<compile_context>
chip_gen: v7x
topology: tpu7x:2x2x1
jax: 0.10.0
libtpu: 0.0.40
codegen_flags: <defaults>
</compile_context>

<pallas_src>
import math

import jax
import jax.numpy as jnp
from jax import lax
from jax.experimental import pallas as pl
from jax.experimental.pallas import tpu as pltpu

QUERY_DIM = 768          # query_dim / cross_attention_dim
CROSS_DIM = 768
HEADS = 8
DIM_HEAD = 64
INNER_DIM = HEADS * DIM_HEAD   # 512
SCALE = 1.0 / math.sqrt(DIM_HEAD)


def _aligner_attn_kernel(char_ref, img_ref, wq_ref, wk_ref, wv_ref,
                         wo_ref, bo_ref, out_ref):
    """Cross attention for one batch element with a rank-1 (single-row) query.

    char_ref: (1, 1, 768)    the CLS text embedding (single query row)
    img_ref : (1, S_kv, 768) keys/values (image embeddings)
    wq/wk/wv: (768, 512) bf16; wo: (512, 768) bf16; bo: (1, 768) f32
    out_ref : (1, S_kv, 768) -- every row is the same attention output row
    """
    x_bf = char_ref[0].astype(jnp.bfloat16)     # (1, 768)
    ctx_bf = img_ref[0].astype(jnp.bfloat16)    # (S, 768)

    # Projections on the MXU (bf16 inputs, f32 accumulation). SCALE folded into q once.
    q = jnp.dot(x_bf, wq_ref[...], preferred_element_type=jnp.float32) * SCALE  # (1, 512)
    k = jnp.dot(ctx_bf, wk_ref[...], preferred_element_type=jnp.float32)        # (S, 512)
    v = jnp.dot(ctx_bf, wv_ref[...], preferred_element_type=jnp.float32)        # (S, 512)

    # Accumulate per-head contributions directly into the output projection:
    #   out_row = bo + sum_h softmax(q_h k_h^T) v_h @ wo[h*64:(h+1)*64, :]
    # This avoids concatenating eight lane-width-64 pieces.  After the rank-1 collapse
    # the per-head matmuls are tiny; the dominant work is the K/V projections above.
    out_row = bo_ref[...].astype(jnp.float32)                                    # (1, 768)
    for h in range(HEADS):                       # static unroll over heads
        sl = slice(h * DIM_HEAD, (h + 1) * DIM_HEAD)
        qh, kh, vh = q[:, sl], k[:, sl], v[:, sl]
        # q_h @ k_h^T without an explicit transpose (K consumed transposed by the MXU).
        s = lax.dot_general(qh, kh,
                            dimension_numbers=(((1,), (1,)), ((), ())),
                            preferred_element_type=jnp.float32)                  # (1, S)
        m = jnp.max(s, axis=-1, keepdims=True)
        e = jnp.exp(s - m)
        l = jnp.sum(e, axis=-1, keepdims=True)
        p = e * pl.reciprocal(l, approx=True)                                    # (1, S)
        o_h = jnp.dot(p, vh, preferred_element_type=jnp.float32)                 # (1, 64)
        out_row = out_row + jnp.dot(o_h.astype(jnp.bfloat16), wo_ref[sl, :],
                                    preferred_element_type=jnp.float32)          # (1, 768)

    # Lane-dense writeback: broadcast the single row across the sequence (sublane bcast).
    s_len = out_ref.shape[1]
    out_ref[0] = jnp.broadcast_to(out_row, (s_len, QUERY_DIM)).astype(out_ref.dtype)


def init_aligner_params(key):
    """Deterministic init matching the nn.Linear shapes of diffusers Attention.

    to_q/to_k/to_v: Linear(768, 512, bias=False); to_out[0]: Linear(512, 768).
    Weights are stored transposed (in, out) for right-multiplication; projection
    weights are stored in bf16 for the MXU fast path (bias stays f32).
    """
    ks = jax.random.split(key, 5)

    def uniform(k, shape, fan_in):
        bound = 1.0 / math.sqrt(fan_in)
        return jax.random.uniform(k, shape, jnp.float32, -bound, bound)

    wq = uniform(ks[0], (QUERY_DIM, INNER_DIM), QUERY_DIM).astype(jnp.bfloat16)
    wk = uniform(ks[1], (CROSS_DIM, INNER_DIM), CROSS_DIM).astype(jnp.bfloat16)
    wv = uniform(ks[2], (CROSS_DIM, INNER_DIM), CROSS_DIM).astype(jnp.bfloat16)
    wo = uniform(ks[3], (INNER_DIM, QUERY_DIM), INNER_DIM).astype(jnp.bfloat16)
    bo = uniform(ks[4], (1, QUERY_DIM), INNER_DIM)            # f32
    return wq, wk, wv, wo, bo


def aligner_cls_forward(image_embeds, text_embeds, captions, params):
    """image_embeds: (B, S, 768); text_embeds: tuple, text_embeds[0]: (B, 768)."""
    del captions  # unused in aligner_cls.forward
    char = text_embeds[0][:, None, :]                         # (B, 1, 768) -- NOT expanded
    B, S, _ = image_embeds.shape

    wq, wk, wv, wo, bo = params
    return pl.pallas_call(
        _aligner_attn_kernel,
        out_shape=jax.ShapeDtypeStruct((B, S, QUERY_DIM), image_embeds.dtype),
        grid_spec=pltpu.PrefetchScalarGridSpec(
            num_scalar_prefetch=0,
            grid=(B,),
            in_specs=[
                pl.BlockSpec((1, 1, QUERY_DIM), lambda b: (b, 0, 0)),
                pl.BlockSpec((1, S, CROSS_DIM), lambda b: (b, 0, 0)),
                pl.BlockSpec((QUERY_DIM, INNER_DIM), lambda b: (0, 0)),
                pl.BlockSpec((CROSS_DIM, INNER_DIM), lambda b: (0, 0)),
                pl.BlockSpec((CROSS_DIM, INNER_DIM), lambda b: (0, 0)),
                pl.BlockSpec((INNER_DIM, QUERY_DIM), lambda b: (0, 0)),
                pl.BlockSpec((1, QUERY_DIM), lambda b: (0, 0)),
            ],
            out_specs=pl.BlockSpec((1, S, QUERY_DIM), lambda b: (b, 0, 0)),
        ),
        compiler_params=pltpu.CompilerParams(
            dimension_semantics=("parallel",),
            # Explicit scoped-VMEM limit (v5e default is 16 MiB; stays below v7x's
            # 64 MiB physical).  For very large S on v7x, add a second "parallel"
            # S-tile grid axis with an online softmax over the KV blocks.
            vmem_limit_bytes=48 * 1024 * 1024,
        ),
    )(char, image_embeds, wq, wk, wv, wo, bo)


def _reference_forward(image_embeds, text_embeds, params):
    """Plain-JAX f32 reference of the same math (uses the bf16-stored weights upcast)."""
    wq, wk, wv, wo, bo = [p.astype(jnp.float32) for p in params]
    char = text_embeds[0]
    B, S, D = image_embeds.shape
    x = jnp.broadcast_to(char[:, None, :], (B, S, D))
    q = x @ wq
    k = image_embeds @ wk
    v = image_embeds @ wv
    qh = q.reshape(B, S, HEADS, DIM_HEAD).transpose(0, 2, 1, 3)
    kh = k.reshape(B, S, HEADS, DIM_HEAD).transpose(0, 2, 1, 3)
    vh = v.reshape(B, S, HEADS, DIM_HEAD).transpose(0, 2, 1, 3)
    s = jnp.einsum('bhqd,bhkd->bhqk', qh, kh) * SCALE
    p = jax.nn.softmax(s, axis=-1)
    o = jnp.einsum('bhqk,bhkd->bhqd', p, vh)
    o = o.transpose(0, 2, 1, 3).reshape(B, S, INNER_DIM)
    return o @ wo + bo[0]


if __name__ == "__main__":
    key = jax.random.PRNGKey(0)
    k_img, k_cls, k_tok, k_par = jax.random.split(key, 4)

    B, S_IMG, L_TXT = 2, 16, 8
    image_embeds = jax.random.normal(k_img, (B, S_IMG, QUERY_DIM), jnp.float32)
    # text_embeds modeled as (cls_embeds, token_embeds); forward uses element [0].
    text_cls = jax.random.normal(k_cls, (B, QUERY_DIM), jnp.float32)
    text_tokens = jax.random.normal(k_tok, (B, L_TXT, QUERY_DIM), jnp.float32)
    text_embeds = (text_cls, text_tokens)
    captions = ["a character walking in the park", "a scenic landscape"]

    params = init_aligner_params(k_par)

    out = aligner_cls_forward(image_embeds, text_embeds, captions, params)
    out = jax.block_until_ready(out)

    ref = _reference_forward(image_embeds, text_embeds, params)
    assert out.shape == (B, S_IMG, QUERY_DIM)
    # bf16 MXU inputs + approx EUP reciprocal inside the kernel vs an f32 reference.
    assert jnp.allclose(out, ref, atol=5e-2, rtol=5e-2), "mismatch vs reference"

    print("KERNEL_OK")
</pallas_src>

<mosaic_0001>
module attributes {stable_mosaic.version = 11 : i64} {
  func.func @_aligner_attn_kernel(%arg0: i32, %arg1: memref<1x1x768xf32, #tpu.memory_space<vmem>>, %arg2: memref<1x16x768xf32, #tpu.memory_space<vmem>>, %arg3: memref<768x512xbf16, #tpu.memory_space<vmem>>, %arg4: memref<768x512xbf16, #tpu.memory_space<vmem>>, %arg5: memref<768x512xbf16, #tpu.memory_space<vmem>>, %arg6: memref<512x768xbf16, #tpu.memory_space<vmem>>, %arg7: memref<1x768xf32, #tpu.memory_space<vmem>>, %arg8: memref<1x16x768xf32, #tpu.memory_space<vmem>>) attributes {dimension_semantics = [#tpu.dimension_semantics<parallel>], iteration_bounds = array<i64: 2>, scalar_prefetch = 0 : i64, scratch_operands = 0 : i64, tpu.core_type = #tpu.core_type<tc>, window_params = [{transform_indices = @transform_0, window_bounds = array<i64: 1, 1, 768>}, {transform_indices = @transform_1, window_bounds = array<i64: 1, 16, 768>}, {pipeline_mode = #tpu.pipeline_mode<synchronous>, transform_indices = @transform_2, window_bounds = array<i64: 768, 512>}, {pipeline_mode = #tpu.pipeline_mode<synchronous>, transform_indices = @transform_3, window_bounds = array<i64: 768, 512>}, {pipeline_mode = #tpu.pipeline_mode<synchronous>, transform_indices = @transform_4, window_bounds = array<i64: 768, 512>}, {pipeline_mode = #tpu.pipeline_mode<synchronous>, transform_indices = @transform_5, window_bounds = array<i64: 512, 768>}, {pipeline_mode = #tpu.pipeline_mode<synchronous>, transform_indices = @transform_6, window_bounds = array<i64: 1, 768>}, {transform_indices = @transform_7, window_bounds = array<i64: 1, 16, 768>}]} {
    %c0 = arith.constant 0 : index
    %c0_0 = arith.constant 0 : index
    %c0_1 = arith.constant 0 : index
    %0 = vector.load %arg1[%c0, %c0_0, %c0_1] : memref<1x1x768xf32, #tpu.memory_space<vmem>>, vector<1x1x768xf32>
    %1 = vector.shape_cast %0 : vector<1x1x768xf32> to vector<1x768xf32>
    %2 = arith.truncf %1 : vector<1x768xf32> to vector<1x768xbf16>
    %c0_2 = arith.constant 0 : index
    %c0_3 = arith.constant 0 : index
    %c0_4 = arith.constant 0 : index
    %3 = vector.load %arg2[%c0_2, %c0_3, %c0_4] : memref<1x16x768xf32, #tpu.memory_space<vmem>>, vector<1x16x768xf32>
    %4 = vector.shape_cast %3 : vector<1x16x768xf32> to vector<16x768xf32>
    %5 = arith.truncf %4 : vector<16x768xf32> to vector<16x768xbf16>
    %c0_5 = arith.constant 0 : index
    %c0_6 = arith.constant 0 : index
    %6 = vector.load %arg3[%c0_5, %c0_6] : memref<768x512xbf16, #tpu.memory_space<vmem>>, vector<768x512xbf16>
    %cst = arith.constant dense<0.000000e+00> : vector<1x512xf32>
    %7 = tpu.matmul %2, %6, %cst {dimension_numbers = #tpu.dot_dimension_numbers<[1], [0], [0], [1], [0, 0, 1, 1], [], []>} : vector<1x768xbf16>, vector<768x512xbf16>, vector<1x512xf32> -> vector<1x512xf32>
    %cst_7 = arith.constant 1.250000e-01 : f32
    %8 = vector.broadcast %cst_7 : f32 to vector<1x512xf32>
    %9 = arith.mulf %7, %8 : vector<1x512xf32>
    %c0_8 = arith.constant 0 : index
    %c0_9 = arith.constant 0 : index
    %10 = vector.load %arg4[%c0_8, %c0_9] : memref<768x512xbf16, #tpu.memory_space<vmem>>, vector<768x512xbf16>
    %cst_10 = arith.constant dense<0.000000e+00> : vector<16x512xf32>
    %11 = tpu.matmul %5, %10, %cst_10 {dimension_numbers = #tpu.dot_dimension_numbers<[1], [0], [0], [1], [0, 0, 1, 1], [], []>} : vector<16x768xbf16>, vector<768x512xbf16>, vector<16x512xf32> -> vector<16x512xf32>
    %c0_11 = arith.constant 0 : index
    %c0_12 = arith.constant 0 : index
    %12 = vector.load %arg5[%c0_11, %c0_12] : memref<768x512xbf16, #tpu.memory_space<vmem>>, vector<768x512xbf16>
    %cst_13 = arith.constant dense<0.000000e+00> : vector<16x512xf32>
    %13 = tpu.matmul %5, %12, %cst_13 {dimension_numbers = #tpu.dot_dimension_numbers<[1], [0], [0], [1], [0, 0, 1, 1], [], []>} : vector<16x768xbf16>, vector<768x512xbf16>, vector<16x512xf32> -> vector<16x512xf32>
    %c0_14 = arith.constant 0 : index
    %c0_15 = arith.constant 0 : index
    %14 = vector.load %arg7[%c0_14, %c0_15] : memref<1x768xf32, #tpu.memory_space<vmem>>, vector<1x768xf32>
    %15 = vector.extract_strided_slice %9 {offsets = [0, 0], sizes = [1, 64], strides = [1, 1]} : vector<1x512xf32> to vector<1x64xf32>
    %16 = vector.extract_strided_slice %11 {offsets = [0, 0], sizes = [16, 64], strides = [1, 1]} : vector<16x512xf32> to vector<16x64xf32>
    %17 = vector.extract_strided_slice %13 {offsets = [0, 0], sizes = [16, 64], strides = [1, 1]} : vector<16x512xf32> to vector<16x64xf32>
    %cst_16 = arith.constant dense<0.000000e+00> : vector<1x16xf32>
    %18 = tpu.matmul %15, %16, %cst_16 {dimension_numbers = #tpu.dot_dimension_numbers<[1], [1], [0], [0], [0, 0, 1, 0], [], []>} : vector<1x64xf32>, vector<16x64xf32>, vector<1x16xf32> -> vector<1x16xf32>
    %cst_17 = arith.constant dense<0xFF800000> : vector<1xf32>
    %19 = vector.multi_reduction <maximumf>, %18, %cst_17 [1] : vector<1x16xf32> to vector<1xf32>
    %20 = vector.shape_cast %19 : vector<1xf32> to vector<1x1xf32>
    %21 = vector.broadcast %20 : vector<1x1xf32> to vector<1x16xf32>
    %22 = arith.subf %18, %21 : vector<1x16xf32>
    %23 = math.exp %22 : vector<1x16xf32>
    %cst_18 = arith.constant dense<0.000000e+00> : vector<1xf32>
    %24 = vector.multi_reduction <add>, %23, %cst_18 [1] : vector<1x16xf32> to vector<1xf32>
    %25 = vector.shape_cast %24 : vector<1xf32> to vector<1x1xf32>
    %26 = tpu.reciprocal %25 {approx = true} : vector<1x1xf32> -> vector<1x1xf32>
    %27 = vector.broadcast %26 : vector<1x1xf32> to vector<1x16xf32>
    %28 = arith.mulf %23, %27 : vector<1x16xf32>
    %cst_19 = arith.constant dense<0.000000e+00> : vector<1x64xf32>
    %29 = tpu.matmul %28, %17, %cst_19 {dimension_numbers = #tpu.dot_dimension_numbers<[1], [0], [0], [1], [0, 0, 1, 1], [], []>} : vector<1x16xf32>, vector<16x64xf32>, vector<1x64xf32> -> vector<1x64xf32>
    %30 = arith.truncf %29 : vector<1x64xf32> to vector<1x64xbf16>
    %c0_20 = arith.constant 0 : index
    %c0_21 = arith.constant 0 : index
    %31 = vector.load %arg6[%c0_20, %c0_21] : memref<512x768xbf16, #tpu.memory_space<vmem>>, vector<64x768xbf16>
    %cst_22 = arith.constant dense<0.000000e+00> : vector<1x768xf32>
    %32 = tpu.matmul %30, %31, %cst_22 {dimension_numbers = #tpu.dot_dimension_numbers<[1], [0], [0], [1], [0, 0, 1, 1], [], []>} : vector<1x64xbf16>, vector<64x768xbf16>, vector<1x768xf32> -> vector<1x768xf32>
    %33 = arith.addf %14, %32 : vector<1x768xf32>
    %34 = vector.extract_strided_slice %9 {offsets = [0, 64], sizes = [1, 64], strides = [1, 1]} : vector<1x512xf32> to vector<1x64xf32>
    %35 = vector.extract_strided_slice %11 {offsets = [0, 64], sizes = [16, 64], strides = [1, 1]} : vector<16x512xf32> to vector<16x64xf32>
    %36 = vector.extract_strided_slice %13 {offsets = [0, 64], sizes = [16, 64], strides = [1, 1]} : vector<16x512xf32> to vector<16x64xf32>
    %cst_23 = arith.constant dense<0.000000e+00> : vector<1x16xf32>
    %37 = tpu.matmul %34, %35, %cst_23 {dimension_numbers = #tpu.dot_dimension_numbers<[1], [1], [0], [0], [0, 0, 1, 0], [], []>} : vector<1x64xf32>, vector<16x64xf32>, vector<1x16xf32> -> vector<1x16xf32>
    %cst_24 = arith.constant dense<0xFF800000> : vector<1xf32>
    %38 = vector.multi_reduction <maximumf>, %37, %cst_24 [1] : vector<1x16xf32> to vector<1xf32>
    %39 = vector.shape_cast %38 : vector<1xf32> to vector<1x1xf32>
    %40 = vector.broadcast %39 : vector<1x1xf32> to vector<1x16xf32>
    %41 = arith.subf %37, %40 : vector<1x16xf32>
    %42 = math.exp %41 : vector<1x16xf32>
    %cst_25 = arith.constant dense<0.000000e+00> : vector<1xf32>
    %43 = vector.multi_reduction <add>, %42, %cst_25 [1] : vector<1x16xf32> to vector<1xf32>
    %44 = vector.shape_cast %43 : vector<1xf32> to vector<1x1xf32>
    %45 = tpu.reciprocal %44 {approx = true} : vector<1x1xf32> -> vector<1x1xf32>
    %46 = vector.broadcast %45 : vector<1x1xf32> to vector<1x16xf32>
    %47 = arith.mulf %42, %46 : vector<1x16xf32>
    %cst_26 = arith.constant dense<0.000000e+00> : vector<1x64xf32>
    %48 = tpu.matmul %47, %36, %cst_26 {dimension_numbers = #tpu.dot_dimension_numbers<[1], [0], [0], [1], [0, 0, 1, 1], [], []>} : vector<1x16xf32>, vector<16x64xf32>, vector<1x64xf32> -> vector<1x64xf32>
    %49 = arith.truncf %48 : vector<1x64xf32> to vector<1x64xbf16>
    %c64 = arith.constant 64 : index
    %c0_27 = arith.constant 0 : index
    %50 = vector.load %arg6[%c64, %c0_27] : memref<512x768xbf16, #tpu.memory_space<vmem>>, vector<64x768xbf16>
    %cst_28 = arith.constant dense<0.000000e+00> : vector<1x768xf32>
    %51 = tpu.matmul %49, %50, %cst_28 {dimension_numbers = #tpu.dot_dimension_numbers<[1], [0], [0], [1], [0, 0, 1, 1], [], []>} : vector<1x64xbf16>, vector<64x768xbf16>, vector<1x768xf32> -> vector<1x768xf32>
    %52 = arith.addf %33, %51 : vector<1x768xf32>
    %53 = vector.extract_strided_slice %9 {offsets = [0, 128], sizes = [1, 64], strides = [1, 1]} : vector<1x512xf32> to vector<1x64xf32>
    %54 = vector.extract_strided_slice %11 {offsets = [0, 128], sizes = [16, 64], strides = [1, 1]} : vector<16x512xf32> to vector<16x64xf32>
    %55 = vector.extract_strided_slice %13 {offsets = [0, 128], sizes = [16, 64], strides = [1, 1]} : vector<16x512xf32> to vector<16x64xf32>
    %cst_29 = arith.constant dense<0.000000e+00> : vector<1x16xf32>
    %56 = tpu.matmul %53, %54, %cst_29 {dimension_numbers = #tpu.dot_dimension_numbers<[1], [1], [0], [0], [0, 0, 1, 0], [], []>} : vector<1x64xf32>, vector<16x64xf32>, vector<1x16xf32> -> vector<1x16xf32>
    %cst_30 = arith.constant dense<0xFF800000> : vector<1xf32>
    %57 = vector.multi_reduction <maximumf>, %56, %cst_30 [1] : vector<1x16xf32> to vector<1xf32>
    %58 = vector.shape_cast %57 : vector<1xf32> to vector<1x1xf32>
    %59 = vector.broadcast %58 : vector<1x1xf32> to vector<1x16xf32>
    %60 = arith.subf %56, %59 : vector<1x16xf32>
    %61 = math.exp %60 : vector<1x16xf32>
    %cst_31 = arith.constant dense<0.000000e+00> : vector<1xf32>
    %62 = vector.multi_reduction <add>, %61, %cst_31 [1] : vector<1x16xf32> to vector<1xf32>
    %63 = vector.shape_cast %62 : vector<1xf32> to vector<1x1xf32>
    %64 = tpu.reciprocal %63 {approx = true} : vector<1x1xf32> -> vector<1x1xf32>
    %65 = vector.broadcast %64 : vector<1x1xf32> to vector<1x16xf32>
    %66 = arith.mulf %61, %65 : vector<1x16xf32>
    %cst_32 = arith.constant dense<0.000000e+00> : vector<1x64xf32>
    %67 = tpu.matmul %66, %55, %cst_32 {dimension_numbers = #tpu.dot_dimension_numbers<[1], [0], [0], [1], [0, 0, 1, 1], [], []>} : vector<1x16xf32>, vector<16x64xf32>, vector<1x64xf32> -> vector<1x64xf32>
    %68 = arith.truncf %67 : vector<1x64xf32> to vector<1x64xbf16>
    %c128 = arith.constant 128 : index
    %c0_33 = arith.constant 0 : index
    %69 = vector.load %arg6[%c128, %c0_33] : memref<512x768xbf16, #tpu.memory_space<vmem>>, vector<64x768xbf16>
    %cst_34 = arith.constant dense<0.000000e+00> : vector<1x768xf32>
    %70 = tpu.matmul %68, %69, %cst_34 {dimension_numbers = #tpu.dot_dimension_numbers<[1], [0], [0], [1], [0, 0, 1, 1], [], []>} : vector<1x64xbf16>, vector<64x768xbf16>, vector<1x768xf32> -> vector<1x768xf32>
    %71 = arith.addf %52, %70 : vector<1x768xf32>
    %72 = vector.extract_strided_slice %9 {offsets = [0, 192], sizes = [1, 64], strides = [1, 1]} : vector<1x512xf32> to vector<1x64xf32>
    %73 = vector.extract_strided_slice %11 {offsets = [0, 192], sizes = [16, 64], strides = [1, 1]} : vector<16x512xf32> to vector<16x64xf32>
    %74 = vector.extract_strided_slice %13 {offsets = [0, 192], sizes = [16, 64], strides = [1, 1]} : vector<16x512xf32> to vector<16x64xf32>
    %cst_35 = arith.constant dense<0.000000e+00> : vector<1x16xf32>
    %75 = tpu.matmul %72, %73, %cst_35 {dimension_numbers = #tpu.dot_dimension_numbers<[1], [1], [0], [0], [0, 0, 1, 0], [], []>} : vector<1x64xf32>, vector<16x64xf32>, vector<1x16xf32> -> vector<1x16xf32>
    %cst_36 = arith.constant dense<0xFF800000> : vector<1xf32>
    %76 = vector.multi_reduction <maximumf>, %75, %cst_36 [1] : vector<1x16xf32> to vector<1xf32>
    %77 = vector.shape_cast %76 : vector<1xf32> to vector<1x1xf32>
    %78 = vector.broadcast %77 : vector<1x1xf32> to vector<1x16xf32>
    %79 = arith.subf %75, %78 : vector<1x16xf32>
    %80 = math.exp %79 : vector<1x16xf32>
    %cst_37 = arith.constant dense<0.000000e+00> : vector<1xf32>
    %81 = vector.multi_reduction <add>, %80, %cst_37 [1] : vector<1x16xf32> to vector<1xf32>
    %82 = vector.shape_cast %81 : vector<1xf32> to vector<1x1xf32>
    %83 = tpu.reciprocal %82 {approx = true} : vector<1x1xf32> -> vector<1x1xf32>
    %84 = vector.broadcast %83 : vector<1x1xf32> to vector<1x16xf32>
    %85 = arith.mulf %80, %84 : vector<1x16xf32>
    %cst_38 = arith.constant dense<0.000000e+00> : vector<1x64xf32>
    %86 = tpu.matmul %85, %74, %cst_38 {dimension_numbers = #tpu.dot_dimension_numbers<[1], [0], [0], [1], [0, 0, 1, 1], [], []>} : vector<1x16xf32>, vector<16x64xf32>, vector<1x64xf32> -> vector<1x64xf32>
    %87 = arith.truncf %86 : vector<1x64xf32> to vector<1x64xbf16>
    %c192 = arith.constant 192 : index
    %c0_39 = arith.constant 0 : index
    %88 = vector.load %arg6[%c192, %c0_39] : memref<512x768xbf16, #tpu.memory_space<vmem>>, vector<64x768xbf16>
    %cst_40 = arith.constant dense<0.000000e+00> : vector<1x768xf32>
    %89 = tpu.matmul %87, %88, %cst_40 {dimension_numbers = #tpu.dot_dimension_numbers<[1], [0], [0], [1], [0, 0, 1, 1], [], []>} : vector<1x64xbf16>, vector<64x768xbf16>, vector<1x768xf32> -> vector<1x768xf32>
    %90 = arith.addf %71, %89 : vector<1x768xf32>
    %91 = vector.extract_strided_slice %9 {offsets = [0, 256], sizes = [1, 64], strides = [1, 1]} : vector<1x512xf32> to vector<1x64xf32>
    %92 = vector.extract_strided_slice %11 {offsets = [0, 256], sizes = [16, 64], strides = [1, 1]} : vector<16x512xf32> to vector<16x64xf32>
    %93 = vector.extract_strided_slice %13 {offsets = [0, 256], sizes = [16, 64], strides = [1, 1]} : vector<16x512xf32> to vector<16x64xf32>
    %cst_41 = arith.constant dense<0.000000e+00> : vector<1x16xf32>
    %94 = tpu.matmul %91, %92, %cst_41 {dimension_numbers = #tpu.dot_dimension_numbers<[1], [1], [0], [0], [0, 0, 1, 0], [], []>} : vector<1x64xf32>, vector<16x64xf32>, vector<1x16xf32> -> vector<1x16xf32>
    %cst_42 = arith.constant dense<0xFF800000> : vector<1xf32>
    %95 = vector.multi_reduction <maximumf>, %94, %cst_42 [1] : vector<1x16xf32> to vector<1xf32>
    %96 = vector.shape_cast %95 : vector<1xf32> to vector<1x1xf32>
    %97 = vector.broadcast %96 : vector<1x1xf32> to vector<1x16xf32>
    %98 = arith.subf %94, %97 : vector<1x16xf32>
    %99 = math.exp %98 : vector<1x16xf32>
    %cst_43 = arith.constant dense<0.000000e+00> : vector<1xf32>
    %100 = vector.multi_reduction <add>, %99, %cst_43 [1] : vector<1x16xf32> to vector<1xf32>
    %101 = vector.shape_cast %100 : vector<1xf32> to vector<1x1xf32>
    %102 = tpu.reciprocal %101 {approx = true} : vector<1x1xf32> -> vector<1x1xf32>
    %103 = vector.broadcast %102 : vector<1x1xf32> to vector<1x16xf32>
    %104 = arith.mulf %99, %103 : vector<1x16xf32>
    %cst_44 = arith.constant dense<0.000000e+00> : vector<1x64xf32>
    %105 = tpu.matmul %104, %93, %cst_44 {dimension_numbers = #tpu.dot_dimension_numbers<[1], [0], [0], [1], [0, 0, 1, 1], [], []>} : vector<1x16xf32>, vector<16x64xf32>, vector<1x64xf32> -> vector<1x64xf32>
    %106 = arith.truncf %105 : vector<1x64xf32> to vector<1x64xbf16>
    %c256 = arith.constant 256 : index
    %c0_45 = arith.constant 0 : index
    %107 = vector.load %arg6[%c256, %c0_45] : memref<512x768xbf16, #tpu.memory_space<vmem>>, vector<64x768xbf16>
    %cst_46 = arith.constant dense<0.000000e+00> : vector<1x768xf32>
    %108 = tpu.matmul %106, %107, %cst_46 {dimension_numbers = #tpu.dot_dimension_numbers<[1], [0], [0], [1], [0, 0, 1, 1], [], []>} : vector<1x64xbf16>, vector<64x768xbf16>, vector<1x768xf32> -> vector<1x768xf32>
    %109 = arith.addf %90, %108 : vector<1x768xf32>
    %110 = vector.extract_strided_slice %9 {offsets = [0, 320], sizes = [1, 64], strides = [1, 1]} : vector<1x512xf32> to vector<1x64xf32>
    %111 = vector.extract_strided_slice %11 {offsets = [0, 320], sizes = [16, 64], strides = [1, 1]} : vector<16x512xf32> to vector<16x64xf32>
    %112 = vector.extract_strided_slice %13 {offsets = [0, 320], sizes = [16, 64], strides = [1, 1]} : vector<16x512xf32> to vector<16x64xf32>
    %cst_47 = arith.constant dense<0.000000e+00> : vector<1x16xf32>
    %113 = tpu.matmul %110, %111, %cst_47 {dimension_numbers = #tpu.dot_dimension_numbers<[1], [1], [0], [0], [0, 0, 1, 0], [], []>} : vector<1x64xf32>, vector<16x64xf32>, vector<1x16xf32> -> vector<1x16xf32>
    %cst_48 = arith.constant dense<0xFF800000> : vector<1xf32>
    %114 = vector.multi_reduction <maximumf>, %113, %cst_48 [1] : vector<1x16xf32> to vector<1xf32>
    %115 = vector.shape_cast %114 : vector<1xf32> to vector<1x1xf32>
    %116 = vector.broadcast %115 : vector<1x1xf32> to vector<1x16xf32>
    %117 = arith.subf %113, %116 : vector<1x16xf32>
    %118 = math.exp %117 : vector<1x16xf32>
    %cst_49 = arith.constant dense<0.000000e+00> : vector<1xf32>
    %119 = vector.multi_reduction <add>, %118, %cst_49 [1] : vector<1x16xf32> to vector<1xf32>
    %120 = vector.shape_cast %119 : vector<1xf32> to vector<1x1xf32>
    %121 = tpu.reciprocal %120 {approx = true} : vector<1x1xf32> -> vector<1x1xf32>
    %122 = vector.broadcast %121 : vector<1x1xf32> to vector<1x16xf32>
    %123 = arith.mulf %118, %122 : vector<1x16xf32>
    %cst_50 = arith.constant dense<0.000000e+00> : vector<1x64xf32>
    %124 = tpu.matmul %123, %112, %cst_50 {dimension_numbers = #tpu.dot_dimension_numbers<[1], [0], [0], [1], [0, 0, 1, 1], [], []>} : vector<1x16xf32>, vector<16x64xf32>, vector<1x64xf32> -> vector<1x64xf32>
    %125 = arith.truncf %124 : vector<1x64xf32> to vector<1x64xbf16>
    %c320 = arith.constant 320 : index
    %c0_51 = arith.constant 0 : index
    %126 = vector.load %arg6[%c320, %c0_51] : memref<512x768xbf16, #tpu.memory_space<vmem>>, vector<64x768xbf16>
    %cst_52 = arith.constant dense<0.000000e+00> : vector<1x768xf32>
    %127 = tpu.matmul %125, %126, %cst_52 {dimension_numbers = #tpu.dot_dimension_numbers<[1], [0], [0], [1], [0, 0, 1, 1], [], []>} : vector<1x64xbf16>, vector<64x768xbf16>, vector<1x768xf32> -> vector<1x768xf32>
    %128 = arith.addf %109, %127 : vector<1x768xf32>
    %129 = vector.extract_strided_slice %9 {offsets = [0, 384], sizes = [1, 64], strides = [1, 1]} : vector<1x512xf32> to vector<1x64xf32>
    %130 = vector.extract_strided_slice %11 {offsets = [0, 384], sizes = [16, 64], strides = [1, 1]} : vector<16x512xf32> to vector<16x64xf32>
    %131 = vector.extract_strided_slice %13 {offsets = [0, 384], sizes = [16, 64], strides = [1, 1]} : vector<16x512xf32> to vector<16x64xf32>
    %cst_53 = arith.constant dense<0.000000e+00> : vector<1x16xf32>
    %132 = tpu.matmul %129, %130, %cst_53 {dimension_numbers = #tpu.dot_dimension_numbers<[1], [1], [0], [0], [0, 0, 1, 0], [], []>} : vector<1x64xf32>, vector<16x64xf32>, vector<1x16xf32> -> vector<1x16xf32>
    %cst_54 = arith.constant dense<0xFF800000> : vector<1xf32>
    %133 = vector.multi_reduction <maximumf>, %132, %cst_54 [1] : vector<1x16xf32> to vector<1xf32>
    %134 = vector.shape_cast %133 : vector<1xf32> to vector<1x1xf32>
    %135 = vector.broadcast %134 : vector<1x1xf32> to vector<1x16xf32>
    %136 = arith.subf %132, %135 : vector<1x16xf32>
    %137 = math.exp %136 : vector<1x16xf32>
    %cst_55 = arith.constant dense<0.000000e+00> : vector<1xf32>
    %138 = vector.multi_reduction <add>, %137, %cst_55 [1] : vector<1x16xf32> to vector<1xf32>
    %139 = vector.shape_cast %138 : vector<1xf32> to vector<1x1xf32>
    %140 = tpu.reciprocal %139 {approx = true} : vector<1x1xf32> -> vector<1x1xf32>
    %141 = vector.broadcast %140 : vector<1x1xf32> to vector<1x16xf32>
    %142 = arith.mulf %137, %141 : vector<1x16xf32>
    %cst_56 = arith.constant dense<0.000000e+00> : vector<1x64xf32>
    %143 = tpu.matmul %142, %131, %cst_56 {dimension_numbers = #tpu.dot_dimension_numbers<[1], [0], [0], [1], [0, 0, 1, 1], [], []>} : vector<1x16xf32>, vector<16x64xf32>, vector<1x64xf32> -> vector<1x64xf32>
    %144 = arith.truncf %143 : vector<1x64xf32> to vector<1x64xbf16>
    %c384 = arith.constant 384 : index
    %c0_57 = arith.constant 0 : index
    %145 = vector.load %arg6[%c384, %c0_57] : memref<512x768xbf16, #tpu.memory_space<vmem>>, vector<64x768xbf16>
    %cst_58 = arith.constant dense<0.000000e+00> : vector<1x768xf32>
    %146 = tpu.matmul %144, %145, %cst_58 {dimension_numbers = #tpu.dot_dimension_numbers<[1], [0], [0], [1], [0, 0, 1, 1], [], []>} : vector<1x64xbf16>, vector<64x768xbf16>, vector<1x768xf32> -> vector<1x768xf32>
    %147 = arith.addf %128, %146 : vector<1x768xf32>
    %148 = vector.extract_strided_slice %9 {offsets = [0, 448], sizes = [1, 64], strides = [1, 1]} : vector<1x512xf32> to vector<1x64xf32>
    %149 = vector.extract_strided_slice %11 {offsets = [0, 448], sizes = [16, 64], strides = [1, 1]} : vector<16x512xf32> to vector<16x64xf32>
    %150 = vector.extract_strided_slice %13 {offsets = [0, 448], sizes = [16, 64], strides = [1, 1]} : vector<16x512xf32> to vector<16x64xf32>
    %cst_59 = arith.constant dense<0.000000e+00> : vector<1x16xf32>
    %151 = tpu.matmul %148, %149, %cst_59 {dimension_numbers = #tpu.dot_dimension_numbers<[1], [1], [0], [0], [0, 0, 1, 0], [], []>} : vector<1x64xf32>, vector<16x64xf32>, vector<1x16xf32> -> vector<1x16xf32>
    %cst_60 = arith.constant dense<0xFF800000> : vector<1xf32>
    %152 = vector.multi_reduction <maximumf>, %151, %cst_60 [1] : vector<1x16xf32> to vector<1xf32>
    %153 = vector.shape_cast %152 : vector<1xf32> to vector<1x1xf32>
    %154 = vector.broadcast %153 : vector<1x1xf32> to vector<1x16xf32>
    %155 = arith.subf %151, %154 : vector<1x16xf32>
    %156 = math.exp %155 : vector<1x16xf32>
    %cst_61 = arith.constant dense<0.000000e+00> : vector<1xf32>
    %157 = vector.multi_reduction <add>, %156, %cst_61 [1] : vector<1x16xf32> to vector<1xf32>
    %158 = vector.shape_cast %157 : vector<1xf32> to vector<1x1xf32>
    %159 = tpu.reciprocal %158 {approx = true} : vector<1x1xf32> -> vector<1x1xf32>
    %160 = vector.broadcast %159 : vector<1x1xf32> to vector<1x16xf32>
    %161 = arith.mulf %156, %160 : vector<1x16xf32>
    %cst_62 = arith.constant dense<0.000000e+00> : vector<1x64xf32>
    %162 = tpu.matmul %161, %150, %cst_62 {dimension_numbers = #tpu.dot_dimension_numbers<[1], [0], [0], [1], [0, 0, 1, 1], [], []>} : vector<1x16xf32>, vector<16x64xf32>, vector<1x64xf32> -> vector<1x64xf32>
    %163 = arith.truncf %162 : vector<1x64xf32> to vector<1x64xbf16>
    %c448 = arith.constant 448 : index
    %c0_63 = arith.constant 0 : index
    %164 = vector.load %arg6[%c448, %c0_63] : memref<512x768xbf16, #tpu.memory_space<vmem>>, vector<64x768xbf16>
    %cst_64 = arith.constant dense<0.000000e+00> : vector<1x768xf32>
    %165 = tpu.matmul %163, %164, %cst_64 {dimension_numbers = #tpu.dot_dimension_numbers<[1], [0], [0], [1], [0, 0, 1, 1], [], []>} : vector<1x64xbf16>, vector<64x768xbf16>, vector<1x768xf32> -> vector<1x768xf32>
    %166 = arith.addf %147, %165 : vector<1x768xf32>
    %167 = vector.shape_cast %166 : vector<1x768xf32> to vector<1x768xf32>
    %168 = vector.broadcast %167 : vector<1x768xf32> to vector<16x768xf32>
    %c0_65 = arith.constant 0 : index
    %c0_66 = arith.constant 0 : index
    %c0_67 = arith.constant 0 : index
    %169 = vector.load %arg8[%c0_65, %c0_66, %c0_67] : memref<1x16x768xf32, #tpu.memory_space<vmem>>, vector<1x16x768xf32>
    %170 = vector.shape_cast %169 : vector<1x16x768xf32> to vector<16x768xf32>
    %171 = vector.shape_cast %168 : vector<16x768xf32> to vector<1x16x768xf32>
    tpu.vector_store %arg8[%c0_65, %c0_66, %c0_67], %171 {strides = array<i32>} : memref<1x16x768xf32, #tpu.memory_space<vmem>>, vector<1x16x768xf32>,
    return
  }
  func.func @transform_0(%arg0: i32) -> (i32, i32, i32) {
    %c0_i32 = arith.constant 0 : i32
    %c0_i32_0 = arith.constant 0 : i32
    %c0_i32_1 = arith.constant 0 : i32
    return %arg0, %c0_i32, %c0_i32_0 : i32, i32, i32
  }
  func.func @transform_1(%arg0: i32) -> (i32, i32, i32) {
    %c0_i32 = arith.constant 0 : i32
    %c0_i32_0 = arith.constant 0 : i32
    %c0_i32_1 = arith.constant 0 : i32
    return %arg0, %c0_i32, %c0_i32_0 : i32, i32, i32
  }
  func.func @transform_2(%arg0: i32) -> (i32, i32) {
    %c0_i32 = arith.constant 0 : i32
    %c0_i32_0 = arith.constant 0 : i32
    %c0_i32_1 = arith.constant 0 : i32
    return %c0_i32, %c0_i32_0 : i32, i32
  }
  func.func @transform_3(%arg0: i32) -> (i32, i32) {
    %c0_i32 = arith.constant 0 : i32
    %c0_i32_0 = arith.constant 0 : i32
    %c0_i32_1 = arith.constant 0 : i32
    return %c0_i32, %c0_i32_0 : i32, i32
  }
  func.func @transform_4(%arg0: i32) -> (i32, i32) {
    %c0_i32 = arith.constant 0 : i32
    %c0_i32_0 = arith.constant 0 : i32
    %c0_i32_1 = arith.constant 0 : i32
    return %c0_i32, %c0_i32_0 : i32, i32
  }
  func.func @transform_5(%arg0: i32) -> (i32, i32) {
    %c0_i32 = arith.constant 0 : i32
    %c0_i32_0 = arith.constant 0 : i32
    %c0_i32_1 = arith.constant 0 : i32
    return %c0_i32, %c0_i32_0 : i32, i32
  }
  func.func @transform_6(%arg0: i32) -> (i32, i32) {
    %c0_i32 = arith.constant 0 : i32
    %c0_i32_0 = arith.constant 0 : i32
    %c0_i32_1 = arith.constant 0 : i32
    return %c0_i32, %c0_i32_0 : i32, i32
  }
  func.func @transform_7(%arg0: i32) -> (i32, i32, i32) {
    %c0_i32 = arith.constant 0 : i32
    %c0_i32_0 = arith.constant 0 : i32
    %c0_i32_1 = arith.constant 0 : i32
    return %arg0, %c0_i32, %c0_i32_0 : i32, i32, i32
  }
}

</mosaic_0001>

<bundles_post_ra>
// kernel: tpu_custom_call.1
= control target key start
LH: loop header
LB: loop body
LE: loop exit
PB: predicated region body
PF: predicated region fallthrough
CT: control target
= control target key end

     0   :  { %s12325_s0 = inlined_call_operand.hbm [shape: f32[2,1,768], index: 0, kind: input, shape index: {}]   ;;  %s12326_s1 = inlined_call_operand.hbm [shape: f32[2,16,768], index: 1, kind: input, shape index: {}]   ;;  %s12327_s2 = inlined_call_operand.hbm [shape: bf16[768,512], index: 2, kind: input, shape index: {}]   ;;  %s12328_s3 = inlined_call_operand.hbm [shape: bf16[768,512], index: 3, kind: input, shape index: {}]   ;;  %s12329_s4 = inlined_call_operand.hbm [shape: bf16[768,512], index: 4, kind: input, shape index: {}]   ;;  %s12330_s5 = inlined_call_operand.hbm [shape: bf16[512,768], index: 5, kind: input, shape index: {}]   ;;  %s12331_s6 = inlined_call_operand.vmem [shape: f32[1,768], index: 6, kind: input, shape index: {}]   ;;  %s12332_s7 = inlined_call_operand.hbm [shape: f32[2,16,768], index: 7, kind: output, shape index: {}]  }
   0x1   :  { %12336 = sst [smem:[#allocation20_spill]] %s12325_s0 }
   0x2   :  { %12337 = sst [smem:[#allocation21_spill]] %s12327_s2 }
   0x3   :  { %12338 = sst [smem:[#allocation22_spill]] %s12328_s3 }
   0x4   :  { %12 = vsyncpa [#allocation3], 0 }
   0x5   :  { %14 = vsyncpa [#allocation3 + $0x1], 0 }
   0x6   :  { %15 = vsyncpa [#allocation6], 0 }
   0x7   :  { %17 = vsyncpa [#allocation6 + $0x1], 0 }
   0x8   :  { %18 = vsyncpa [#allocation9], 0 }
   0x9   :  { %19 = vsyncpa [#allocation12], 0 }
   0xa   :  { %20 = vsyncpa [#allocation4], 0 }
   0xb   :  { %22 = vsyncpa [#allocation4 + $0x1], 0  ;;  %s11527_s24 = smov 0   ;;  %s11529_s25 = smov 0  }
   0xc   :  { %s11531_s26 = smov 0   ;;  %s11533_s27 = smov 0  }
   0xd LB: > { %s11466_s28 = smov [#allocation7]   ;;  %s11548_s30 = sadd.s32 4294967295, %s11464_s27   ;;  %s11464_s27 = sphi %s11533_s27, %s12366_s27   ;;  %s11460_s26 = sphi %s11531_s26, %s12365_s26   ;;  %s11456_s25 = sphi %s11529_s25, %s12364_s25   ;;  %s11452_s24 = sphi %s11527_s24, %s12363_s24  }
   0xe   : > { %s228_s29 = sshll.u32 %s11466_s28, 4  ;;  %p8768_p0 = scmp.ge.s32.totalorder %s11464_s27, 1  ;;  %s11553_s29 = int_to_ptr.vmem [resolvable:$true] %s228_s29 }
   0xf   : > { %p12333_p1 = scmp.eq.s32.totalorder %s11548_s30, 0  ;;  %p216_p2 = scmp.lt.s32.totalorder %s11464_s27, 3 }
  0x10   : > { %s11467_s9 = smov [#allocation8]   ;;  %s11468_s12 = smov [#allocation10]  }
  0x11   : > { %p11555_p3 = pnand %p8768_p0, %p216_p2  ;;  %s241_s10 = sshll.u32 %s11467_s9, 4  ;;  %s11568_s10 = int_to_ptr.vmem [resolvable:$true] %s241_s10 }
  0x12   : > { %s254_s13 = sshll.u32 %s11468_s12, 4  ;;  %s12341_s2 = sld [smem:[#allocation21_spill]]  ;;  %s11570_s13 = int_to_ptr.vmem [resolvable:$true] %s254_s13 }
  0x13   : > { %s12339_s8 = scalar_select %p11555_p3, 1, 0 }
  0x14   : > { %p9901_p5 = pneg %p11555_p3 }
  0x16   : > { %p11564_p6 = pnand %p9901_p5, %p12333_p1 }
  0x18   : > { %s11210_s16 = scalar_lea.hbm %s12341_s2, 24576  ;;  %p11580_p8 = pneg %p11564_p6 }
  0x19   : > { %p11211_p7 = scmp.ne.s32.totalorder %s12341_s2, %s11210_s16  ;;  %p11217_p11 = scmp.lt.u32.totalorder %s11210_s16, %s12341_s2 }
  0x1b   : > { %p11213_p9 = pnand %p11580_p8, %p11211_p7 }
  0x1d   : > { %p11214_p10 = pneg %p11213_p9 }
  0x1f   : > { %p11219_p12 = pnand %p11217_p11, %p11214_p10 }
  0x21   : > { %11222 = shalt.err (!%p11219_p12)
}
  0x22   : > { %s11223_s22 = scalar_lea.vmem %s11553_s29, 24576  ;;  %p11231_p5 = scmp.lt.s32.totalorder %s11553_s29, %s11553_s29 }
  0x23   : > { %p11224_p13 = scmp.ne.s32.totalorder %s11553_s29, %s11223_s22  ;;  %p11232_p4 = scmp.lt.s32.totalorder %s11223_s22, %s11223_s22 }
  0x25   : > { %p11226_p0 = pnand %p11224_p13, %p11580_p8  ;;  %p11233_p7 = por %p11232_p4, %p11231_p5 }
  0x27   : > { %p11227_p2 = pneg %p11226_p0 }
  0x29   : > { %p11234_p9 = pnand %p11233_p7, %p11227_p2 }
  0x2b   : > { %11237 = shalt.err (!%p11234_p9)
}
  0x2c   : > { %s11469_s23 = smov 256   ;;  %s11470_s28 = smov 16  }
  0x2d   : > { %9904 = dma.hbm_to_vmem [thread:$0]  (!%p11564_p6), %s12341_s2, 24576, %s11553_s29, [#allocation6], %s11469_s23, %s11469_s23, %s11470_s28  }
  0x2e   : > { %s12343_s3 = sld [smem:[#allocation22_spill]] }
  0x34   : > { %s11238_s16 = scalar_lea.hbm %s12343_s3, 24576 }
  0x35   : > { %p11239_p4 = scmp.ne.s32.totalorder %s12343_s3, %s11238_s16  ;;  %p11245_p12 = scmp.lt.u32.totalorder %s11238_s16, %s12343_s3 }
  0x37   : > { %p11241_p10 = pnand %p11239_p4, %p11580_p8 }
  0x39   : > { %p11242_p11 = pneg %p11241_p10 }
  0x3b   : > { %p11247_p13 = pnand %p11245_p12, %p11242_p11 }
  0x3d   : > { %11250 = shalt.err (!%p11247_p13)
}
  0x3e   : > { %s11251_s29 = scalar_lea.vmem %s11568_s10, 24576  ;;  %p11259_p7 = scmp.lt.s32.totalorder %s11568_s10, %s11568_s10 }
  0x3f   : > { %p11252_p0 = scmp.ne.s32.totalorder %s11568_s10, %s11251_s29  ;;  %p11260_p9 = scmp.lt.s32.totalorder %s11251_s29, %s11251_s29 }
  0x41   : > { %p11254_p2 = pnand %p11252_p0, %p11580_p8  ;;  %p11261_p4 = por %p11260_p9, %p11259_p7 }
  0x43   : > { %p11255_p5 = pneg %p11254_p2 }
  0x45   : > { %p11262_p10 = pnand %p11261_p4, %p11255_p5 }
  0x47   : > { %11265 = shalt.err (!%p11262_p10)
}
  0x48   : > { %9907 = dma.hbm_to_vmem [thread:$0]  (!%p11564_p6), %s12343_s3, 24576, %s11568_s10, [#allocation9], %s11469_s23, %s11469_s23, %s11470_s28  }
  0x49   : > { %s11266_s15 = scalar_lea.hbm %s12329_s4, 24576 }
  0x4a   : > { %p11267_p11 = scmp.ne.s32.totalorder %s12329_s4, %s11266_s15  ;;  %p11273_p0 = scmp.lt.u32.totalorder %s11266_s15, %s12329_s4 }
  0x4c   : > { %p11269_p12 = pnand %p11267_p11, %p11580_p8 }
  0x4e   : > { %p11270_p13 = pneg %p11269_p12 }
  0x50   : > { %p11275_p2 = pnand %p11273_p0, %p11270_p13 }
  0x52   : > { %11278 = shalt.err (!%p11275_p2)
}
  0x53   : > { %s11279_s10 = scalar_lea.vmem %s11570_s13, 24576  ;;  %p11287_p4 = scmp.lt.s32.totalorder %s11570_s13, %s11570_s13 }
  0x54   : > { %p11280_p5 = scmp.ne.s32.totalorder %s11570_s13, %s11279_s10  ;;  %p11288_p10 = scmp.lt.s32.totalorder %s11279_s10, %s11279_s10 }
  0x56   : > { %p11282_p7 = pnand %p11280_p5, %p11580_p8  ;;  %p11289_p11 = por %p11288_p10, %p11287_p4 }
  0x58   : > { %p11283_p9 = pneg %p11282_p7 }
  0x5a   : > { %p11290_p12 = pnand %p11289_p11, %p11283_p9 }
  0x5c   : > { %11293 = shalt.err (!%p11290_p12)
}
  0x5d   : > { %9910 = dma.hbm_to_vmem [thread:$0]  (!%p11564_p6), %s12329_s4, 24576, %s11570_s13, [#allocation9], %s11469_s23, %s11469_s23, %s11470_s28  }
  0x5e   : > { %s11471_s22 = smov [#allocation11]   ;;  %s11294_s15 = scalar_lea.hbm %s12330_s5, 24576 }
  0x5f   : > { %s267_s9 = sshll.u32 %s11471_s22, 4  ;;  %p11295_p13 = scmp.ne.s32.totalorder %s12330_s5, %s11294_s15  ;;  %s268_s9 = int_to_ptr.vmem [resolvable:$true] %s267_s9 }
  0x60   : > { %p11301_p5 = scmp.lt.u32.totalorder %s11294_s15, %s12330_s5 }
  0x61   : > { %p11297_p0 = pnand %p11295_p13, %p11580_p8 }
  0x63   : > { %p11298_p2 = pneg %p11297_p0 }
  0x65   : > { %p11303_p7 = pnand %p11301_p5, %p11298_p2 }
  0x67   : > { %11306 = shalt.err (!%p11303_p7)
}
  0x68   : > { %s11307_s13 = scalar_lea.vmem %s268_s9, 24576  ;;  %p11315_p11 = scmp.lt.s32.totalorder %s268_s9, %s268_s9 }
  0x69   : > { %p11308_p9 = scmp.ne.s32.totalorder %s268_s9, %s11307_s13  ;;  %p11316_p12 = scmp.lt.s32.totalorder %s11307_s13, %s11307_s13 }
  0x6b   : > { %p11310_p4 = pnand %p11308_p9, %p11580_p8  ;;  %p11317_p1 = por %p11316_p12, %p11315_p11 }
  0x6d   : > { %p11311_p10 = pneg %p11310_p4 }
  0x6f   : > { %p11318_p3 = pnand %p11317_p1, %p11311_p10 }
  0x71   : > { %11321 = shalt.err (!%p11318_p3)
}
  0x72   : > { %s11472_s23 = smov 384   ;;  %s11473_s19 = smov 24  }
  0x73   : > { %9913 = dma.hbm_to_vmem [thread:$0]  (!%p11564_p6), %s12330_s5, 24576, %s268_s9, [#allocation12], %s11472_s23, %s11472_s23, %s11473_s19  }
  0x74   : > { %s8767_s21 = sadd.s32 4294967294, %s11464_s27   ;;  %s11676_s29 = sadd.s32 1, %s11464_s27  }
  0x75   : > { %s32_s22 = ssub.s32 %s11464_s27, %s11676_s29  ;;  %s35_s12 = sadd.s32 1, %s11460_s26 }
  0x76   : > { %p33_p1 = scmp.eq.s32.totalorder %s32_s22, 0  ;;  %p42_p3 = scmp.ne.s32.totalorder %s11460_s26, %s11456_s25 }
  0x77   : > { %p43_p8 = scmp.eq.s32.totalorder %s11464_s27, 0  ;;  %p48_p13 = scmp.ne.s32.totalorder %s11456_s25, %s11452_s24 }
  0x78   : > { %s11687_s14 = scalar_select %p33_p1, %s11460_s26, %s35_s12  }
  0x79   : > { %p44_p0 = por %p43_p8, %p42_p3  ;;  %p12344_p2 = scmp.eq.s32.totalorder %s11548_s30, 0 }
  0x7a   : > { %p203_p6 = scmp.eq.s32.totalorder %s11548_s30, 1  ;;  %p209_p7 = scmp.eq.s32.totalorder %s8767_s21, 1 }
  0x7b   : > { %p11691_p5 = por %p12344_p2, %p48_p13  ;;  %p9929_p9 = scmp.lt.s32.totalorder %s11464_s27, 2 }
  0x7c   : > { %s11698_s9 = sand.u32 1, %s11460_s26   ;;  %p11700_p4 = por %p203_p6, %p42_p3 }
  0x7d   : > { %p11704_p10 = por %p209_p7, %p48_p13  ;;  %s9872_s17 = smul.u32 6, %s11698_s9 }
  0x7e   : > { %s12346_s15 = scalar_select %p11700_p4, 1, 0 }
  0x7f   : > { %s12347_s16 = scalar_select %p11704_p10, 1, 0 }
  0x80   : > { %s9873_s18 = smul.u32 96, %s11464_s27  ;;  %p11710_p11 = pnand %p9929_p9, %p44_p0 }
  0x81   : > { %s12349_s0 = sld [smem:[#allocation20_spill]]  ;;  %s288_s10 = scalar_lea.vmem [#allocation2], %s9872_s17 }
  0x82   : > { %s296_s21 = sshll.u32 %s288_s10, 4  ;;  %s285_s22 = scalar_lea.sflag [#allocation3], %s11698_s9  ;;  %s11720_s21 = int_to_ptr.vmem [resolvable:$true] %s296_s21 }
  0x83   : > { %p11324_p1 = pneg %p11710_p11 }
  0x87   : > { %s11718_s28 = scalar_lea.hbm %s12349_s0, %s9873_s18  ;;  %s11327_s19 = scalar_lea.hbm %s12349_s0, 192 }
  0x88   : > { %s11322_s12 = scalar_lea.hbm %s11718_s28, 96  ;;  %p11328_p13 = scmp.lt.u32.totalorder %s11718_s28, %s12349_s0 }
  0x89   : > { %p11323_p12 = scmp.ne.s32.totalorder %s11718_s28, %s11322_s12  ;;  %p11329_p0 = scmp.lt.u32.totalorder %s11327_s19, %s11322_s12 }
  0x8a   : > { %p11331_p6 = scmp.lt.u32.totalorder %s11322_s12, %s11718_s28 }
  0x8b   : > { %p11325_p3 = pnand %p11324_p1, %p11323_p12  ;;  %p11330_p2 = por %p11329_p0, %p11328_p13 }
  0x8d   : > { %p11326_p8 = pneg %p11325_p3  ;;  %p11332_p7 = por %p11331_p6, %p11330_p2 }
  0x8f   : > { %p11333_p9 = pnand %p11332_p7, %p11326_p8 }
  0x91   : > { %11336 = shalt.err (!%p11333_p9)
}
  0x92   : > { %s11337_s17 = scalar_lea.vmem %s11720_s21, 96  ;;  %s11474_s10 = smov [#allocation2]  }
  0x93   : > { %p11338_p12 = scmp.ne.s32.totalorder %s11720_s21, %s11337_s17  ;;  %s11342_s23 = sshll.u32 %s11474_s10, 4  ;;  %s11343_s23 = int_to_ptr.vmem [resolvable:$false] %s11342_s23 }
  0x94   : > { %s11344_s2 = scalar_lea.vmem %s11343_s23, 192  ;;  %p11345_p4 = scmp.lt.s32.totalorder %s11720_s21, %s11343_s23 }
  0x95   : > { %p11340_p3 = pnand %p11338_p12, %p11324_p1  ;;  %p11346_p13 = scmp.lt.s32.totalorder %s11344_s2, %s11337_s17 }
  0x97   : > { %p11341_p10 = pneg %p11340_p3  ;;  %p11347_p0 = por %p11346_p13, %p11345_p4 }
  0x99   : > { %p11348_p2 = pnand %p11347_p0, %p11341_p10 }
  0x9b   : > { %11351 = shalt.err (!%p11348_p2)
}
  0x9c   : > { %9917 = dma.hbm_to_vmem [thread:$0]  (!%p11710_p11), %s11718_s28, 96, %s11720_s21, %s285_s22  }
  0x9d   : > { %s303_s13 = sand.u32 1, %s11464_s27   ;;  %s12350_s12 = smul.u32 96, %s11698_s9 }
  0x9e   : > { %s9875_s10 = smul.u32 1536, %s11464_s27  ;;  %s11759_s0 = scalar_lea.sflag [#allocation6], %s303_s13 }
  0x9f   : > { %s307_s18 = scalar_lea.vmem [#allocation5], %s12350_s12  ;;  %s11357_s21 = scalar_lea.hbm %s12326_s1, 3072 }
  0xa0   : > { %s314_s19 = sshll.u32 %s307_s18, 4  ;;  %s11757_s2 = scalar_lea.hbm %s12326_s1, %s9875_s10  ;;  %s11751_s19 = int_to_ptr.vmem [resolvable:$true] %s314_s19 }
  0xa1   : > { %s11352_s3 = scalar_lea.hbm %s11757_s2, 1536  ;;  %p11358_p6 = scmp.lt.u32.totalorder %s11757_s2, %s12326_s1 }
  0xa2   : > { %p11353_p4 = scmp.ne.s32.totalorder %s11757_s2, %s11352_s3  ;;  %p11359_p7 = scmp.lt.u32.totalorder %s11357_s21, %s11352_s3 }
  0xa3   : > { %p11361_p12 = scmp.lt.u32.totalorder %s11352_s3, %s11757_s2 }
  0xa4   : > { %p11355_p10 = pnand %p11353_p4, %p11324_p1  ;;  %p11360_p9 = por %p11359_p7, %p11358_p6 }
  0xa6   : > { %p11356_p8 = pneg %p11355_p10  ;;  %p11362_p3 = por %p11361_p12, %p11360_p9 }
  0xa8   : > { %p11363_p13 = pnand %p11362_p3, %p11356_p8 }
  0xaa   : > { %11366 = shalt.err (!%p11363_p13)
}
  0xab   : > { %s11367_s13 = scalar_lea.vmem %s11751_s19, 1536  ;;  %s11475_s18 = smov [#allocation5]  }
  0xac   : > { %p11368_p0 = scmp.ne.s32.totalorder %s11751_s19, %s11367_s13  ;;  %s11372_s10 = sshll.u32 %s11475_s18, 4  ;;  %s11373_s10 = int_to_ptr.vmem [resolvable:$false] %s11372_s10 }
  0xad   : > { %s11374_s17 = scalar_lea.vmem %s11373_s10, 3072  ;;  %p11375_p10 = scmp.lt.s32.totalorder %s11751_s19, %s11373_s10 }
  0xae   : > { %p11370_p2 = pnand %p11368_p0, %p11324_p1  ;;  %p11376_p6 = scmp.lt.s32.totalorder %s11374_s17, %s11367_s13 }
  0xb0   : > { %p11371_p4 = pneg %p11370_p2  ;;  %p11377_p7 = por %p11376_p6, %p11375_p10 }
  0xb2   : > { %p11378_p9 = pnand %p11377_p7, %p11371_p4 }
  0xb4   : > { %11381 = shalt.err (!%p11378_p9)
}
  0xb5   : > { %s11476_s3 = smov 768   ;;  %s11477_s23 = smov 48  }
  0xb6   : > { %9920 = dma.hbm_to_vmem [thread:$0]  (!%p11710_p11), %s11757_s2, 1536, %s11751_s19, %s11759_s0, %s11476_s3, %s11476_s3, %s11477_s23  }
  0xb7   : > { %p12351_p1 = scmp.ne.s32.totalorder %s12339_s8, 0 }
  0xb8   : > { %s11788_s9 = sand.u32 (!%p12351_p1), 1, %s11456_s25  }
  0xb9   : > { %326 = sbr.rel (%p12351_p1) target bundleno = 7052 (0x1b8c), region = 48  ;;  %s329_s21 = scalar_lea.sflag (!%p12351_p1), [#allocation3], %s11788_s9 }
  0xba   : > { %s9876_s28 = smul.u32 (!%p12351_p1), 6, %s11788_s9 }
  0xbc   : > { %s11792_s22 = scalar_lea.vmem (!%p12351_p1), [#allocation2], %s9876_s28 }
  0xc0   : > { %11427 = dma.done.wait (%p11691_p5), %s329_s21, 96  }
  0xc1   : > { %11429 = vsyncadd (%p11691_p5), %s329_s21, 4294967200  ;;  %s337_s0 = sand.u32 1, %s11548_s30   ;;  %s9877_s8 = smul.u32 96, %s11788_s9 }
  0xc2   : > { %s338_s20 = scalar_lea.sflag [#allocation6], %s337_s0 }
  0xc3   : > { %s11802_s19 = scalar_lea.vmem [#allocation5], %s9877_s8 }
  0xc4   : > { %11431 = dma.done.wait (%p11691_p5), %s338_s20, 1536  }
  0xc5   : > { %11433 = vsyncadd (%p11691_p5), %s338_s20, 4294965760  ;;  %p12352_p11 = scmp.eq.s32.totalorder %s11548_s30, 0 }
  0xc7   : > { %11435 = dma.done.wait (%p12352_p11), [#allocation6], 24576   ;;  %p12353_p8 = pmov %p12352_p11 }
  0xc9   : > { %11437 = vsyncadd (%p12353_p8), [#allocation6], 4294942720  ;;  %p12354_p12 = pmov %p12353_p8 }
  0xca   : > { %p12355_p3 = pmov %p12353_p8 }
  0xcb   : > { %11439 = dma.done.wait (%p12354_p12), [#allocation9], 49152  }
  0xcc   : > { %11441 = vsyncadd (%p12355_p3), [#allocation9], 4294918144  ;;  %p12356_p13 = pmov %p12355_p3 }
  0xcd   : > { %p12357_p0 = pmov %p12355_p3 }
  0xce   : > { %11443 = dma.done.wait (%p12356_p13), [#allocation12], 24576  }
  0xcf   : > { %11445 = vsyncadd (%p12357_p0), [#allocation12], 4294942720  ;;  %v10025_v0 = vld [vmem:[#allocation7 + $0x4] ss:$16 sps:$4 sm:$0xff]   ;;  %v10027_v1 = vld [vmem:[#allocation7] ss:$16 sps:$4 sm:$0xff]   ;;  %v396_v7 = vlaneseq }
  0xd0   : > { %1602 = vmatprep.subr.bf16.mxu0 %v10025_v0  ;;  %v10028_v2 = vld [vmem:[#allocation7 + $0x24] ss:$16 sps:$4 sm:$0xff]   ;;  %v10030_v3 = vld [vmem:[#allocation7 + $0x20] ss:$16 sps:$4 sm:$0xff]   ;;  %vm11479_vm0 = vmmov 0   ;;  %vm4673_vm1 = vcmask 523264  }
  0xd1   : > { %1603 = vmatpush1.bf16.msra.mxu0 %v10027_v1  ;;  %v10031_v4 = vld [vmem:[#allocation7 + $0x44] ss:$16 sps:$4 sm:$0xff]   ;;  %v10033_v5 = vld [vmem:[#allocation7 + $0x40] ss:$16 sps:$4 sm:$0xff]   ;;  %v11820_v10 = vshrl.u32 %v396_v7, 7  ;;  %vm11913_vm2 = vmpackc.low %vm4673_vm1, %vm4673_vm1  ;;  %s11481_s11 = smov 64  }
  0xd2   : > { %1604 = vmatprep.subr.bf16.mxu0 %v10028_v2  ;;  %v10034_v6 = vld [vmem:[#allocation7 + $0x64] ss:$16 sps:$4 sm:$0xff]   ;;  %v10036_v8 = vld [vmem:[#allocation7 + $0x60] ss:$16 sps:$4 sm:$0xff]   ;;  %vm4753_vm3 = vcmask 122880   ;;  %vm4765_vm4 = vcmask 130048  }
  0xd3   : > { %v10037_v9 = vld [vmem:[#allocation7 + $0x84] ss:$16 sps:$4 sm:$0xff]   ;;  %v10039_v11 = vld [vmem:[#allocation7 + $0x80] ss:$16 sps:$4 sm:$0xff]   ;;  %v402_v13 = vsub.s32 1, %v11820_v10  ;;  %v398_v35 = vsub.s32 0, %v11820_v10 }
  0xd4   : > { %v10040_v12 = vld [vmem:[#allocation7 + $0xa4] ss:$16 sps:$4 sm:$0xff]   ;;  %v10042_v14 = vld [vmem:[#allocation7 + $0xa0] ss:$16 sps:$4 sm:$0xff]   ;;  %v410_v37 = vsub.s32 3, %v11820_v10  ;;  %s9878_s13 = smul.u32 1536, %s11548_s30 }
  0xd5   : > { %1605 = vmatpush1.bf16.msra.mxu0 %v10030_v3  ;;  %v10043_v15 = vld [vmem:[#allocation7 + $0xc4] ss:$16 sps:$4 sm:$0xff]   ;;  %v10045_v18 = vld [vmem:[#allocation7 + $0xc0] ss:$16 sps:$4 sm:$0xff]   ;;  %s392_s18 = scalar_lea.vmem [#allocation13], %s9877_s8  ;;  %s8620_s23 = scalar_lea.sflag [#allocation4], %s11788_s9 }
  0xd6   : > { %1606 = vmatprep.subr.bf16.mxu0 %v10031_v4  ;;  %v11824_v16 = vld [vmem:[%s11792_s22] sm:$0x3f]  ;;  %v10048_v21 = vld [vmem:[#allocation7 + $0xe0] ss:$16 sps:$4 sm:$0xff]   ;;  %s8633_s10 = sshll.u32 %s392_s18, 4  ;;  %s12275_s30 = scalar_lea.hbm %s12332_s7, %s9878_s13  ;;  %s12277_s10 = int_to_ptr.vmem [resolvable:$true] %s8633_s10 }
  0xd7   : > { %v403_v17 = vrot.slane %v11824_v16, %v402_v13  ;;  %v10046_v19 = vld [vmem:[#allocation7 + $0xe4] ss:$16 sps:$4 sm:$0xff]   ;;  %v10051_v23 = vld [vmem:[#allocation7 + $0x100] ss:$16 sps:$4 sm:$0xff]   ;;  %v399_v39 = vrot.slane %v11824_v16, %v398_v35  ;;  %v411_v41 = vrot.slane %v11824_v16, %v410_v37  ;;  %s11382_s28 = scalar_lea.vmem %s12277_s10, 1536  ;;  %p12360_p2 = scmp.ne.s32.totalorder %s12346_s15, 0 }
  0xd8   : > { %v10049_v22 = vld [vmem:[#allocation7 + $0x104] ss:$16 sps:$4 sm:$0xff]   ;;  %v10054_v25 = vld [vmem:[#allocation7 + $0x120] ss:$16 sps:$4 sm:$0xff]   ;;  %p11383_p5 = scmp.ne.s32.totalorder %s12277_s10, %s11382_s28  ;;  %s11484_s21 = smov [#allocation13]  }
  0xd9   : > { %1607 = vmatpush1.bf16.msra.mxu0 %v10033_v5  ;;  %v427_v20 = vpack.c.bf16 %v403_v17, %v403_v17  ;;  %v10052_v24 = vld [vmem:[#allocation7 + $0x124] ss:$16 sps:$4 sm:$0xff]   ;;  %v10057_v27 = vld [vmem:[#allocation7 + $0x140] ss:$16 sps:$4 sm:$0xff]   ;;  %v11837_v43 = vpack.c.bf16 %v399_v39, %v399_v39  ;;  %v11839_v45 = vpack.c.bf16 %v411_v41, %v411_v41 }
  0xda   : > { %1608 = vmatprep.subr.bf16.mxu0 %v10034_v6  ;;  %v10055_v26 = vld [vmem:[#allocation7 + $0x144] ss:$16 sps:$4 sm:$0xff]   ;;  %v10060_v29 = vld [vmem:[#allocation7 + $0x160] ss:$16 sps:$4 sm:$0xff]   ;;  %p11384_p4 = pnand %p11383_p5, %p12360_p2 }
  0xdb   : > { %1634 = vmatprep.mubr.bf16.mxu0 %v427_v20  ;;  %1757 = vmatprep.mubr.bf16.mxu1 %v427_v20  ;;  %v10058_v28 = vld [vmem:[#allocation7 + $0x164] ss:$16 sps:$4 sm:$0xff]   ;;  %v10063_v31 = vld [vmem:[#allocation7 + $0x180] ss:$16 sps:$4 sm:$0xff]  }
  0xdc   : > { %v10061_v30 = vld [vmem:[#allocation7 + $0x184] ss:$16 sps:$4 sm:$0xff]   ;;  %v10066_v33 = vld [vmem:[#allocation7 + $0x1a0] ss:$16 sps:$4 sm:$0xff]   ;;  %p11385_p10 = pneg %p11384_p4 }
  0xdd   : > { %1609 = vmatpush1.bf16.msra.mxu0 %v10036_v8  ;;  %v10064_v32 = vld [vmem:[#allocation7 + $0x1a4] ss:$16 sps:$4 sm:$0xff]   ;;  %v10069_v36 = vld [vmem:[#allocation7 + $0x1c0] ss:$16 sps:$4 sm:$0xff]  }
  0xde   : > { %1610 = vmatprep.subr.bf16.mxu0 %v10037_v9  ;;  %v10067_v34 = vld [vmem:[#allocation7 + $0x1c4] ss:$16 sps:$4 sm:$0xff]   ;;  %v10072_v40 = vld [vmem:[#allocation7 + $0x1e0] ss:$16 sps:$4 sm:$0xff]   ;;  %v406_v9 = vsub.s32 2, %v11820_v10 }
  0xdf   : > { %v10070_v38 = vld [vmem:[#allocation7 + $0x1e4] ss:$16 sps:$4 sm:$0xff]   ;;  %v10073_v44 = vld [vmem:[#allocation7 + $0x200] ss:$16 sps:$4 sm:$0xff]  }
  0xe0   : > { %v10075_v42 = vld [vmem:[#allocation7 + $0x204] ss:$16 sps:$4 sm:$0xff]   ;;  %v10076_v47 = vld [vmem:[#allocation7 + $0x220] ss:$16 sps:$4 sm:$0xff]  }
  0xe1   : > { %1611 = vmatpush1.bf16.msra.mxu0 %v10039_v11  ;;  %v10078_v46 = vld [vmem:[#allocation7 + $0x224] ss:$16 sps:$4 sm:$0xff]   ;;  %v10079_v49 = vld [vmem:[#allocation7 + $0x240] ss:$16 sps:$4 sm:$0xff]  }
  0xe2   : > { %1612 = vmatprep.subr.bf16.mxu0 %v10040_v12  ;;  %v10081_v48 = vld [vmem:[#allocation7 + $0x244] ss:$16 sps:$4 sm:$0xff]   ;;  %v10082_v51 = vld [vmem:[#allocation7 + $0x260] ss:$16 sps:$4 sm:$0xff]  }
  0xe3   : > { %v10084_v50 = vld [vmem:[#allocation7 + $0x264] ss:$16 sps:$4 sm:$0xff]   ;;  %v10085_v53 = vld [vmem:[#allocation7 + $0x280] ss:$16 sps:$4 sm:$0xff]  }
  0xe4   : > { %v10087_v52 = vld [vmem:[#allocation7 + $0x284] ss:$16 sps:$4 sm:$0xff]   ;;  %v10088_v55 = vld [vmem:[#allocation7 + $0x2a0] ss:$16 sps:$4 sm:$0xff]  }
  0xe5   : > { %1613 = vmatpush1.bf16.msra.mxu0 %v10042_v14  ;;  %v10090_v54 = vld [vmem:[#allocation7 + $0x2a4] ss:$16 sps:$4 sm:$0xff]   ;;  %v10091_v57 = vld [vmem:[#allocation7 + $0x2c0] ss:$16 sps:$4 sm:$0xff]   ;;  %v418_v14 = vsub.s32 5, %v11820_v10 }
  0xe6   : > { %1614 = vmatprep.subr.bf16.mxu0 %v10043_v15  ;;  %v10093_v56 = vld [vmem:[#allocation7 + $0x2c4] ss:$16 sps:$4 sm:$0xff]   ;;  %v10094_v59 = vld [vmem:[#allocation7 + $0x2e0] ss:$16 sps:$4 sm:$0xff]   ;;  %v407_v15 = vrot.slane %v11824_v16, %v406_v9 }
  0xe7   : > { %v10096_v58 = vld [vmem:[#allocation7 + $0x2e4] ss:$16 sps:$4 sm:$0xff]   ;;  %v10097_v61 = vld [vmem:[#allocation7 + $0x300] ss:$16 sps:$4 sm:$0xff]  }
  0xe8   : > { %v10099_v60 = vld [vmem:[#allocation7 + $0x304] ss:$16 sps:$4 sm:$0xff]   ;;  %v10100_v63 = vld [vmem:[#allocation7 + $0x320] ss:$16 sps:$4 sm:$0xff]   ;;  %v11851_v20 = vpack.c.bf16 %v407_v15, %v407_v15 }
  0xe9   : > { %1615 = vmatpush1.bf16.msra.mxu0 %v10045_v18  ;;  %v10102_v62 = vld [vmem:[#allocation7 + $0x324] ss:$16 sps:$4 sm:$0xff]   ;;  %v10103_v1 = vld [vmem:[#allocation7 + $0x340] ss:$16 sps:$4 sm:$0xff]  }
  0xea   : > { %1616 = vmatprep.subr.bf16.mxu0 %v10046_v19  ;;  %v10105_v0 = vld [vmem:[#allocation7 + $0x344] ss:$16 sps:$4 sm:$0xff]   ;;  %v10106_v3 = vld [vmem:[#allocation7 + $0x360] ss:$16 sps:$4 sm:$0xff]   ;;  %v419_v19 = vrot.slane %v11824_v16, %v418_v14 }
  0xeb   : > { %v10108_v2 = vld [vmem:[#allocation7 + $0x364] ss:$16 sps:$4 sm:$0xff]   ;;  %v10109_v5 = vld [vmem:[#allocation7 + $0x380] ss:$16 sps:$4 sm:$0xff]  }
  0xec   : > { %v10111_v4 = vld [vmem:[#allocation7 + $0x384] ss:$16 sps:$4 sm:$0xff]   ;;  %v10112_v7 = vld [vmem:[#allocation7 + $0x3a0] ss:$16 sps:$4 sm:$0xff]  }
  0xed   : > { %1617 = vmatpush1.bf16.msra.mxu0 %v10048_v21  ;;  %v10114_v6 = vld [vmem:[#allocation7 + $0x3a4] ss:$16 sps:$4 sm:$0xff]   ;;  %v10115_v11 = vld [vmem:[#allocation7 + $0x3c0] ss:$16 sps:$4 sm:$0xff]  }
  0xee   : > { %1618 = vmatprep.subr.bf16.mxu0 %v10049_v22  ;;  %v10117_v8 = vld [vmem:[#allocation7 + $0x3c4] ss:$16 sps:$4 sm:$0xff]   ;;  %v10118_v17 = vld [vmem:[#allocation7 + $0x3e0] ss:$16 sps:$4 sm:$0xff]   ;;  %v11853_v22 = vpack.c.bf16 %v419_v19, %v419_v19 }
  0xef   : > { %v10120_v12 = vld [vmem:[#allocation7 + $0x3e4] ss:$16 sps:$4 sm:$0xff]   ;;  %v10121_v21 = vld [vmem:[#allocation7 + $0x400] ss:$16 sps:$4 sm:$0xff]  }
  0xf0   : > { %v10123_v18 = vld [vmem:[#allocation7 + $0x404] ss:$16 sps:$4 sm:$0xff]   ;;  %v10145_v39 = vld [vmem:[#allocation7 + $0x500] ss:$16 sps:$4 sm:$0xff]  }
  0xf1   : > { %1619 = vmatpush1.bf16.msra.mxu0 %v10051_v23  ;;  %v10126_v23 = vld [vmem:[#allocation7 + $0x424] ss:$16 sps:$4 sm:$0xff]   ;;  %v10148_v41 = vld [vmem:[#allocation7 + $0x520] ss:$16 sps:$4 sm:$0xff]  }
  0xf2   : > { %1620 = vmatprep.subr.bf16.mxu0 %v10052_v24  ;;  %v10124_v24 = vld [vmem:[#allocation7 + $0x420] ss:$16 sps:$4 sm:$0xff]   ;;  %v10132_v16 = vld [vmem:[#allocation7 + $0x464] ss:$16 sps:$4 sm:$0xff]  }
  0xf3   : > { %v10189_v15 = vld [vmem:[#allocation8 + $0xc4] ss:$16 sps:$4 sm:$0xff]   ;;  %v10190_v19 = vld [vmem:[#allocation8 + $0xe0] ss:$16 sps:$4 sm:$0xff]  }
  0xf5   : > { %1621 = vmatpush1.bf16.msra.mxu0 %v10054_v25  ;;  %v10129_v25 = vld [vmem:[#allocation7 + $0x444] ss:$16 sps:$4 sm:$0xff]  }
  0xf6   : > { %1622 = vmatprep.subr.bf16.mxu0 %v10055_v26  ;;  %v10127_v26 = vld [vmem:[#allocation7 + $0x440] ss:$16 sps:$4 sm:$0xff]  }
  0xf9   : > { %1623 = vmatpush1.bf16.msra.mxu0 %v10057_v27  ;;  %v10130_v27 = vld [vmem:[#allocation7 + $0x460] ss:$16 sps:$4 sm:$0xff]  }
  0xfa   : > { %1624 = vmatprep.subr.bf16.mxu0 %v10058_v28  ;;  %v10135_v28 = vld [vmem:[#allocation7 + $0x484] ss:$16 sps:$4 sm:$0xff]  }
  0xfd   : > { %1625 = vmatpush1.bf16.msra.mxu0 %v10060_v29  ;;  %v10133_v29 = vld [vmem:[#allocation7 + $0x480] ss:$16 sps:$4 sm:$0xff]  }
  0xfe   : > { %1626 = vmatprep.subr.bf16.mxu0 %v10061_v30  ;;  %v10138_v30 = vld [vmem:[#allocation7 + $0x4a4] ss:$16 sps:$4 sm:$0xff]  }
 0x101   : > { %1627 = vmatpush1.bf16.msra.mxu0 %v10063_v31  ;;  %v10136_v31 = vld [vmem:[#allocation7 + $0x4a0] ss:$16 sps:$4 sm:$0xff]  }
 0x102   : > { %1628 = vmatprep.subr.bf16.mxu0 %v10064_v32  ;;  %v10141_v32 = vld [vmem:[#allocation7 + $0x4c4] ss:$16 sps:$4 sm:$0xff]  }
 0x105   : > { %1629 = vmatpush1.bf16.msra.mxu0 %v10066_v33  ;;  %v10139_v33 = vld [vmem:[#allocation7 + $0x4c0] ss:$16 sps:$4 sm:$0xff]  }
 0x106   : > { %1630 = vmatprep.subr.bf16.mxu0 %v10067_v34  ;;  %v10144_v34 = vld [vmem:[#allocation7 + $0x4e4] ss:$16 sps:$4 sm:$0xff]  }
 0x109   : > { %1631 = vmatpush1.bf16.msra.mxu0 %v10069_v36  ;;  %v10142_v36 = vld [vmem:[#allocation7 + $0x4e0] ss:$16 sps:$4 sm:$0xff]  }
 0x10a   : > { %1632 = vmatprep.subr.bf16.mxu0 %v10070_v38  ;;  %v10147_v38 = vld [vmem:[#allocation7 + $0x504] ss:$16 sps:$4 sm:$0xff]  }
 0x10d   : > { %1633 = vmatpush1.bf16.msra.mxu0 %v10072_v40  ;;  %v10150_v40 = vld [vmem:[#allocation7 + $0x524] ss:$16 sps:$4 sm:$0xff]  }
 0x10e   : > { %1643 = vmatprep.subr.bf16.mxu0 %v10075_v42  ;;  %v10153_v42 = vld [vmem:[#allocation7 + $0x544] ss:$16 sps:$4 sm:$0xff]  }
 0x110   : > { %1635 = vmatmul.mubr.bf16.vlgmr.msra.gmra.mrb[0].mxu0 %v11837_v43 }
 0x111   : > { %1644 = vmatpush1.bf16.msra.mxu0 %v10073_v44  ;;  %1675 = vmatprep.mubr.bf16.mxu0 %v11839_v45  ;;  %v10151_v44 = vld [vmem:[#allocation7 + $0x540] ss:$16 sps:$4 sm:$0xff]  }
 0x112   : > { %1645 = vmatprep.subr.bf16.mxu0 %v10078_v46  ;;  %v10156_v46 = vld [vmem:[#allocation7 + $0x564] ss:$16 sps:$4 sm:$0xff]  }
 0x115   : > { %1646 = vmatpush1.bf16.msra.mxu0 %v10076_v47  ;;  %v10154_v47 = vld [vmem:[#allocation7 + $0x560] ss:$16 sps:$4 sm:$0xff]  }
 0x116   : > { %1647 = vmatprep.subr.bf16.mxu0 %v10081_v48  ;;  %v10159_v48 = vld [vmem:[#allocation7 + $0x584] ss:$16 sps:$4 sm:$0xff]  }
 0x119   : > { %1648 = vmatpush1.bf16.msra.mxu0 %v10079_v49  ;;  %v10157_v49 = vld [vmem:[#allocation7 + $0x580] ss:$16 sps:$4 sm:$0xff]  }
 0x11a   : > { %1649 = vmatprep.subr.bf16.mxu0 %v10084_v50  ;;  %v10162_v50 = vld [vmem:[#allocation7 + $0x5a4] ss:$16 sps:$4 sm:$0xff]  }
 0x11d   : > { %1650 = vmatpush1.bf16.msra.mxu0 %v10082_v51  ;;  %v10160_v51 = vld [vmem:[#allocation7 + $0x5a0] ss:$16 sps:$4 sm:$0xff]  }
 0x11e   : > { %1651 = vmatprep.subr.bf16.mxu0 %v10087_v52  ;;  %v10165_v52 = vld [vmem:[#allocation7 + $0x5c4] ss:$16 sps:$4 sm:$0xff]  }
 0x121   : > { %1652 = vmatpush1.bf16.msra.mxu0 %v10085_v53  ;;  %v414_v53 = vsub.s32 4, %v11820_v10 }
 0x122   : > { %1653 = vmatprep.subr.bf16.mxu0 %v10090_v54  ;;  %v10163_v54 = vld [vmem:[#allocation7 + $0x5c0] ss:$16 sps:$4 sm:$0xff]  }
 0x125   : > { %1654 = vmatpush1.bf16.msra.mxu0 %v10088_v55  ;;  %v10168_v55 = vld [vmem:[#allocation7 + $0x5e4] ss:$16 sps:$4 sm:$0xff]  }
 0x126   : > { %1655 = vmatprep.subr.bf16.mxu0 %v10093_v56  ;;  %v10166_v56 = vld [vmem:[#allocation7 + $0x5e0] ss:$16 sps:$4 sm:$0xff]  }
 0x129   : > { %1656 = vmatpush1.bf16.msra.mxu0 %v10091_v57  ;;  %v11209_v57 = vld [vmem:[%s11792_s22] sm:$0x3f]  ;;  %s11386_s22 = sshll.u32 %s11484_s21, 4  ;;  %s11387_s22 = int_to_ptr.vmem [resolvable:$false] %s11386_s22 }
 0x12a   : > { %1657 = vmatprep.subr.bf16.mxu0 %v10096_v58  ;;  %v415_v58 = vrot.slane %v11209_v57, %v414_v53  ;;  %v10229_v57 = vld [vmem:[#allocation8 + $0x280] ss:$16 sps:$4 sm:$0xff]   ;;  %s11388_s0 = scalar_lea.vmem %s11387_s22, 3072  ;;  %p11389_p6 = scmp.lt.s32.totalorder %s12277_s10, %s11387_s22 }
 0x12b   : > { %p11390_p7 = scmp.lt.s32.totalorder %s11388_s0, %s11382_s28 }
 0x12d   : > { %1658 = vmatpush1.bf16.msra.mxu0 %v10094_v59  ;;  %v10171_v59 = vld [vmem:[#allocation8 + $0x4] ss:$16 sps:$4 sm:$0xff]   ;;  %p11391_p9 = por %p11390_p7, %p11389_p6 }
 0x12e   : > { %1659 = vmatprep.subr.bf16.mxu0 %v10099_v60  ;;  %v433_v60 = vld [vmem:[%s11802_s19 + $0x8] sm:$0xff] }
 0x12f   : > { %p11392_p1 = pnand %p11391_p9, %p11385_p10 }
 0x131   : > { %1660 = vmatpush1.bf16.msra.mxu0 %v10097_v61  ;;  %v439_v61 = vld [vmem:[%s11802_s19 + $0x38] sm:$0xff] }
 0x132   : > { %1661 = vmatprep.subr.bf16.mxu0 %v10102_v62  ;;  %v11863_v62 = vpack.c.bf16 %v415_v58, %v415_v58  ;;  %v10234_v58 = vld [vmem:[#allocation8 + $0x2a4] ss:$16 sps:$4 sm:$0xff]  }
 0x135   : > { %1662 = vmatpush1.bf16.msra.mxu0 %v10100_v63  ;;  %v10169_v63 = vld [vmem:[#allocation8] ss:$16 sps:$4 sm:$0xff]  }
 0x136   : > { %1663 = vmatprep.subr.bf16.mxu0 %v10105_v0  ;;  %v11865_v0 = vpack.c.bf16 %v439_v61, %v433_v60  ;;  %v10237_v60 = vld [vmem:[#allocation8 + $0x2c4] ss:$16 sps:$4 sm:$0xff]   ;;  %v10235_v61 = vld [vmem:[#allocation8 + $0x2c0] ss:$16 sps:$4 sm:$0xff]  }
 0x139   : > { %1664 = vmatpush1.bf16.msra.mxu0 %v10103_v1  ;;  %v10174_v1 = vld [vmem:[#allocation8 + $0x24] ss:$16 sps:$4 sm:$0xff]  }
 0x13a   : > { %1665 = vmatprep.subr.bf16.mxu0 %v10108_v2  ;;  %v10172_v2 = vld [vmem:[#allocation8 + $0x20] ss:$16 sps:$4 sm:$0xff]  }
 0x13d   : > { %1666 = vmatpush1.bf16.msra.mxu0 %v10106_v3  ;;  %v10177_v3 = vld [vmem:[#allocation8 + $0x44] ss:$16 sps:$4 sm:$0xff]  }
 0x13e   : > { %1667 = vmatprep.subr.bf16.mxu0 %v10111_v4  ;;  %v10175_v4 = vld [vmem:[#allocation8 + $0x40] ss:$16 sps:$4 sm:$0xff]  }
 0x141   : > { %1668 = vmatpush1.bf16.msra.mxu0 %v10109_v5  ;;  %v10180_v5 = vld [vmem:[#allocation8 + $0x64] ss:$16 sps:$4 sm:$0xff]  }
 0x142   : > { %1669 = vmatprep.subr.bf16.mxu0 %v10114_v6  ;;  %v10178_v6 = vld [vmem:[#allocation8 + $0x60] ss:$16 sps:$4 sm:$0xff]  }
 0x145   : > { %1670 = vmatpush1.bf16.msra.mxu0 %v10112_v7  ;;  %v10183_v7 = vld [vmem:[#allocation8 + $0x84] ss:$16 sps:$4 sm:$0xff]  }
 0x146   : > { %1671 = vmatprep.subr.bf16.mxu0 %v10117_v8  ;;  %v10181_v8 = vld [vmem:[#allocation8 + $0x80] ss:$16 sps:$4 sm:$0xff]  }
 0x149   : > { %1672 = vmatpush1.bf16.msra.mxu0 %v10115_v11  ;;  %v10186_v11 = vld [vmem:[#allocation8 + $0xa4] ss:$16 sps:$4 sm:$0xff]  }
 0x14a   : > { %1673 = vmatprep.subr.bf16.mxu0 %v10120_v12  ;;  %v10184_v12 = vld [vmem:[#allocation8 + $0xa0] ss:$16 sps:$4 sm:$0xff]  }
 0x14d   : > { %1674 = vmatpush1.bf16.msra.mxu0 %v10118_v17  ;;  %v10187_v17 = vld [vmem:[#allocation8 + $0xc0] ss:$16 sps:$4 sm:$0xff]  }
 0x14e   : > { %1684 = vmatprep.subr.bf16.mxu0 %v10123_v18  ;;  %v10192_v18 = vld [vmem:[#allocation8 + $0xe4] ss:$16 sps:$4 sm:$0xff]  }
 0x150   : > { %1676 = vmatmul.mubr.bf16.vlgmr.msra.gmra.mrb[0].mxu0 %v11851_v20 }
 0x151   : > { %1685 = vmatpush1.bf16.msra.mxu0 %v10121_v21  ;;  %1716 = vmatprep.mubr.bf16.mxu0 %v11853_v22  ;;  %v10195_v21 = vld [vmem:[#allocation8 + $0x104] ss:$16 sps:$4 sm:$0xff]  }
 0x152   : > { %1686 = vmatprep.subr.bf16.mxu0 %v10126_v23  ;;  %v10193_v23 = vld [vmem:[#allocation8 + $0x100] ss:$16 sps:$4 sm:$0xff]  }
 0x155   : > { %1687 = vmatpush1.bf16.msra.mxu0 %v10124_v24  ;;  %v10198_v24 = vld [vmem:[#allocation8 + $0x124] ss:$16 sps:$4 sm:$0xff]  }
 0x156   : > { %1688 = vmatprep.subr.bf16.mxu0 %v10129_v25  ;;  %v10196_v25 = vld [vmem:[#allocation8 + $0x120] ss:$16 sps:$4 sm:$0xff]  }
 0x159   : > { %1689 = vmatpush1.bf16.msra.mxu0 %v10127_v26  ;;  %v10201_v26 = vld [vmem:[#allocation8 + $0x144] ss:$16 sps:$4 sm:$0xff]  }
 0x15a   : > { %1690 = vmatprep.subr.bf16.mxu0 %v10132_v16  ;;  %v10199_v16 = vld [vmem:[#allocation8 + $0x140] ss:$16 sps:$4 sm:$0xff]  }
 0x15d   : > { %1691 = vmatpush1.bf16.msra.mxu0 %v10130_v27  ;;  %v10204_v27 = vld [vmem:[#allocation8 + $0x164] ss:$16 sps:$4 sm:$0xff]  }
 0x15e   : > { %1692 = vmatprep.subr.bf16.mxu0 %v10135_v28  ;;  %v10202_v28 = vld [vmem:[#allocation8 + $0x160] ss:$16 sps:$4 sm:$0xff]  }
 0x161   : > { %1693 = vmatpush1.bf16.msra.mxu0 %v10133_v29  ;;  %v10207_v29 = vld [vmem:[#allocation8 + $0x184] ss:$16 sps:$4 sm:$0xff]  }
 0x162   : > { %1694 = vmatprep.subr.bf16.mxu0 %v10138_v30  ;;  %v10205_v30 = vld [vmem:[#allocation8 + $0x180] ss:$16 sps:$4 sm:$0xff]  }
 0x165   : > { %1695 = vmatpush1.bf16.msra.mxu0 %v10136_v31  ;;  %v10210_v31 = vld [vmem:[#allocation8 + $0x1a4] ss:$16 sps:$4 sm:$0xff]  }
 0x166   : > { %1696 = vmatprep.subr.bf16.mxu0 %v10141_v32  ;;  %v10208_v32 = vld [vmem:[#allocation8 + $0x1a0] ss:$16 sps:$4 sm:$0xff]  }
 0x169   : > { %1697 = vmatpush1.bf16.msra.mxu0 %v10139_v33  ;;  %v10213_v33 = vld [vmem:[#allocation8 + $0x1c4] ss:$16 sps:$4 sm:$0xff]  }
 0x16a   : > { %1698 = vmatprep.subr.bf16.mxu0 %v10144_v34  ;;  %v10211_v34 = vld [vmem:[#allocation8 + $0x1c0] ss:$16 sps:$4 sm:$0xff]  }
 0x16d   : > { %1699 = vmatpush1.bf16.msra.mxu0 %v10142_v36  ;;  %v10216_v36 = vld [vmem:[#allocation8 + $0x1e4] ss:$16 sps:$4 sm:$0xff]  }
 0x16e   : > { %1700 = vmatprep.subr.bf16.mxu0 %v10147_v38  ;;  %v10214_v38 = vld [vmem:[#allocation8 + $0x1e0] ss:$16 sps:$4 sm:$0xff]  }
 0x171   : > { %1701 = vmatpush1.bf16.msra.mxu0 %v10145_v39  ;;  %v432_v39 = vld [vmem:[%s11802_s19] sm:$0xff] }
 0x172   : > { %1702 = vmatprep.subr.bf16.mxu0 %v10150_v40  ;;  %v438_v40 = vld [vmem:[%s11802_s19 + $0x30] sm:$0xff] }
 0x175   : > { %1703 = vmatpush1.bf16.msra.mxu0 %v10148_v41  ;;  %v10219_v41 = vld [vmem:[#allocation8 + $0x204] ss:$16 sps:$4 sm:$0xff]  }
 0x176   : > { %1704 = vmatprep.subr.bf16.mxu0 %v10153_v42  ;;  %v435_v42 = vld [vmem:[%s11802_s19 + $0x18] sm:$0xff] }
 0x179   : > { %1705 = vmatpush1.bf16.msra.mxu0 %v10151_v44  ;;  %v441_v44 = vld [vmem:[%s11802_s19 + $0x48] sm:$0xff] }
 0x17a   : > { %1706 = vmatprep.subr.bf16.mxu0 %v10156_v46  ;;  %v11873_v46 = vpack.c.bf16 %v438_v40, %v432_v39  ;;  %v10274_v39 = vld [vmem:[#allocation8 + $0x460] ss:$16 sps:$4 sm:$0xff]   ;;  %v10279_v40 = vld [vmem:[#allocation8 + $0x484] ss:$16 sps:$4 sm:$0xff]  }
 0x17d   : > { %1707 = vmatpush1.bf16.msra.mxu0 %v10154_v47  ;;  %v10217_v47 = vld [vmem:[#allocation8 + $0x200] ss:$16 sps:$4 sm:$0xff]  }
 0x17e   : > { %1708 = vmatprep.subr.bf16.mxu0 %v10159_v48  ;;  %v11875_v48 = vpack.c.bf16 %v441_v44, %v435_v42  ;;  %v10282_v42 = vld [vmem:[#allocation8 + $0x4a4] ss:$16 sps:$4 sm:$0xff]   ;;  %v10280_v44 = vld [vmem:[#allocation8 + $0x4a0] ss:$16 sps:$4 sm:$0xff]  }
 0x181   : > { %1709 = vmatpush1.bf16.msra.mxu0 %v10157_v49  ;;  %v10222_v49 = vld [vmem:[#allocation8 + $0x224] ss:$16 sps:$4 sm:$0xff]  }
 0x182   : > { %1710 = vmatprep.subr.bf16.mxu0 %v10162_v50  ;;  %v10220_v50 = vld [vmem:[#allocation8 + $0x220] ss:$16 sps:$4 sm:$0xff]  }
 0x185   : > { %1711 = vmatpush1.bf16.msra.mxu0 %v10160_v51  ;;  %v10225_v51 = vld [vmem:[#allocation8 + $0x244] ss:$16 sps:$4 sm:$0xff]  }
 0x186   : > { %1712 = vmatprep.subr.bf16.mxu0 %v10165_v52  ;;  %v10223_v52 = vld [vmem:[#allocation8 + $0x240] ss:$16 sps:$4 sm:$0xff]  }
 0x189   : > { %1713 = vmatpush1.bf16.msra.mxu0 %v10163_v54  ;;  %v10228_v54 = vld [vmem:[#allocation8 + $0x264] ss:$16 sps:$4 sm:$0xff]  }
 0x18a   : > { %1714 = vmatprep.subr.bf16.mxu0 %v10168_v55  ;;  %v10226_v55 = vld [vmem:[#allocation8 + $0x260] ss:$16 sps:$4 sm:$0xff]  }
 0x18d   : > { %1715 = vmatpush1.bf16.msra.mxu0 %v10166_v56  ;;  %v10231_v56 = vld [vmem:[#allocation8 + $0x284] ss:$16 sps:$4 sm:$0xff]  }
 0x18e   : > { %3004 = vmatprep.subr.bf16.mxu0 %v10171_v59  ;;  %v10232_v59 = vld [vmem:[#allocation8 + $0x2a0] ss:$16 sps:$4 sm:$0xff]  }
 0x190   : > { %1717 = vmatmul.mubr.bf16.vlgmr.msra.gmra.mrb[0].mxu0 %v11863_v62 }
 0x191   : > { %3005 = vmatpush1.bf16.msra.mxu0 %v10169_v63  ;;  %3036 = vmatprep.mubr.bf16.mxu0 %v11865_v0  ;;  %v10240_v63 = vld [vmem:[#allocation8 + $0x2e4] ss:$16 sps:$4 sm:$0xff]  }
 0x192   : > { %3006 = vmatprep.subr.bf16.mxu0 %v10174_v1  ;;  %v10238_v1 = vld [vmem:[#allocation8 + $0x2e0] ss:$16 sps:$4 sm:$0xff]  }
 0x195   : > { %3007 = vmatpush1.bf16.msra.mxu0 %v10172_v2  ;;  %v10243_v2 = vld [vmem:[#allocation8 + $0x304] ss:$16 sps:$4 sm:$0xff]  }
 0x196   : > { %3008 = vmatprep.subr.bf16.mxu0 %v10177_v3  ;;  %v10241_v3 = vld [vmem:[#allocation8 + $0x300] ss:$16 sps:$4 sm:$0xff]  }
 0x199   : > { %3009 = vmatpush1.bf16.msra.mxu0 %v10175_v4  ;;  %v10246_v4 = vld [vmem:[#allocation8 + $0x324] ss:$16 sps:$4 sm:$0xff]  }
 0x19a   : > { %3010 = vmatprep.subr.bf16.mxu0 %v10180_v5  ;;  %v10244_v5 = vld [vmem:[#allocation8 + $0x320] ss:$16 sps:$4 sm:$0xff]  }
 0x19d   : > { %3011 = vmatpush1.bf16.msra.mxu0 %v10178_v6  ;;  %v10249_v6 = vld [vmem:[#allocation8 + $0x344] ss:$16 sps:$4 sm:$0xff]  }
 0x19e   : > { %3012 = vmatprep.subr.bf16.mxu0 %v10183_v7  ;;  %v10247_v7 = vld [vmem:[#allocation8 + $0x340] ss:$16 sps:$4 sm:$0xff]  }
 0x1a1   : > { %3013 = vmatpush1.bf16.msra.mxu0 %v10181_v8  ;;  %v10252_v8 = vld [vmem:[#allocation8 + $0x364] ss:$16 sps:$4 sm:$0xff]  }
 0x1a2   : > { %3014 = vmatprep.subr.bf16.mxu0 %v10186_v11  ;;  %v10250_v11 = vld [vmem:[#allocation8 + $0x360] ss:$16 sps:$4 sm:$0xff]  }
 0x1a5   : > { %3015 = vmatpush1.bf16.msra.mxu0 %v10184_v12  ;;  %v10255_v12 = vld [vmem:[#allocation8 + $0x384] ss:$16 sps:$4 sm:$0xff]  }
 0x1a6   : > { %3016 = vmatprep.subr.bf16.mxu0 %v10189_v15  ;;  %v10253_v15 = vld [vmem:[#allocation8 + $0x380] ss:$16 sps:$4 sm:$0xff]  }
 0x1a9   : > { %3017 = vmatpush1.bf16.msra.mxu0 %v10187_v17  ;;  %v10258_v17 = vld [vmem:[#allocation8 + $0x3a4] ss:$16 sps:$4 sm:$0xff]  }
 0x1aa   : > { %3018 = vmatprep.subr.bf16.mxu0 %v10192_v18  ;;  %v10256_v18 = vld [vmem:[#allocation8 + $0x3a0] ss:$16 sps:$4 sm:$0xff]  }
 0x1ad   : > { %3019 = vmatpush1.bf16.msra.mxu0 %v10190_v19  ;;  %v10261_v19 = vld [vmem:[#allocation8 + $0x3c4] ss:$16 sps:$4 sm:$0xff]  }
 0x1ae   : > { %3020 = vmatprep.subr.bf16.mxu0 %v10195_v21  ;;  %v10259_v21 = vld [vmem:[#allocation8 + $0x3c0] ss:$16 sps:$4 sm:$0xff]  }
 0x1b1   : > { %3021 = vmatpush1.bf16.msra.mxu0 %v10193_v23  ;;  %v10264_v23 = vld [vmem:[#allocation8 + $0x3e4] ss:$16 sps:$4 sm:$0xff]  }
 0x1b2   : > { %3022 = vmatprep.subr.bf16.mxu0 %v10198_v24  ;;  %v10262_v24 = vld [vmem:[#allocation8 + $0x3e0] ss:$16 sps:$4 sm:$0xff]  }
 0x1b5   : > { %3023 = vmatpush1.bf16.msra.mxu0 %v10196_v25  ;;  %v434_v25 = vld [vmem:[%s11802_s19 + $0x10] sm:$0xff] }
 0x1b6   : > { %3024 = vmatprep.subr.bf16.mxu0 %v10201_v26  ;;  %v440_v26 = vld [vmem:[%s11802_s19 + $0x40] sm:$0xff] }
 0x1b9   : > { %3025 = vmatpush1.bf16.msra.mxu0 %v10199_v16  ;;  %v10267_v16 = vld [vmem:[#allocation8 + $0x404] ss:$16 sps:$4 sm:$0xff]  }
 0x1ba   : > { %3026 = vmatprep.subr.bf16.mxu0 %v10204_v27  ;;  %v437_v27 = vld [vmem:[%s11802_s19 + $0x28] sm:$0xff] }
 0x1bd   : > { %3027 = vmatpush1.bf16.msra.mxu0 %v10202_v28  ;;  %v443_v28 = vld [vmem:[%s11802_s19 + $0x58] sm:$0xff] }
 0x1be   : > { %3028 = vmatprep.subr.bf16.mxu0 %v10207_v29  ;;  %v11883_v29 = vpack.c.bf16 %v440_v26, %v434_v25  ;;  %v10327_v25 = vld [vmem:[#allocation10 + $0x84] ss:$16 sps:$4 sm:$0xff]   ;;  %v10325_v26 = vld [vmem:[#allocation10 + $0x80] ss:$16 sps:$4 sm:$0xff]  }
 0x1c1   : > { %3029 = vmatpush1.bf16.msra.mxu0 %v10205_v30  ;;  %v10265_v30 = vld [vmem:[#allocation8 + $0x400] ss:$16 sps:$4 sm:$0xff]  }
 0x1c2   : > { %3030 = vmatprep.subr.bf16.mxu0 %v10210_v31  ;;  %v10270_v31 = vld [vmem:[#allocation8 + $0x424] ss:$16 sps:$4 sm:$0xff]  }
 0x1c5   : > { %3031 = vmatpush1.bf16.msra.mxu0 %v10208_v32  ;;  %v11885_v32 = vpack.c.bf16 %v443_v28, %v437_v27  ;;  %v10328_v27 = vld [vmem:[#allocation10 + $0xa0] ss:$16 sps:$4 sm:$0xff]   ;;  %v10333_v28 = vld [vmem:[#allocation10 + $0xc4] ss:$16 sps:$4 sm:$0xff]  }
 0x1c6   : > { %3032 = vmatprep.subr.bf16.mxu0 %v10213_v33  ;;  %v10268_v33 = vld [vmem:[#allocation8 + $0x420] ss:$16 sps:$4 sm:$0xff]  }
 0x1c9   : > { %3033 = vmatpush1.bf16.msra.mxu0 %v10211_v34  ;;  %v10273_v34 = vld [vmem:[#allocation8 + $0x444] ss:$16 sps:$4 sm:$0xff]  }
 0x1ca   : > { %3034 = vmatprep.subr.bf16.mxu0 %v10216_v36  ;;  %v10271_v36 = vld [vmem:[#allocation8 + $0x440] ss:$16 sps:$4 sm:$0xff]  }
 0x1cd   : > { %3035 = vmatpush1.bf16.msra.mxu0 %v10214_v38  ;;  %v10276_v38 = vld [vmem:[#allocation8 + $0x464] ss:$16 sps:$4 sm:$0xff]  }
 0x1ce   : > { %3047 = vmatprep.subr.bf16.mxu0 %v10219_v41  ;;  %v10277_v41 = vld [vmem:[#allocation8 + $0x480] ss:$16 sps:$4 sm:$0xff]  }
 0x1d0   : > { %3037 = vmatmul.mubr.bf16.vlgmr.msra.gmra.mrb[4].mxu0 %v11873_v46 }
 0x1d1   : > { %3048 = vmatpush1.bf16.msra.mxu0 %v10217_v47  ;;  %3079 = vmatprep.mubr.bf16.mxu0 %v11875_v48  ;;  %v10285_v47 = vld [vmem:[#allocation8 + $0x4c4] ss:$16 sps:$4 sm:$0xff]  }
 0x1d2   : > { %3049 = vmatprep.subr.bf16.mxu0 %v10222_v49  ;;  %v10283_v49 = vld [vmem:[#allocation8 + $0x4c0] ss:$16 sps:$4 sm:$0xff]  }
 0x1d5   : > { %3050 = vmatpush1.bf16.msra.mxu0 %v10220_v50  ;;  %v10288_v50 = vld [vmem:[#allocation8 + $0x4e4] ss:$16 sps:$4 sm:$0xff]  }
 0x1d6   : > { %3051 = vmatprep.subr.bf16.mxu0 %v10225_v51  ;;  %v10286_v51 = vld [vmem:[#allocation8 + $0x4e0] ss:$16 sps:$4 sm:$0xff]  }
 0x1d9   : > { %3052 = vmatpush1.bf16.msra.mxu0 %v10223_v52  ;;  %v10291_v52 = vld [vmem:[#allocation8 + $0x504] ss:$16 sps:$4 sm:$0xff]  }
 0x1da   : > { %3053 = vmatprep.subr.bf16.mxu0 %v10228_v54  ;;  %v10289_v54 = vld [vmem:[#allocation8 + $0x500] ss:$16 sps:$4 sm:$0xff]  }
 0x1dd   : > { %3054 = vmatpush1.bf16.msra.mxu0 %v10226_v55  ;;  %v10294_v55 = vld [vmem:[#allocation8 + $0x524] ss:$16 sps:$4 sm:$0xff]  }
 0x1de   : > { %3055 = vmatprep.subr.bf16.mxu0 %v10231_v56  ;;  %v10292_v56 = vld [vmem:[#allocation8 + $0x520] ss:$16 sps:$4 sm:$0xff]  }
 0x1e1   : > { %3056 = vmatpush1.bf16.msra.mxu0 %v10229_v57  ;;  %v10297_v57 = vld [vmem:[#allocation8 + $0x544] ss:$16 sps:$4 sm:$0xff]  }
 0x1e2   : > { %3057 = vmatprep.subr.bf16.mxu0 %v10234_v58  ;;  %v10295_v58 = vld [vmem:[#allocation8 + $0x540] ss:$16 sps:$4 sm:$0xff]  }
 0x1e5   : > { %3058 = vmatpush1.bf16.msra.mxu0 %v10232_v59  ;;  %v10300_v59 = vld [vmem:[#allocation8 + $0x564] ss:$16 sps:$4 sm:$0xff]  }
 0x1e6   : > { %3059 = vmatprep.subr.bf16.mxu0 %v10237_v60  ;;  %v10298_v60 = vld [vmem:[#allocation8 + $0x560] ss:$16 sps:$4 sm:$0xff]  }
 0x1e9   : > { %3060 = vmatpush1.bf16.msra.mxu0 %v10235_v61  ;;  %v10303_v61 = vld [vmem:[#allocation8 + $0x584] ss:$16 sps:$4 sm:$0xff]  }
 0x1ea   : > { %3061 = vmatprep.subr.bf16.mxu0 %v10240_v63  ;;  %v10301_v63 = vld [vmem:[#allocation8 + $0x580] ss:$16 sps:$4 sm:$0xff]  }
 0x1ed   : > { %3062 = vmatpush1.bf16.msra.mxu0 %v10238_v1  ;;  %v10306_v1 = vld [vmem:[#allocation8 + $0x5a4] ss:$16 sps:$4 sm:$0xff]  }
 0x1ee   : > { %3063 = vmatprep.subr.bf16.mxu0 %v10243_v2  ;;  %v10304_v2 = vld [vmem:[#allocation8 + $0x5a0] ss:$16 sps:$4 sm:$0xff]  }
 0x1f1   : > { %3064 = vmatpush1.bf16.msra.mxu0 %v10241_v3  ;;  %v10309_v3 = vld [vmem:[#allocation8 + $0x5c4] ss:$16 sps:$4 sm:$0xff]  }
 0x1f2   : > { %3065 = vmatprep.subr.bf16.mxu0 %v10246_v4  ;;  %v10307_v4 = vld [vmem:[#allocation8 + $0x5c0] ss:$16 sps:$4 sm:$0xff]  }
 0x1f5   : > { %3066 = vmatpush1.bf16.msra.mxu0 %v10244_v5  ;;  %v10312_v5 = vld [vmem:[#allocation8 + $0x5e4] ss:$16 sps:$4 sm:$0xff]  }
 0x1f6   : > { %3067 = vmatprep.subr.bf16.mxu0 %v10249_v6  ;;  %v10310_v6 = vld [vmem:[#allocation8 + $0x5e0] ss:$16 sps:$4 sm:$0xff]  }
 0x1f9   : > { %3068 = vmatpush1.bf16.msra.mxu0 %v10247_v7  ;;  %v436_v7 = vld [vmem:[%s11802_s19 + $0x20] sm:$0xff] }
 0x1fa   : > { %3069 = vmatprep.subr.bf16.mxu0 %v10252_v8  ;;  %v442_v8 = vld [vmem:[%s11802_s19 + $0x50] sm:$0xff] }
 0x1fd   : > { %3070 = vmatpush1.bf16.msra.mxu0 %v10250_v11  ;;  %v10315_v11 = vld [vmem:[#allocation10 + $0x4] ss:$16 sps:$4 sm:$0xff]  }
 0x1fe   : > { %3071 = vmatprep.subr.bf16.mxu0 %v10255_v12  ;;  %v11891_v12 = vpack.c.bf16 %v442_v8, %v436_v7  ;;  %v10375_v7 = vld [vmem:[#allocation10 + $0x284] ss:$16 sps:$4 sm:$0xff]   ;;  %v10373_v8 = vld [vmem:[#allocation10 + $0x280] ss:$16 sps:$4 sm:$0xff]  }
 0x201   : > { %3072 = vmatpush1.bf16.msra.mxu0 %v10253_v15  ;;  %v10313_v15 = vld [vmem:[#allocation10] ss:$16 sps:$4 sm:$0xff]  }
 0x202   : > { %3073 = vmatprep.subr.bf16.mxu0 %v10258_v17  ;;  %v10318_v17 = vld [vmem:[#allocation10 + $0x24] ss:$16 sps:$4 sm:$0xff]  }
 0x205   : > { %3074 = vmatpush1.bf16.msra.mxu0 %v10256_v18  ;;  %v10316_v18 = vld [vmem:[#allocation10 + $0x20] ss:$16 sps:$4 sm:$0xff]  }
 0x206   : > { %3075 = vmatprep.subr.bf16.mxu0 %v10261_v19  ;;  %v10321_v19 = vld [vmem:[#allocation10 + $0x44] ss:$16 sps:$4 sm:$0xff]  }
 0x209   : > { %3076 = vmatpush1.bf16.msra.mxu0 %v10259_v21  ;;  %v10319_v21 = vld [vmem:[#allocation10 + $0x40] ss:$16 sps:$4 sm:$0xff]  }
 0x20a   : > { %3077 = vmatprep.subr.bf16.mxu0 %v10264_v23  ;;  %v10324_v23 = vld [vmem:[#allocation10 + $0x64] ss:$16 sps:$4 sm:$0xff]  }
 0x20d   : > { %3078 = vmatpush1.bf16.msra.mxu0 %v10262_v24  ;;  %v10322_v24 = vld [vmem:[#allocation10 + $0x60] ss:$16 sps:$4 sm:$0xff]  }
 0x20e   : > { %3090 = vmatprep.subr.bf16.mxu0 %v10267_v16  ;;  %v10330_v16 = vld [vmem:[#allocation10 + $0xa4] ss:$16 sps:$4 sm:$0xff]  }
 0x210   : > { %3080 = vmatmul.mubr.bf16.vlgmr.msra.gmra.mrb[4].mxu0 %v11883_v29 }
 0x211   : > { %3091 = vmatpush1.bf16.msra.mxu0 %v10265_v30  ;;  %3122 = vmatprep.mubr.bf16.mxu0 %v11885_v32 }
 0x212   : > { %3092 = vmatprep.subr.bf16.mxu0 %v10270_v31 }
 0x215   : > { %3093 = vmatpush1.bf16.msra.mxu0 %v10268_v33 }
 0x216   : > { %3094 = vmatprep.subr.bf16.mxu0 %v10273_v34  ;;  %v10331_v34 = vld [vmem:[#allocation10 + $0xc0] ss:$16 sps:$4 sm:$0xff]  }
 0x219   : > { %3095 = vmatpush1.bf16.msra.mxu0 %v10271_v36 }
 0x21a   : > { %3096 = vmatprep.subr.bf16.mxu0 %v10276_v38  ;;  %v10336_v38 = vld [vmem:[#allocation10 + $0xe4] ss:$16 sps:$4 sm:$0xff]  }
 0x21d   : > { %3097 = vmatpush1.bf16.msra.mxu0 %v10274_v39  ;;  %v10334_v39 = vld [vmem:[#allocation10 + $0xe0] ss:$16 sps:$4 sm:$0xff]  }
 0x21e   : > { %3098 = vmatprep.subr.bf16.mxu0 %v10279_v40  ;;  %v10339_v40 = vld [vmem:[#allocation10 + $0x104] ss:$16 sps:$4 sm:$0xff]  }
 0x221   : > { %3099 = vmatpush1.bf16.msra.mxu0 %v10277_v41  ;;  %v10337_v41 = vld [vmem:[#allocation10 + $0x100] ss:$16 sps:$4 sm:$0xff]  }
 0x222   : > { %3100 = vmatprep.subr.bf16.mxu0 %v10282_v42  ;;  %v10342_v42 = vld [vmem:[#allocation10 + $0x124] ss:$16 sps:$4 sm:$0xff]  }
 0x225   : > { %3101 = vmatpush1.bf16.msra.mxu0 %v10280_v44  ;;  %v10340_v44 = vld [vmem:[#allocation10 + $0x120] ss:$16 sps:$4 sm:$0xff]  }
 0x226   : > { %3102 = vmatprep.subr.bf16.mxu0 %v10285_v47  ;;  %v10345_v47 = vld [vmem:[#allocation10 + $0x144] ss:$16 sps:$4 sm:$0xff]  }
 0x229   : > { %3103 = vmatpush1.bf16.msra.mxu0 %v10283_v49  ;;  %v10343_v49 = vld [vmem:[#allocation10 + $0x140] ss:$16 sps:$4 sm:$0xff]  }
 0x22a   : > { %3104 = vmatprep.subr.bf16.mxu0 %v10288_v50  ;;  %v10348_v50 = vld [vmem:[#allocation10 + $0x164] ss:$16 sps:$4 sm:$0xff]  }
 0x22d   : > { %3105 = vmatpush1.bf16.msra.mxu0 %v10286_v51  ;;  %v10346_v51 = vld [vmem:[#allocation10 + $0x160] ss:$16 sps:$4 sm:$0xff]  }
 0x22e   : > { %3106 = vmatprep.subr.bf16.mxu0 %v10291_v52  ;;  %v10351_v52 = vld [vmem:[#allocation10 + $0x184] ss:$16 sps:$4 sm:$0xff]  }
 0x231   : > { %3107 = vmatpush1.bf16.msra.mxu0 %v10289_v54  ;;  %v10349_v54 = vld [vmem:[#allocation10 + $0x180] ss:$16 sps:$4 sm:$0xff]  }
 0x232   : > { %3108 = vmatprep.subr.bf16.mxu0 %v10294_v55  ;;  %v10354_v55 = vld [vmem:[#allocation10 + $0x1a4] ss:$16 sps:$4 sm:$0xff]  }
 0x235   : > { %3109 = vmatpush1.bf16.msra.mxu0 %v10292_v56  ;;  %v10352_v56 = vld [vmem:[#allocation10 + $0x1a0] ss:$16 sps:$4 sm:$0xff]  }
 0x236   : > { %3110 = vmatprep.subr.bf16.mxu0 %v10297_v57  ;;  %v10357_v57 = vld [vmem:[#allocation10 + $0x1c4] ss:$16 sps:$4 sm:$0xff]  }
 0x239   : > { %3111 = vmatpush1.bf16.msra.mxu0 %v10295_v58  ;;  %v10355_v58 = vld [vmem:[#allocation10 + $0x1c0] ss:$16 sps:$4 sm:$0xff]  }
 0x23a   : > { %3112 = vmatprep.subr.bf16.mxu0 %v10300_v59  ;;  %v10360_v59 = vld [vmem:[#allocation10 + $0x1e4] ss:$16 sps:$4 sm:$0xff]  }
 0x23d   : > { %3113 = vmatpush1.bf16.msra.mxu0 %v10298_v60  ;;  %v10358_v60 = vld [vmem:[#allocation10 + $0x1e0] ss:$16 sps:$4 sm:$0xff]  }
 0x23e   : > { %3114 = vmatprep.subr.bf16.mxu0 %v10303_v61  ;;  %v10363_v61 = vld [vmem:[#allocation10 + $0x204] ss:$16 sps:$4 sm:$0xff]  }
 0x241   : > { %3115 = vmatpush1.bf16.msra.mxu0 %v10301_v63  ;;  %v10361_v63 = vld [vmem:[#allocation10 + $0x200] ss:$16 sps:$4 sm:$0xff]  }
 0x242   : > { %3116 = vmatprep.subr.bf16.mxu0 %v10306_v1  ;;  %v10366_v1 = vld [vmem:[#allocation10 + $0x224] ss:$16 sps:$4 sm:$0xff]  }
 0x245   : > { %3117 = vmatpush1.bf16.msra.mxu0 %v10304_v2  ;;  %v10364_v2 = vld [vmem:[#allocation10 + $0x220] ss:$16 sps:$4 sm:$0xff]  }
 0x246   : > { %3118 = vmatprep.subr.bf16.mxu0 %v10309_v3  ;;  %v10369_v3 = vld [vmem:[#allocation10 + $0x244] ss:$16 sps:$4 sm:$0xff]  }
 0x249   : > { %3119 = vmatpush1.bf16.msra.mxu0 %v10307_v4  ;;  %v10367_v4 = vld [vmem:[#allocation10 + $0x240] ss:$16 sps:$4 sm:$0xff]  }
 0x24a   : > { %3120 = vmatprep.subr.bf16.mxu0 %v10312_v5  ;;  %v10372_v5 = vld [vmem:[#allocation10 + $0x264] ss:$16 sps:$4 sm:$0xff]  }
 0x24d   : > { %3121 = vmatpush1.bf16.msra.mxu0 %v10310_v6  ;;  %v10370_v6 = vld [vmem:[#allocation10 + $0x260] ss:$16 sps:$4 sm:$0xff]  }
 0x24e   : > { %4414 = vmatprep.subr.bf16.mxu0 %v10315_v11  ;;  %v10378_v11 = vld [vmem:[#allocation10 + $0x2a4] ss:$16 sps:$4 sm:$0xff]  }
 0x250   : > { %3123 = vmatmul.mubr.bf16.vlgmr.msra.gmra.mrb[4].mxu0 %v11891_v12 }
 0x251   : > { %4415 = vmatpush1.bf16.msra.mxu0 %v10313_v15  ;;  %4446 = vmatprep.mubr.bf16.mxu0 %v11865_v0  ;;  %v10376_v15 = vld [vmem:[#allocation10 + $0x2a0] ss:$16 sps:$4 sm:$0xff]  }
 0x252   : > { %4416 = vmatprep.subr.bf16.mxu0 %v10318_v17  ;;  %v10381_v17 = vld [vmem:[#allocation10 + $0x2c4] ss:$16 sps:$4 sm:$0xff]  }
 0x255   : > { %4417 = vmatpush1.bf16.msra.mxu0 %v10316_v18  ;;  %v10379_v18 = vld [vmem:[#allocation10 + $0x2c0] ss:$16 sps:$4 sm:$0xff]  }
 0x256   : > { %4418 = vmatprep.subr.bf16.mxu0 %v10321_v19  ;;  %v10384_v19 = vld [vmem:[#allocation10 + $0x2e4] ss:$16 sps:$4 sm:$0xff]  }
 0x259   : > { %4419 = vmatpush1.bf16.msra.mxu0 %v10319_v21  ;;  %v10382_v21 = vld [vmem:[#allocation10 + $0x2e0] ss:$16 sps:$4 sm:$0xff]  }
 0x25a   : > { %4420 = vmatprep.subr.bf16.mxu0 %v10324_v23  ;;  %v10387_v23 = vld [vmem:[#allocation10 + $0x304] ss:$16 sps:$4 sm:$0xff]  }
 0x25d   : > { %4421 = vmatpush1.bf16.msra.mxu0 %v10322_v24  ;;  %v10385_v24 = vld [vmem:[#allocation10 + $0x300] ss:$16 sps:$4 sm:$0xff]  }
 0x25e   : > { %4422 = vmatprep.subr.bf16.mxu0 %v10327_v25  ;;  %v10390_v25 = vld [vmem:[#allocation10 + $0x324] ss:$16 sps:$4 sm:$0xff]  }
 0x261   : > { %4423 = vmatpush1.bf16.msra.mxu0 %v10325_v26  ;;  %v10457_v26 = vld [vmem:[#allocation7 + $0xc] ss:$16 sps:$4 sm:$0xff]  }
 0x262   : > { %4424 = vmatprep.subr.bf16.mxu0 %v10330_v16  ;;  %v10459_v16 = vld [vmem:[#allocation7 + $0x8] ss:$16 sps:$4 sm:$0xff]   ;;  %1725 = vmatprep.subr.bf16.mxu1 %v10457_v26  ;;  %v10423_v26 = vld [vmem:[#allocation10 + $0x484] ss:$16 sps:$4 sm:$0xff]  }
 0x263   : > { %v11895_v30 = vpop.f32.mrb[0].mxu0  ;;  %1726 = vmatpush1.bf16.msra.mxu1 %v10459_v16  ;;  %v10492_v16 = vld [vmem:[#allocation7 + $0x168] ss:$16 sps:$4 sm:$0xff]  }
 0x264   : > { %v11897_v31 = vpop.f32.mrb[1].mxu0 }
 0x265   : > { %v1722_v33 = vpop.f32.mrb[2].mxu0  ;;  %4425 = vmatpush1.bf16.msra.mxu0 %v10328_v27  ;;  %v10460_v27 = vld [vmem:[#allocation7 + $0x2c] ss:$16 sps:$4 sm:$0xff]  }
 0x266   : > { %v1723_v36 = vpop.f32.mrb[3].mxu0  ;;  %4426 = vmatprep.subr.bf16.mxu0 %v10333_v28  ;;  %v10388_v28 = vld [vmem:[#allocation10 + $0x320] ss:$16 sps:$4 sm:$0xff]   ;;  %v10393_v33 = vld [vmem:[#allocation10 + $0x344] ss:$16 sps:$4 sm:$0xff]   ;;  %1727 = vmatprep.subr.bf16.mxu1 %v10460_v27 }
 0x267   : > { %v10463_v36 = vld [vmem:[#allocation7 + $0x4c] ss:$16 sps:$4 sm:$0xff]  }
 0x268   : > { %v10493_v27 = vld [vmem:[#allocation7 + $0x18c] ss:$16 sps:$4 sm:$0xff]  }
 0x269   : > { %4427 = vmatpush1.bf16.msra.mxu0 %v10331_v34  ;;  %v10462_v34 = vld [vmem:[#allocation7 + $0x28] ss:$16 sps:$4 sm:$0xff]  }
 0x26a   : > { %4428 = vmatprep.subr.bf16.mxu0 %v10336_v38  ;;  %v10391_v38 = vld [vmem:[#allocation10 + $0x340] ss:$16 sps:$4 sm:$0xff]   ;;  %1728 = vmatpush1.bf16.msra.mxu1 %v10462_v34  ;;  %v10495_v34 = vld [vmem:[#allocation7 + $0x188] ss:$16 sps:$4 sm:$0xff]  }
 0x26b   : > { %1729 = vmatprep.subr.bf16.mxu1 %v10463_v36  ;;  %v10496_v36 = vld [vmem:[#allocation7 + $0x1ac] ss:$16 sps:$4 sm:$0xff]  }
 0x26d   : > { %4429 = vmatpush1.bf16.msra.mxu0 %v10334_v39  ;;  %v10396_v39 = vld [vmem:[#allocation10 + $0x364] ss:$16 sps:$4 sm:$0xff]  }
 0x26e   : > { %4430 = vmatprep.subr.bf16.mxu0 %v10339_v40  ;;  %v10465_v40 = vld [vmem:[#allocation7 + $0x48] ss:$16 sps:$4 sm:$0xff]  }
 0x26f   : > { %1730 = vmatpush1.bf16.msra.mxu1 %v10465_v40  ;;  %v10498_v40 = vld [vmem:[#allocation7 + $0x1a8] ss:$16 sps:$4 sm:$0xff]  }
 0x271   : > { %4431 = vmatpush1.bf16.msra.mxu0 %v10337_v41  ;;  %v10466_v41 = vld [vmem:[#allocation7 + $0x6c] ss:$16 sps:$4 sm:$0xff]  }
 0x272   : > { %4432 = vmatprep.subr.bf16.mxu0 %v10342_v42  ;;  %v10394_v42 = vld [vmem:[#allocation10 + $0x360] ss:$16 sps:$4 sm:$0xff]   ;;  %1731 = vmatprep.subr.bf16.mxu1 %v10466_v41  ;;  %v10499_v41 = vld [vmem:[#allocation7 + $0x1cc] ss:$16 sps:$4 sm:$0xff]  }
 0x275   : > { %4433 = vmatpush1.bf16.msra.mxu0 %v10340_v44  ;;  %v10399_v44 = vld [vmem:[#allocation10 + $0x384] ss:$16 sps:$4 sm:$0xff]  }
 0x276   : > { %4434 = vmatprep.subr.bf16.mxu0 %v10345_v47  ;;  %v10468_v47 = vld [vmem:[#allocation7 + $0x68] ss:$16 sps:$4 sm:$0xff]  }
 0x277   : > { %1732 = vmatpush1.bf16.msra.mxu1 %v10468_v47  ;;  %v10501_v47 = vld [vmem:[#allocation7 + $0x1c8] ss:$16 sps:$4 sm:$0xff]  }
 0x279   : > { %4435 = vmatpush1.bf16.msra.mxu0 %v10343_v49  ;;  %v10469_v49 = vld [vmem:[#allocation7 + $0x8c] ss:$16 sps:$4 sm:$0xff]  }
 0x27a   : > { %4436 = vmatprep.subr.bf16.mxu0 %v10348_v50  ;;  %v10397_v50 = vld [vmem:[#allocation10 + $0x380] ss:$16 sps:$4 sm:$0xff]   ;;  %1733 = vmatprep.subr.bf16.mxu1 %v10469_v49  ;;  %v10502_v49 = vld [vmem:[#allocation7 + $0x1ec] ss:$16 sps:$4 sm:$0xff]  }
 0x27d   : > { %4437 = vmatpush1.bf16.msra.mxu0 %v10346_v51  ;;  %v10402_v51 = vld [vmem:[#allocation10 + $0x3a4] ss:$16 sps:$4 sm:$0xff]  }
 0x27e   : > { %4438 = vmatprep.subr.bf16.mxu0 %v10351_v52  ;;  %v10471_v52 = vld [vmem:[#allocation7 + $0x88] ss:$16 sps:$4 sm:$0xff]  }
 0x27f   : > { %1734 = vmatpush1.bf16.msra.mxu1 %v10471_v52  ;;  %v10504_v52 = vld [vmem:[#allocation7 + $0x1e8] ss:$16 sps:$4 sm:$0xff]  }
 0x281   : > { %4439 = vmatpush1.bf16.msra.mxu0 %v10349_v54  ;;  %v10472_v54 = vld [vmem:[#allocation7 + $0xac] ss:$16 sps:$4 sm:$0xff]  }
 0x282   : > { %4440 = vmatprep.subr.bf16.mxu0 %v10354_v55  ;;  %v10400_v55 = vld [vmem:[#allocation10 + $0x3a0] ss:$16 sps:$4 sm:$0xff]   ;;  %1735 = vmatprep.subr.bf16.mxu1 %v10472_v54  ;;  %v10507_v54 = vld [vmem:[#allocation7 + $0x20c] ss:$16 sps:$4 sm:$0xff]  }
 0x285   : > { %4441 = vmatpush1.bf16.msra.mxu0 %v10352_v56  ;;  %v10405_v56 = vld [vmem:[#allocation10 + $0x3c4] ss:$16 sps:$4 sm:$0xff]  }
 0x286   : > { %4442 = vmatprep.subr.bf16.mxu0 %v10357_v57  ;;  %v10474_v57 = vld [vmem:[#allocation7 + $0xa8] ss:$16 sps:$4 sm:$0xff]  }
 0x287   : > { %1736 = vmatpush1.bf16.msra.mxu1 %v10474_v57  ;;  %v10505_v57 = vld [vmem:[#allocation7 + $0x208] ss:$16 sps:$4 sm:$0xff]  }
 0x289   : > { %4443 = vmatpush1.bf16.msra.mxu0 %v10355_v58  ;;  %v10475_v58 = vld [vmem:[#allocation7 + $0xcc] ss:$16 sps:$4 sm:$0xff]  }
 0x28a   : > { %4444 = vmatprep.subr.bf16.mxu0 %v10360_v59  ;;  %v10403_v59 = vld [vmem:[#allocation10 + $0x3c0] ss:$16 sps:$4 sm:$0xff]   ;;  %1737 = vmatprep.subr.bf16.mxu1 %v10475_v58  ;;  %v10510_v58 = vld [vmem:[#allocation7 + $0x22c] ss:$16 sps:$4 sm:$0xff]  }
 0x28d   : > { %4445 = vmatpush1.bf16.msra.mxu0 %v10358_v60  ;;  %v10408_v60 = vld [vmem:[#allocation10 + $0x3e4] ss:$16 sps:$4 sm:$0xff]  }
 0x28e   : > { %4457 = vmatprep.subr.bf16.mxu0 %v10363_v61  ;;  %v10477_v61 = vld [vmem:[#allocation7 + $0xc8] ss:$16 sps:$4 sm:$0xff]  }
 0x28f   : > { %1738 = vmatpush1.bf16.msra.mxu1 %v10477_v61  ;;  %v10508_v61 = vld [vmem:[#allocation7 + $0x228] ss:$16 sps:$4 sm:$0xff]  }
 0x290   : > { %4447 = vmatmul.mubr.bf16.vlgmr.msra.gmra.mrb[8].mxu0 %v11873_v46 }
 0x291   : > { %4458 = vmatpush1.bf16.msra.mxu0 %v10361_v63  ;;  %4489 = vmatprep.mubr.bf16.mxu0 %v11875_v48  ;;  %v10478_v63 = vld [vmem:[#allocation7 + $0xec] ss:$16 sps:$4 sm:$0xff]  }
 0x292   : > { %4459 = vmatprep.subr.bf16.mxu0 %v10366_v1  ;;  %v10406_v1 = vld [vmem:[#allocation10 + $0x3e0] ss:$16 sps:$4 sm:$0xff]   ;;  %1739 = vmatprep.subr.bf16.mxu1 %v10478_v63  ;;  %v10513_v63 = vld [vmem:[#allocation7 + $0x24c] ss:$16 sps:$4 sm:$0xff]  }
 0x295   : > { %4460 = vmatpush1.bf16.msra.mxu0 %v10364_v2  ;;  %v10411_v2 = vld [vmem:[#allocation10 + $0x404] ss:$16 sps:$4 sm:$0xff]  }
 0x296   : > { %4461 = vmatprep.subr.bf16.mxu0 %v10369_v3  ;;  %v10480_v3 = vld [vmem:[#allocation7 + $0xe8] ss:$16 sps:$4 sm:$0xff]  }
 0x297   : > { %1740 = vmatpush1.bf16.msra.mxu1 %v10480_v3  ;;  %v10511_v3 = vld [vmem:[#allocation7 + $0x248] ss:$16 sps:$4 sm:$0xff]  }
 0x299   : > { %4462 = vmatpush1.bf16.msra.mxu0 %v10367_v4  ;;  %v10481_v4 = vld [vmem:[#allocation7 + $0x10c] ss:$16 sps:$4 sm:$0xff]  }
 0x29a   : > { %4463 = vmatprep.subr.bf16.mxu0 %v10372_v5  ;;  %v10409_v5 = vld [vmem:[#allocation10 + $0x400] ss:$16 sps:$4 sm:$0xff]   ;;  %1741 = vmatprep.subr.bf16.mxu1 %v10481_v4  ;;  %v10516_v4 = vld [vmem:[#allocation7 + $0x26c] ss:$16 sps:$4 sm:$0xff]  }
 0x29d   : > { %4464 = vmatpush1.bf16.msra.mxu0 %v10370_v6  ;;  %v10414_v6 = vld [vmem:[#allocation10 + $0x424] ss:$16 sps:$4 sm:$0xff]  }
 0x29e   : > { %4465 = vmatprep.subr.bf16.mxu0 %v10375_v7  ;;  %v10483_v7 = vld [vmem:[#allocation7 + $0x108] ss:$16 sps:$4 sm:$0xff]  }
 0x29f   : > { %1742 = vmatpush1.bf16.msra.mxu1 %v10483_v7  ;;  %v10519_v7 = vld [vmem:[#allocation7 + $0x28c] ss:$16 sps:$4 sm:$0xff]  }
 0x2a1   : > { %4466 = vmatpush1.bf16.msra.mxu0 %v10373_v8  ;;  %v10484_v8 = vld [vmem:[#allocation7 + $0x12c] ss:$16 sps:$4 sm:$0xff]  }
 0x2a2   : > { %4467 = vmatprep.subr.bf16.mxu0 %v10378_v11  ;;  %v10412_v11 = vld [vmem:[#allocation10 + $0x420] ss:$16 sps:$4 sm:$0xff]   ;;  %1743 = vmatprep.subr.bf16.mxu1 %v10484_v8 }
 0x2a3   : > { %v10445_v8 = vld [vmem:[#allocation10 + $0x580] ss:$16 sps:$4 sm:$0xff]  }
 0x2a5   : > { %4468 = vmatpush1.bf16.msra.mxu0 %v10376_v15  ;;  %v10417_v15 = vld [vmem:[#allocation10 + $0x444] ss:$16 sps:$4 sm:$0xff]  }
 0x2a6   : > { %4469 = vmatprep.subr.bf16.mxu0 %v10381_v17  ;;  %v10486_v17 = vld [vmem:[#allocation7 + $0x128] ss:$16 sps:$4 sm:$0xff]  }
 0x2a7   : > { %1744 = vmatpush1.bf16.msra.mxu1 %v10486_v17  ;;  %v10448_v17 = vld [vmem:[#allocation10 + $0x5a0] ss:$16 sps:$4 sm:$0xff]  }
 0x2a9   : > { %4470 = vmatpush1.bf16.msra.mxu0 %v10379_v18  ;;  %v10487_v18 = vld [vmem:[#allocation7 + $0x14c] ss:$16 sps:$4 sm:$0xff]  }
 0x2aa   : > { %4471 = vmatprep.subr.bf16.mxu0 %v10384_v19  ;;  %v10415_v19 = vld [vmem:[#allocation10 + $0x440] ss:$16 sps:$4 sm:$0xff]   ;;  %1745 = vmatprep.subr.bf16.mxu1 %v10487_v18  ;;  %v10453_v18 = vld [vmem:[#allocation10 + $0x5c4] ss:$16 sps:$4 sm:$0xff]  }
 0x2ad   : > { %4472 = vmatpush1.bf16.msra.mxu0 %v10382_v21  ;;  %v10420_v21 = vld [vmem:[#allocation10 + $0x464] ss:$16 sps:$4 sm:$0xff]  }
 0x2ae   : > { %4473 = vmatprep.subr.bf16.mxu0 %v10387_v23  ;;  %v10489_v23 = vld [vmem:[#allocation7 + $0x148] ss:$16 sps:$4 sm:$0xff]  }
 0x2af   : > { %1746 = vmatpush1.bf16.msra.mxu1 %v10489_v23  ;;  %v10451_v23 = vld [vmem:[#allocation10 + $0x5c0] ss:$16 sps:$4 sm:$0xff]  }
 0x2b1   : > { %4474 = vmatpush1.bf16.msra.mxu0 %v10385_v24  ;;  %v10490_v24 = vld [vmem:[#allocation7 + $0x16c] ss:$16 sps:$4 sm:$0xff]  }
 0x2b2   : > { %4475 = vmatprep.subr.bf16.mxu0 %v10390_v25  ;;  %v10418_v25 = vld [vmem:[#allocation10 + $0x460] ss:$16 sps:$4 sm:$0xff]   ;;  %1747 = vmatprep.subr.bf16.mxu1 %v10490_v24  ;;  %v10456_v24 = vld [vmem:[#allocation10 + $0x5e4] ss:$16 sps:$4 sm:$0xff]  }
 0x2b3   : > { %1748 = vmatpush1.bf16.msra.mxu1 %v10492_v16  ;;  %v10454_v16 = vld [vmem:[#allocation10 + $0x5e0] ss:$16 sps:$4 sm:$0xff]  }
 0x2b4   : > { %1749 = vmatprep.subr.bf16.mxu1 %v10493_v27  ;;  %v10526_v27 = vld [vmem:[#allocation7 + $0x2e8] ss:$16 sps:$4 sm:$0xff]  }
 0x2b5   : > { %4476 = vmatpush1.bf16.msra.mxu0 %v10388_v28  ;;  %v10421_v28 = vld [vmem:[#allocation10 + $0x480] ss:$16 sps:$4 sm:$0xff]  }
 0x2b6   : > { %4477 = vmatprep.subr.bf16.mxu0 %v10393_v33  ;;  %v10426_v33 = vld [vmem:[#allocation10 + $0x4a4] ss:$16 sps:$4 sm:$0xff]  }
 0x2b7   : > { %1750 = vmatpush1.bf16.msra.mxu1 %v10495_v34  ;;  %v10531_v34 = vld [vmem:[#allocation7 + $0x30c] ss:$16 sps:$4 sm:$0xff]  }
 0x2b8   : > { %1751 = vmatprep.subr.bf16.mxu1 %v10496_v36  ;;  %v10529_v36 = vld [vmem:[#allocation7 + $0x308] ss:$16 sps:$4 sm:$0xff]  }
 0x2b9   : > { %4478 = vmatpush1.bf16.msra.mxu0 %v10391_v38  ;;  %v10424_v38 = vld [vmem:[#allocation10 + $0x4a0] ss:$16 sps:$4 sm:$0xff]  }
 0x2ba   : > { %4479 = vmatprep.subr.bf16.mxu0 %v10396_v39  ;;  %v10429_v39 = vld [vmem:[#allocation10 + $0x4c4] ss:$16 sps:$4 sm:$0xff]  }
 0x2bb   : > { %1752 = vmatpush1.bf16.msra.mxu1 %v10498_v40  ;;  %v10537_v40 = vld [vmem:[#allocation7 + $0x34c] ss:$16 sps:$4 sm:$0xff]  }
 0x2bc   : > { %1753 = vmatprep.subr.bf16.mxu1 %v10499_v41  ;;  %v10535_v41 = vld [vmem:[#allocation7 + $0x348] ss:$16 sps:$4 sm:$0xff]  }
 0x2bd   : > { %4480 = vmatpush1.bf16.msra.mxu0 %v10394_v42  ;;  %v10427_v42 = vld [vmem:[#allocation10 + $0x4c0] ss:$16 sps:$4 sm:$0xff]  }
 0x2be   : > { %4481 = vmatprep.subr.bf16.mxu0 %v10399_v44  ;;  %v10432_v44 = vld [vmem:[#allocation10 + $0x4e4] ss:$16 sps:$4 sm:$0xff]  }
 0x2bf   : > { %1754 = vmatpush1.bf16.msra.mxu1 %v10501_v47 }
 0x2c0   : > { %1755 = vmatprep.subr.bf16.mxu1 %v10502_v49 }
 0x2c1   : > { %4482 = vmatpush1.bf16.msra.mxu0 %v10397_v50  ;;  %v10430_v50 = vld [vmem:[#allocation10 + $0x4e0] ss:$16 sps:$4 sm:$0xff]  }
 0x2c2   : > { %4483 = vmatprep.subr.bf16.mxu0 %v10402_v51  ;;  %v10435_v51 = vld [vmem:[#allocation10 + $0x504] ss:$16 sps:$4 sm:$0xff]  }
 0x2c3   : > { %1756 = vmatpush1.bf16.msra.mxu1 %v10504_v52 }
 0x2c4   : > { %1766 = vmatprep.subr.bf16.mxu1 %v10507_v54 }
 0x2c5   : > { %4484 = vmatpush1.bf16.msra.mxu0 %v10400_v55  ;;  %v10433_v55 = vld [vmem:[#allocation10 + $0x500] ss:$16 sps:$4 sm:$0xff]  }
 0x2c6   : > { %4485 = vmatprep.subr.bf16.mxu0 %v10405_v56  ;;  %v10438_v56 = vld [vmem:[#allocation10 + $0x524] ss:$16 sps:$4 sm:$0xff]   ;;  %1758 = vmatmul.mubr.bf16.vlgmr.msra.gmra.mrb[0].mxu1 %v11837_v43 }
 0x2c7   : > { %1767 = vmatpush1.bf16.msra.mxu1 %v10505_v57  ;;  %1798 = vmatprep.mubr.bf16.mxu1 %v11839_v45  ;;  %v10447_v43 = vld [vmem:[#allocation10 + $0x584] ss:$16 sps:$4 sm:$0xff]  }
 0x2c8   : > { %1768 = vmatprep.subr.bf16.mxu1 %v10510_v58  ;;  %v10450_v45 = vld [vmem:[#allocation10 + $0x5a4] ss:$16 sps:$4 sm:$0xff]  }
 0x2c9   : > { %4486 = vmatpush1.bf16.msra.mxu0 %v10403_v59  ;;  %v10436_v59 = vld [vmem:[#allocation10 + $0x520] ss:$16 sps:$4 sm:$0xff]  }
 0x2ca   : > { %4487 = vmatprep.subr.bf16.mxu0 %v10408_v60  ;;  %v10441_v60 = vld [vmem:[#allocation10 + $0x544] ss:$16 sps:$4 sm:$0xff]  }
 0x2cb   : > { %1769 = vmatpush1.bf16.msra.mxu1 %v10508_v61  ;;  %v10546_v61 = vld [vmem:[#allocation7 + $0x3ac] ss:$16 sps:$4 sm:$0xff]  }
 0x2cc   : > { %1770 = vmatprep.subr.bf16.mxu1 %v10513_v63  ;;  %v10544_v63 = vld [vmem:[#allocation7 + $0x3a8] ss:$16 sps:$4 sm:$0xff]  }
 0x2cd   : > { %4488 = vmatpush1.bf16.msra.mxu0 %v10406_v1  ;;  %v10439_v1 = vld [vmem:[#allocation10 + $0x540] ss:$16 sps:$4 sm:$0xff]  }
 0x2ce   : > { %4500 = vmatprep.subr.bf16.mxu0 %v10411_v2  ;;  %v10444_v2 = vld [vmem:[#allocation10 + $0x564] ss:$16 sps:$4 sm:$0xff]  }
 0x2cf   : > { %1771 = vmatpush1.bf16.msra.mxu1 %v10511_v3  ;;  %v10552_v3 = vld [vmem:[#allocation7 + $0x3ec] ss:$16 sps:$4 sm:$0xff]  }
 0x2d0   : > { %4490 = vmatmul.mubr.bf16.vlgmr.msra.gmra.mrb[8].mxu0 %v11883_v29  ;;  %1772 = vmatprep.subr.bf16.mxu1 %v10516_v4  ;;  %v10550_v4 = vld [vmem:[#allocation7 + $0x3e8] ss:$16 sps:$4 sm:$0xff]  }
 0x2d1   : > { %4501 = vmatpush1.bf16.msra.mxu0 %v10409_v5  ;;  %4532 = vmatprep.mubr.bf16.mxu0 %v11885_v32  ;;  %v10442_v5 = vld [vmem:[#allocation10 + $0x560] ss:$16 sps:$4 sm:$0xff]  }
 0x2d2   : > { %4502 = vmatprep.subr.bf16.mxu0 %v10414_v6  ;;  %v10514_v6 = vld [vmem:[#allocation7 + $0x268] ss:$16 sps:$4 sm:$0xff]  }
 0x2d3   : > { %1773 = vmatpush1.bf16.msra.mxu1 %v10514_v6  ;;  %v10556_v6 = vld [vmem:[#allocation7 + $0x428] ss:$16 sps:$4 sm:$0xff]  }
 0x2d4   : > { %1774 = vmatprep.subr.bf16.mxu1 %v10519_v7  ;;  %v10561_v7 = vld [vmem:[#allocation7 + $0x44c] ss:$16 sps:$4 sm:$0xff]  }
 0x2d5   : > { %4503 = vmatpush1.bf16.msra.mxu0 %v10412_v11  ;;  %v10517_v11 = vld [vmem:[#allocation7 + $0x288] ss:$16 sps:$4 sm:$0xff]  }
 0x2d6   : > { %4504 = vmatprep.subr.bf16.mxu0 %v10417_v15  ;;  %v10522_v15 = vld [vmem:[#allocation7 + $0x2ac] ss:$16 sps:$4 sm:$0xff]  }
 0x2d7   : > { %1775 = vmatpush1.bf16.msra.mxu1 %v10517_v11  ;;  %v10562_v11 = vld [vmem:[#allocation7 + $0x468] ss:$16 sps:$4 sm:$0xff]  }
 0x2d8   : > { %1776 = vmatprep.subr.bf16.mxu1 %v10522_v15  ;;  %v10567_v15 = vld [vmem:[#allocation7 + $0x48c] ss:$16 sps:$4 sm:$0xff]  }
 0x2d9   : > { %4505 = vmatpush1.bf16.msra.mxu0 %v10415_v19  ;;  %v10520_v19 = vld [vmem:[#allocation7 + $0x2a8] ss:$16 sps:$4 sm:$0xff]  }
 0x2da   : > { %4506 = vmatprep.subr.bf16.mxu0 %v10420_v21  ;;  %v10525_v21 = vld [vmem:[#allocation7 + $0x2cc] ss:$16 sps:$4 sm:$0xff]  }
 0x2db   : > { %1777 = vmatpush1.bf16.msra.mxu1 %v10520_v19  ;;  %v10573_v19 = vld [vmem:[#allocation7 + $0x4cc] ss:$16 sps:$4 sm:$0xff]  }
 0x2dc   : > { %1778 = vmatprep.subr.bf16.mxu1 %v10525_v21  ;;  %v10576_v21 = vld [vmem:[#allocation7 + $0x4ec] ss:$16 sps:$4 sm:$0xff]  }
 0x2dd   : > { %4507 = vmatpush1.bf16.msra.mxu0 %v10418_v25  ;;  %v10523_v25 = vld [vmem:[#allocation7 + $0x2c8] ss:$16 sps:$4 sm:$0xff]  }
 0x2de   : > { %4508 = vmatprep.subr.bf16.mxu0 %v10423_v26  ;;  %v10528_v26 = vld [vmem:[#allocation7 + $0x2ec] ss:$16 sps:$4 sm:$0xff]  }
 0x2df   : > { %1779 = vmatpush1.bf16.msra.mxu1 %v10523_v25  ;;  %v10577_v25 = vld [vmem:[#allocation7 + $0x508] ss:$16 sps:$4 sm:$0xff]  }
 0x2e0   : > { %1780 = vmatprep.subr.bf16.mxu1 %v10528_v26  ;;  %v10582_v26 = vld [vmem:[#allocation7 + $0x52c] ss:$16 sps:$4 sm:$0xff]  }
 0x2e1   : > { %4509 = vmatpush1.bf16.msra.mxu0 %v10421_v28  ;;  %v11478_v28 = vmov 0.0|0.0  }
 0x2e2   : > { %4510 = vmatprep.subr.bf16.mxu0 %v10426_v33  ;;  %v11480_v33 = vmov 0.0  }
 0x2e3   : > { %1781 = vmatpush1.bf16.msra.mxu1 %v10526_v27  ;;  %v10585_v27 = vld [vmem:[#allocation7 + $0x54c] ss:$16 sps:$4 sm:$0xff]  }
 0x2e4   : > { %1782 = vmatprep.subr.bf16.mxu1 %v10531_v34  ;;  %v10583_v34 = vld [vmem:[#allocation7 + $0x548] ss:$16 sps:$4 sm:$0xff]  }
 0x2e5   : > { %4511 = vmatpush1.bf16.msra.mxu0 %v10424_v38  ;;  %v10532_v38 = vld [vmem:[#allocation7 + $0x328] ss:$16 sps:$4 sm:$0xff]  }
 0x2e6   : > { %4512 = vmatprep.subr.bf16.mxu0 %v10429_v39  ;;  %v10534_v39 = vld [vmem:[#allocation7 + $0x32c] ss:$16 sps:$4 sm:$0xff]  }
 0x2e7   : > { %1783 = vmatpush1.bf16.msra.mxu1 %v10529_v36  ;;  %v10588_v36 = vld [vmem:[#allocation7 + $0x56c] ss:$16 sps:$4 sm:$0xff]  }
 0x2e8   : > { %1784 = vmatprep.subr.bf16.mxu1 %v10534_v39  ;;  %v10591_v39 = vld [vmem:[#allocation7 + $0x58c] ss:$16 sps:$4 sm:$0xff]  }
 0x2e9   : > { %4513 = vmatpush1.bf16.msra.mxu0 %v10427_v42  ;;  %v10540_v42 = vld [vmem:[#allocation7 + $0x36c] ss:$16 sps:$4 sm:$0xff]  }
 0x2ea   : > { %4514 = vmatprep.subr.bf16.mxu0 %v10432_v44 }
 0x2eb   : > { %1785 = vmatpush1.bf16.msra.mxu1 %v10532_v38  ;;  %v10586_v38 = vld [vmem:[#allocation7 + $0x568] ss:$16 sps:$4 sm:$0xff]  }
 0x2ec   : > { %1786 = vmatprep.subr.bf16.mxu1 %v10537_v40  ;;  %v10589_v40 = vld [vmem:[#allocation7 + $0x588] ss:$16 sps:$4 sm:$0xff]  }
 0x2ed   : > { %4515 = vmatpush1.bf16.msra.mxu0 %v10430_v50  ;;  %v11138_v50 = vld [vmem:[#allocation11 + $0x520] ss:$24 sps:$4 sm:$0xff]  }
 0x2ee   : > { %4516 = vmatprep.subr.bf16.mxu0 %v10435_v51  ;;  %v10538_v51 = vld [vmem:[#allocation7 + $0x368] ss:$16 sps:$4 sm:$0xff]  }
 0x2ef   : > { %1787 = vmatpush1.bf16.msra.mxu1 %v10535_v41  ;;  %v10594_v41 = vld [vmem:[#allocation7 + $0x5ac] ss:$16 sps:$4 sm:$0xff]  }
 0x2f0   : > { %1788 = vmatprep.subr.bf16.mxu1 %v10540_v42  ;;  %v10592_v42 = vld [vmem:[#allocation7 + $0x5a8] ss:$16 sps:$4 sm:$0xff]  }
 0x2f1   : > { %4517 = vmatpush1.bf16.msra.mxu0 %v10433_v55 }
 0x2f2   : > { %4518 = vmatprep.subr.bf16.mxu0 %v10438_v56  ;;  %v10543_v56 = vld [vmem:[#allocation7 + $0x38c] ss:$16 sps:$4 sm:$0xff]  }
 0x2f3   : > { %1789 = vmatpush1.bf16.msra.mxu1 %v10538_v51  ;;  %v10600_v51 = vld [vmem:[#allocation7 + $0x5ec] ss:$16 sps:$4 sm:$0xff]  }
 0x2f4   : > { %1790 = vmatprep.subr.bf16.mxu1 %v10543_v56  ;;  %v10601_v56 = vld [vmem:[#allocation8 + $0x8] ss:$16 sps:$4 sm:$0xff]  }
 0x2f5   : > { %4519 = vmatpush1.bf16.msra.mxu0 %v10436_v59  ;;  %v10541_v59 = vld [vmem:[#allocation7 + $0x388] ss:$16 sps:$4 sm:$0xff]  }
 0x2f6   : > { %4520 = vmatprep.subr.bf16.mxu0 %v10441_v60  ;;  %v1848_v60 = vmul.f32 0.125, %v11895_v30  ;;  %v10555_v30 = vld [vmem:[#allocation7 + $0x40c] ss:$16 sps:$4 sm:$0xff]  }
 0x2f7   : > { %1791 = vmatpush1.bf16.msra.mxu1 %v10541_v59  ;;  %v10606_v59 = vld [vmem:[#allocation8 + $0x2c] ss:$16 sps:$4 sm:$0xff]  }
 0x2f8   : > { %1792 = vmatprep.subr.bf16.mxu1 %v10546_v61  ;;  %v10609_v61 = vld [vmem:[#allocation8 + $0x4c] ss:$16 sps:$4 sm:$0xff]  }
 0x2f9   : > { %4521 = vmatpush1.bf16.msra.mxu0 %v10439_v1  ;;  %v10549_v1 = vld [vmem:[#allocation7 + $0x3cc] ss:$16 sps:$4 sm:$0xff]  }
 0x2fa   : > { %4522 = vmatprep.subr.bf16.mxu0 %v10444_v2  ;;  %v10547_v2 = vld [vmem:[#allocation7 + $0x3c8] ss:$16 sps:$4 sm:$0xff]  }
 0x2fb   : > { %1793 = vmatpush1.bf16.msra.mxu1 %v10544_v63  ;;  %v10607_v63 = vld [vmem:[#allocation8 + $0x48] ss:$16 sps:$4 sm:$0xff]  }
 0x2fc   : > { %1794 = vmatprep.subr.bf16.mxu1 %v10549_v1  ;;  %v10612_v1 = vld [vmem:[#allocation8 + $0x6c] ss:$16 sps:$4 sm:$0xff]  }
 0x2fd   : > { %4523 = vmatpush1.bf16.msra.mxu0 %v10442_v5  ;;  %v10553_v5 = vld [vmem:[#allocation7 + $0x408] ss:$16 sps:$4 sm:$0xff]  }
 0x2fe   : > { %4524 = vmatprep.subr.bf16.mxu0 %v10447_v43  ;;  %v10558_v43 = vld [vmem:[#allocation7 + $0x42c] ss:$16 sps:$4 sm:$0xff]  }
 0x2ff   : > { %1795 = vmatpush1.bf16.msra.mxu1 %v10547_v2  ;;  %v10610_v2 = vld [vmem:[#allocation8 + $0x68] ss:$16 sps:$4 sm:$0xff]  }
 0x300   : > { %1796 = vmatprep.subr.bf16.mxu1 %v10552_v3  ;;  %v10615_v3 = vld [vmem:[#allocation8 + $0x8c] ss:$16 sps:$4 sm:$0xff]  }
 0x301   : > { %4525 = vmatpush1.bf16.msra.mxu0 %v10445_v8  ;;  %v10559_v8 = vld [vmem:[#allocation7 + $0x448] ss:$16 sps:$4 sm:$0xff]  }
 0x302   : > { %4526 = vmatprep.subr.bf16.mxu0 %v10450_v45  ;;  %v10564_v45 = vld [vmem:[#allocation7 + $0x46c] ss:$16 sps:$4 sm:$0xff]  }
 0x303   : > { %1797 = vmatpush1.bf16.msra.mxu1 %v10550_v4  ;;  %v10613_v4 = vld [vmem:[#allocation8 + $0x88] ss:$16 sps:$4 sm:$0xff]  }
 0x304   : > { %1807 = vmatprep.subr.bf16.mxu1 %v10555_v30  ;;  %v10618_v30 = vld [vmem:[#allocation8 + $0xac] ss:$16 sps:$4 sm:$0xff]  }
 0x305   : > { %4527 = vmatpush1.bf16.msra.mxu0 %v10448_v17  ;;  %v10565_v17 = vld [vmem:[#allocation7 + $0x488] ss:$16 sps:$4 sm:$0xff]  }
 0x306   : > { %4528 = vmatprep.subr.bf16.mxu0 %v10453_v18  ;;  %1799 = vmatmul.mubr.bf16.vlgmr.msra.gmra.mrb[0].mxu1 %v11851_v20  ;;  %v10570_v18 = vld [vmem:[#allocation7 + $0x4ac] ss:$16 sps:$4 sm:$0xff]   ;;  %v10568_v20 = vld [vmem:[#allocation7 + $0x4a8] ss:$16 sps:$4 sm:$0xff]  }
 0x307   : > { %1808 = vmatpush1.bf16.msra.mxu1 %v10553_v5  ;;  %1839 = vmatprep.mubr.bf16.mxu1 %v11853_v22  ;;  %v10571_v22 = vld [vmem:[#allocation7 + $0x4c8] ss:$16 sps:$4 sm:$0xff]   ;;  %v10621_v5 = vld [vmem:[#allocation8 + $0xcc] ss:$16 sps:$4 sm:$0xff]  }
 0x308   : > { %1809 = vmatprep.subr.bf16.mxu1 %v10558_v43  ;;  %v10619_v43 = vld [vmem:[#allocation8 + $0xc8] ss:$16 sps:$4 sm:$0xff]  }
 0x309   : > { %4529 = vmatpush1.bf16.msra.mxu0 %v10451_v23  ;;  %v10574_v23 = vld [vmem:[#allocation7 + $0x4e8] ss:$16 sps:$4 sm:$0xff]  }
 0x30a   : > { %4530 = vmatprep.subr.bf16.mxu0 %v10456_v24  ;;  %v10579_v24 = vld [vmem:[#allocation7 + $0x50c] ss:$16 sps:$4 sm:$0xff]  }
 0x30b   : > { %1810 = vmatpush1.bf16.msra.mxu1 %v10556_v6  ;;  %v10624_v6 = vld [vmem:[#allocation8 + $0xec] ss:$16 sps:$4 sm:$0xff]  }
 0x30c   : > { %1811 = vmatprep.subr.bf16.mxu1 %v10561_v7  ;;  %v10622_v7 = vld [vmem:[#allocation8 + $0xe8] ss:$16 sps:$4 sm:$0xff]  }
 0x30d   : > { %4531 = vmatpush1.bf16.msra.mxu0 %v10454_v16  ;;  %v10580_v16 = vld [vmem:[#allocation7 + $0x528] ss:$16 sps:$4 sm:$0xff]  }
 0x30e   : > { %9768 = vmatprep.subr.bf16.mxu0 %v11478_v28 }
 0x30f   : > { %1812 = vmatpush1.bf16.msra.mxu1 %v10559_v8  ;;  %v10627_v8 = vld [vmem:[#allocation8 + $0x10c] ss:$16 sps:$4 sm:$0xff]  }
 0x310   : > { %4533 = vmatmul.mubr.bf16.vlgmr.msra.gmra.mrb[8].mxu0 %v11891_v12  ;;  %1813 = vmatprep.subr.bf16.mxu1 %v10564_v45  ;;  %v10625_v45 = vld [vmem:[#allocation8 + $0x108] ss:$16 sps:$4 sm:$0xff]  }
 0x311   : > { %9660 = vmatprep.mubr.msk.f32.mxu0 %vm11479_vm0, %v11480_v33 }
 0x313   : > { %1814 = vmatpush1.bf16.msra.mxu1 %v10562_v11  ;;  %v10630_v11 = vld [vmem:[#allocation8 + $0x12c] ss:$16 sps:$4 sm:$0xff]  }
 0x314   : > { %1815 = vmatprep.subr.bf16.mxu1 %v10567_v15  ;;  %v10628_v15 = vld [vmem:[#allocation8 + $0x128] ss:$16 sps:$4 sm:$0xff]  }
 0x317   : > { %1816 = vmatpush1.bf16.msra.mxu1 %v10565_v17  ;;  %v10633_v17 = vld [vmem:[#allocation8 + $0x14c] ss:$16 sps:$4 sm:$0xff]  }
 0x318   : > { %1817 = vmatprep.subr.bf16.mxu1 %v10570_v18  ;;  %v10631_v18 = vld [vmem:[#allocation8 + $0x148] ss:$16 sps:$4 sm:$0xff]  }
 0x31b   : > { %1818 = vmatpush1.bf16.msra.mxu1 %v10568_v20  ;;  %v10636_v20 = vld [vmem:[#allocation8 + $0x16c] ss:$16 sps:$4 sm:$0xff]  }
 0x31c   : > { %1819 = vmatprep.subr.bf16.mxu1 %v10573_v19  ;;  %v10634_v19 = vld [vmem:[#allocation8 + $0x168] ss:$16 sps:$4 sm:$0xff]  }
 0x31f   : > { %1820 = vmatpush1.bf16.msra.mxu1 %v10571_v22  ;;  %v10639_v22 = vld [vmem:[#allocation8 + $0x18c] ss:$16 sps:$4 sm:$0xff]  }
 0x320   : > { %1821 = vmatprep.subr.bf16.mxu1 %v10576_v21  ;;  %v10637_v21 = vld [vmem:[#allocation8 + $0x188] ss:$16 sps:$4 sm:$0xff]  }
 0x323   : > { %v3124_v44 = vpop.f32.mrb[4].mxu0  ;;  %1822 = vmatpush1.bf16.msra.mxu1 %v10574_v23  ;;  %v10642_v23 = vld [vmem:[#allocation8 + $0x1ac] ss:$16 sps:$4 sm:$0xff]  }
 0x324   : > { %v11909_v47 = vpop.f32.mrb[5].mxu0  ;;  %1823 = vmatprep.subr.bf16.mxu1 %v10579_v24  ;;  %v10640_v24 = vld [vmem:[#allocation8 + $0x1a8] ss:$16 sps:$4 sm:$0xff]  }
 0x325   : > { %v3128_v49 = vpop.f32.mrb[6].mxu0 }
 0x326   : > { %v9769_v52 = vpack.c.bf16 %v3128_v49, %v3124_v44  ;;  %v11917_v54 = vpop.f32.mrb[7].mxu0  ;;  %v9985_v55 = vpack.i.bf16 %v3128_v49, %v3124_v44  ;;  %v10597_v44 = vld [vmem:[#allocation7 + $0x5cc] ss:$16 sps:$4 sm:$0xff]   ;;  %v10595_v49 = vld [vmem:[#allocation7 + $0x5c8] ss:$16 sps:$4 sm:$0xff]  }
 0x327   : > { %v9995_v57 = vpack.i.bf16 %v11917_v54, %v11909_v47  ;;  %v9783_v58 = vpack.c.bf16 %v11917_v54, %v11909_v47  ;;  %1824 = vmatpush1.bf16.msra.mxu1 %v10577_v25  ;;  %v10645_v25 = vld [vmem:[#allocation8 + $0x1cc] ss:$16 sps:$4 sm:$0xff]  }
 0x328   : > { %9986 = vrot.lane.b32.xlu1 %v9985_v55, %s11481_s11  ;;  %9771 = vmatpush3.bf16.xpose.msk.msra.mxu0 %vm11913_vm2, %v9769_v52  ;;  %v10598_v52 = vld [vmem:[#allocation7 + $0x5e8] ss:$16 sps:$4 sm:$0xff]   ;;  %v10603_v55 = vld [vmem:[#allocation8 + $0xc] ss:$16 sps:$4 sm:$0xff]  }
 0x329   : > { %9772 = vmatprep.subr.bf16.mxu0 %v11478_v28  ;;  %1825 = vmatprep.subr.bf16.mxu1 %v10582_v26  ;;  %v10643_v26 = vld [vmem:[#allocation8 + $0x1c8] ss:$16 sps:$4 sm:$0xff]  }
 0x32b   : > { %1826 = vmatpush1.bf16.msra.mxu1 %v10580_v16  ;;  %v10648_v16 = vld [vmem:[#allocation8 + $0x1ec] ss:$16 sps:$4 sm:$0xff]  }
 0x32c   : > { %5158 = vrot.lane.b32.xlu1 %v1848_v60, %s11481_s11  ;;  %1827 = vmatprep.subr.bf16.mxu1 %v10585_v27  ;;  %v10646_v27 = vld [vmem:[#allocation8 + $0x1e8] ss:$16 sps:$4 sm:$0xff]  }
 0x32f   : > { %9661 = vmatmul.mubr.msk.f32.vlgmr.msra.gmra.mrb[12].mxu0 %vm4673_vm1, %v1848_v60  ;;  %1828 = vmatpush1.bf16.msra.mxu1 %v10583_v34  ;;  %v10604_v60 = vld [vmem:[#allocation8 + $0x28] ss:$16 sps:$4 sm:$0xff]   ;;  %v10651_v34 = vld [vmem:[#allocation8 + $0x20c] ss:$16 sps:$4 sm:$0xff]  }
 0x330   : > { %9667 = vmatprep.mubr.msk.f32.mxu0 %vm11479_vm0, %v11480_v33  ;;  %1829 = vmatprep.subr.bf16.mxu1 %v10588_v36  ;;  %v10649_v36 = vld [vmem:[#allocation8 + $0x208] ss:$16 sps:$4 sm:$0xff]  }
 0x333   : > { %1830 = vmatpush1.bf16.msra.mxu1 %v10586_v38  ;;  %v10654_v38 = vld [vmem:[#allocation8 + $0x22c] ss:$16 sps:$4 sm:$0xff]  }
 0x334   : > { %1831 = vmatprep.subr.bf16.mxu1 %v10591_v39  ;;  %v10652_v39 = vld [vmem:[#allocation8 + $0x228] ss:$16 sps:$4 sm:$0xff]  }
 0x337   : > { %1832 = vmatpush1.bf16.msra.mxu1 %v10589_v40  ;;  %v10657_v40 = vld [vmem:[#allocation8 + $0x24c] ss:$16 sps:$4 sm:$0xff]  }
 0x338   : > { %1833 = vmatprep.subr.bf16.mxu1 %v10594_v41  ;;  %v10655_v41 = vld [vmem:[#allocation8 + $0x248] ss:$16 sps:$4 sm:$0xff]  }
 0x33b   : > { %1834 = vmatpush1.bf16.msra.mxu1 %v10592_v42  ;;  %v10660_v42 = vld [vmem:[#allocation8 + $0x26c] ss:$16 sps:$4 sm:$0xff]  }
 0x33c   : > { %1835 = vmatprep.subr.bf16.mxu1 %v10597_v44  ;;  %v10658_v44 = vld [vmem:[#allocation8 + $0x268] ss:$16 sps:$4 sm:$0xff]  }
 0x33f   : > { %1836 = vmatpush1.bf16.msra.mxu1 %v10595_v49  ;;  %v10663_v49 = vld [vmem:[#allocation8 + $0x28c] ss:$16 sps:$4 sm:$0xff]  }
 0x340   : > { %1837 = vmatprep.subr.bf16.mxu1 %v10600_v51  ;;  %v10661_v51 = vld [vmem:[#allocation8 + $0x288] ss:$16 sps:$4 sm:$0xff]  }
 0x343   : > { %1838 = vmatpush1.bf16.msra.mxu1 %v10598_v52  ;;  %v10666_v52 = vld [vmem:[#allocation8 + $0x2ac] ss:$16 sps:$4 sm:$0xff]  }
 0x344   : > { %3133 = vmatprep.subr.bf16.mxu1 %v10603_v55  ;;  %v10664_v55 = vld [vmem:[#allocation8 + $0x2a8] ss:$16 sps:$4 sm:$0xff]  }
 0x346   : > { %1840 = vmatmul.mubr.bf16.vlgmr.msra.gmra.mrb[0].mxu1 %v11863_v62  ;;  %v10616_v62 = vld [vmem:[#allocation8 + $0xa8] ss:$16 sps:$4 sm:$0xff]  }
 0x347   : > { %3134 = vmatpush1.bf16.msra.mxu1 %v10601_v56  ;;  %3165 = vmatprep.mubr.bf16.mxu1 %v11865_v0  ;;  %v10669_v56 = vld [vmem:[#allocation8 + $0x2cc] ss:$16 sps:$4 sm:$0xff]  }
 0x348   : > { %3135 = vmatprep.subr.bf16.mxu1 %v10606_v59  ;;  %v10667_v59 = vld [vmem:[#allocation8 + $0x2c8] ss:$16 sps:$4 sm:$0xff]  }
 0x34b   : > { %3136 = vmatpush1.bf16.msra.mxu1 %v10604_v60  ;;  %v10672_v60 = vld [vmem:[#allocation8 + $0x2ec] ss:$16 sps:$4 sm:$0xff]  }
 0x34c   : > { %3137 = vmatprep.subr.bf16.mxu1 %v10609_v61  ;;  %v10670_v61 = vld [vmem:[#allocation8 + $0x2e8] ss:$16 sps:$4 sm:$0xff]  }
 0x34f   : > { %3138 = vmatpush1.bf16.msra.mxu1 %v10607_v63  ;;  %v10675_v63 = vld [vmem:[#allocation8 + $0x30c] ss:$16 sps:$4 sm:$0xff]  }
 0x350   : > { %3139 = vmatprep.subr.bf16.mxu1 %v10612_v1  ;;  %v10673_v1 = vld [vmem:[#allocation8 + $0x308] ss:$16 sps:$4 sm:$0xff]  }
 0x353   : > { %3140 = vmatpush1.bf16.msra.mxu1 %v10610_v2  ;;  %v10678_v2 = vld [vmem:[#allocation8 + $0x32c] ss:$16 sps:$4 sm:$0xff]  }
 0x354   : > { %3141 = vmatprep.subr.bf16.mxu1 %v10615_v3  ;;  %v10676_v3 = vld [vmem:[#allocation8 + $0x328] ss:$16 sps:$4 sm:$0xff]  }
 0x357   : > { %3142 = vmatpush1.bf16.msra.mxu1 %v10613_v4  ;;  %v10681_v4 = vld [vmem:[#allocation8 + $0x34c] ss:$16 sps:$4 sm:$0xff]  }
 0x358   : > { %3143 = vmatprep.subr.bf16.mxu1 %v10618_v30  ;;  %v10679_v30 = vld [vmem:[#allocation8 + $0x348] ss:$16 sps:$4 sm:$0xff]  }
 0x35b   : > { %3144 = vmatpush1.bf16.msra.mxu1 %v10616_v62  ;;  %v10684_v62 = vld [vmem:[#allocation8 + $0x36c] ss:$16 sps:$4 sm:$0xff]  }
 0x35c   : > { %3145 = vmatprep.subr.bf16.mxu1 %v10621_v5 }
 0x35f   : > { %3146 = vmatpush1.bf16.msra.mxu1 %v10619_v43 }
 0x360   : > { %3147 = vmatprep.subr.bf16.mxu1 %v10624_v6 }
 0x363   : > { %3148 = vmatpush1.bf16.msra.mxu1 %v10622_v7  ;;  %v10682_v7 = vld [vmem:[#allocation8 + $0x368] ss:$16 sps:$4 sm:$0xff]  }
 0x364   : > { %3149 = vmatprep.subr.bf16.mxu1 %v10627_v8 }
 0x367   : > { %3150 = vmatpush1.bf16.msra.mxu1 %v10625_v45 }
 0x368   : > { %3151 = vmatprep.subr.bf16.mxu1 %v10630_v11 }
 0x36b   : > { %3152 = vmatpush1.bf16.msra.mxu1 %v10628_v15  ;;  %v10687_v15 = vld [vmem:[#allocation8 + $0x38c] ss:$16 sps:$4 sm:$0xff]  }
 0x36c   : > { %3153 = vmatprep.subr.bf16.mxu1 %v10633_v17 }
 0x36f   : > { %3154 = vmatpush1.bf16.msra.mxu1 %v10631_v18 }
 0x370   : > { %3155 = vmatprep.subr.bf16.mxu1 %v10636_v20  ;;  %v10685_v20 = vld [vmem:[#allocation8 + $0x388] ss:$16 sps:$4 sm:$0xff]  }
 0x373   : > { %3156 = vmatpush1.bf16.msra.mxu1 %v10634_v19  ;;  %v10690_v19 = vld [vmem:[#allocation8 + $0x3ac] ss:$16 sps:$4 sm:$0xff]  }
 0x374   : > { %3157 = vmatprep.subr.bf16.mxu1 %v10639_v22  ;;  %v10688_v22 = vld [vmem:[#allocation8 + $0x3a8] ss:$16 sps:$4 sm:$0xff]  }
 0x377   : > { %3158 = vmatpush1.bf16.msra.mxu1 %v10637_v21  ;;  %v10693_v21 = vld [vmem:[#allocation8 + $0x3cc] ss:$16 sps:$4 sm:$0xff]  }
 0x378   : > { %3159 = vmatprep.subr.bf16.mxu1 %v10642_v23  ;;  %v10691_v23 = vld [vmem:[#allocation8 + $0x3c8] ss:$16 sps:$4 sm:$0xff]  }
 0x37b   : > { %3160 = vmatpush1.bf16.msra.mxu1 %v10640_v24  ;;  %v10696_v24 = vld [vmem:[#allocation8 + $0x3ec] ss:$16 sps:$4 sm:$0xff]  }
 0x37c   : > { %3161 = vmatprep.subr.bf16.mxu1 %v10645_v25  ;;  %v10694_v25 = vld [vmem:[#allocation8 + $0x3e8] ss:$16 sps:$4 sm:$0xff]  }
 0x37f   : > { %3162 = vmatpush1.bf16.msra.mxu1 %v10643_v26  ;;  %v10699_v26 = vld [vmem:[#allocation8 + $0x40c] ss:$16 sps:$4 sm:$0xff]  }
 0x380   : > { %3163 = vmatprep.subr.bf16.mxu1 %v10648_v16  ;;  %v10697_v16 = vld [vmem:[#allocation8 + $0x408] ss:$16 sps:$4 sm:$0xff]  }
 0x383   : > { %3164 = vmatpush1.bf16.msra.mxu1 %v10646_v27  ;;  %v10702_v27 = vld [vmem:[#allocation8 + $0x42c] ss:$16 sps:$4 sm:$0xff]  }
 0x384   : > { %3176 = vmatprep.subr.bf16.mxu1 %v10651_v34  ;;  %v10700_v34 = vld [vmem:[#allocation8 + $0x428] ss:$16 sps:$4 sm:$0xff]  }
 0x386   : > { %3166 = vmatmul.mubr.bf16.vlgmr.msra.gmra.mrb[4].mxu1 %v11873_v46 }
 0x387   : > { %3177 = vmatpush1.bf16.msra.mxu1 %v10649_v36  ;;  %3208 = vmatprep.mubr.bf16.mxu1 %v11875_v48  ;;  %v10705_v36 = vld [vmem:[#allocation8 + $0x44c] ss:$16 sps:$4 sm:$0xff]  }
 0x388   : > { %3178 = vmatprep.subr.bf16.mxu1 %v10654_v38  ;;  %v10703_v38 = vld [vmem:[#allocation8 + $0x448] ss:$16 sps:$4 sm:$0xff]  }
 0x38b   : > { %3179 = vmatpush1.bf16.msra.mxu1 %v10652_v39 }
 0x38c   : > { %3180 = vmatprep.subr.bf16.mxu1 %v10657_v40  ;;  %v10708_v40 = vld [vmem:[#allocation8 + $0x46c] ss:$16 sps:$4 sm:$0xff]  }
 0x38f   : > { %3181 = vmatpush1.bf16.msra.mxu1 %v10655_v41 }
 0x390   : > { %3182 = vmatprep.subr.bf16.mxu1 %v10660_v42 }
 0x393   : > { %3183 = vmatpush1.bf16.msra.mxu1 %v10658_v44  ;;  %v10706_v44 = vld [vmem:[#allocation8 + $0x468] ss:$16 sps:$4 sm:$0xff]  }
 0x394   : > { %3184 = vmatprep.subr.bf16.mxu1 %v10663_v49  ;;  %v10711_v49 = vld [vmem:[#allocation8 + $0x48c] ss:$16 sps:$4 sm:$0xff]  }
 0x397   : > { %3185 = vmatpush1.bf16.msra.mxu1 %v10661_v51  ;;  %v10709_v51 = vld [vmem:[#allocation8 + $0x488] ss:$16 sps:$4 sm:$0xff]  }
 0x398   : > { %3186 = vmatprep.subr.bf16.mxu1 %v10666_v52  ;;  %v10714_v52 = vld [vmem:[#allocation8 + $0x4ac] ss:$16 sps:$4 sm:$0xff]  }
 0x39b   : > { %3187 = vmatpush1.bf16.msra.mxu1 %v10664_v55  ;;  %v10712_v55 = vld [vmem:[#allocation8 + $0x4a8] ss:$16 sps:$4 sm:$0xff]  }
 0x39c   : > { %3188 = vmatprep.subr.bf16.mxu1 %v10669_v56  ;;  %v10717_v56 = vld [vmem:[#allocation8 + $0x4cc] ss:$16 sps:$4 sm:$0xff]  }
 0x39f   : > { %3189 = vmatpush1.bf16.msra.mxu1 %v10667_v59  ;;  %v10715_v59 = vld [vmem:[#allocation8 + $0x4c8] ss:$16 sps:$4 sm:$0xff]  }
 0x3a0   : > { %3190 = vmatprep.subr.bf16.mxu1 %v10672_v60  ;;  %v10718_v60 = vld [vmem:[#allocation8 + $0x4e8] ss:$16 sps:$4 sm:$0xff]  }
 0x3a3   : > { %3191 = vmatpush1.bf16.msra.mxu1 %v10670_v61  ;;  %v10720_v61 = vld [vmem:[#allocation8 + $0x4ec] ss:$16 sps:$4 sm:$0xff]  }
 0x3a4   : > { %3192 = vmatprep.subr.bf16.mxu1 %v10675_v63  ;;  %v10723_v63 = vld [vmem:[#allocation8 + $0x50c] ss:$16 sps:$4 sm:$0xff]  }
 0x3a7   : > { %3193 = vmatpush1.bf16.msra.mxu1 %v10673_v1  ;;  %v10721_v1 = vld [vmem:[#allocation8 + $0x508] ss:$16 sps:$4 sm:$0xff]  }
 0x3a8   : > { %3194 = vmatprep.subr.bf16.mxu1 %v10678_v2  ;;  %v10726_v2 = vld [vmem:[#allocation8 + $0x52c] ss:$16 sps:$4 sm:$0xff]  }
 0x3ab   : > { %3195 = vmatpush1.bf16.msra.mxu1 %v10676_v3  ;;  %v10724_v3 = vld [vmem:[#allocation8 + $0x528] ss:$16 sps:$4 sm:$0xff]  }
 0x3ac   : > { %3196 = vmatprep.subr.bf16.mxu1 %v10681_v4  ;;  %v10727_v4 = vld [vmem:[#allocation8 + $0x548] ss:$16 sps:$4 sm:$0xff]  }
 0x3af   : > { %3197 = vmatpush1.bf16.msra.mxu1 %v10679_v30  ;;  %v10729_v30 = vld [vmem:[#allocation8 + $0x54c] ss:$16 sps:$4 sm:$0xff]  }
 0x3b0   : > { %3198 = vmatprep.subr.bf16.mxu1 %v10684_v62  ;;  %v10732_v62 = vld [vmem:[#allocation8 + $0x56c] ss:$16 sps:$4 sm:$0xff]  }
 0x3b3   : > { %3199 = vmatpush1.bf16.msra.mxu1 %v10682_v7  ;;  %v10730_v7 = vld [vmem:[#allocation8 + $0x568] ss:$16 sps:$4 sm:$0xff]  }
 0x3b4   : > { %3200 = vmatprep.subr.bf16.mxu1 %v10687_v15  ;;  %v10733_v15 = vld [vmem:[#allocation8 + $0x588] ss:$16 sps:$4 sm:$0xff]  }
 0x3b7   : > { %3201 = vmatpush1.bf16.msra.mxu1 %v10685_v20  ;;  %v10738_v20 = vld [vmem:[#allocation8 + $0x5ac] ss:$16 sps:$4 sm:$0xff]  }
 0x3b8   : > { %3202 = vmatprep.subr.bf16.mxu1 %v10690_v19  ;;  %v10736_v19 = vld [vmem:[#allocation8 + $0x5a8] ss:$16 sps:$4 sm:$0xff]  }
 0x3bb   : > { %3203 = vmatpush1.bf16.msra.mxu1 %v10688_v22  ;;  %v10741_v22 = vld [vmem:[#allocation8 + $0x5cc] ss:$16 sps:$4 sm:$0xff]  }
 0x3bc   : > { %3204 = vmatprep.subr.bf16.mxu1 %v10693_v21  ;;  %v10739_v21 = vld [vmem:[#allocation8 + $0x5c8] ss:$16 sps:$4 sm:$0xff]  }
 0x3bf   : > { %3205 = vmatpush1.bf16.msra.mxu1 %v10691_v23  ;;  %v10744_v23 = vld [vmem:[#allocation8 + $0x5ec] ss:$16 sps:$4 sm:$0xff]  }
 0x3c0   : > { %3206 = vmatprep.subr.bf16.mxu1 %v10696_v24  ;;  %v10742_v24 = vld [vmem:[#allocation8 + $0x5e8] ss:$16 sps:$4 sm:$0xff]  }
 0x3c3   : > { %3207 = vmatpush1.bf16.msra.mxu1 %v10694_v25  ;;  %v10747_v25 = vld [vmem:[#allocation10 + $0xc] ss:$16 sps:$4 sm:$0xff]  }
 0x3c4   : > { %3219 = vmatprep.subr.bf16.mxu1 %v10699_v26  ;;  %v10745_v26 = vld [vmem:[#allocation10 + $0x8] ss:$16 sps:$4 sm:$0xff]  }
 0x3c6   : > { %3209 = vmatmul.mubr.bf16.vlgmr.msra.gmra.mrb[4].mxu1 %v11883_v29 }
 0x3c7   : > { %3220 = vmatpush1.bf16.msra.mxu1 %v10697_v16  ;;  %3251 = vmatprep.mubr.bf16.mxu1 %v11885_v32  ;;  %v10750_v16 = vld [vmem:[#allocation10 + $0x2c] ss:$16 sps:$4 sm:$0xff]  }
 0x3c8   : > { %3221 = vmatprep.subr.bf16.mxu1 %v10702_v27  ;;  %v10748_v27 = vld [vmem:[#allocation10 + $0x28] ss:$16 sps:$4 sm:$0xff]  }
 0x3cb   : > { %3222 = vmatpush1.bf16.msra.mxu1 %v10700_v34  ;;  %v10753_v34 = vld [vmem:[#allocation10 + $0x4c] ss:$16 sps:$4 sm:$0xff]  }
 0x3cc   : > { %3223 = vmatprep.subr.bf16.mxu1 %v10705_v36  ;;  %v10751_v36 = vld [vmem:[#allocation10 + $0x48] ss:$16 sps:$4 sm:$0xff]  }
 0x3cf   : > { %3224 = vmatpush1.bf16.msra.mxu1 %v10703_v38  ;;  %v10756_v38 = vld [vmem:[#allocation10 + $0x6c] ss:$16 sps:$4 sm:$0xff]  }
 0x3d0   : > { %3225 = vmatprep.subr.bf16.mxu1 %v10708_v40  ;;  %v10754_v40 = vld [vmem:[#allocation10 + $0x68] ss:$16 sps:$4 sm:$0xff]  }
 0x3d3   : > { %3226 = vmatpush1.bf16.msra.mxu1 %v10706_v44  ;;  %v10762_v44 = vld [vmem:[#allocation10 + $0xac] ss:$16 sps:$4 sm:$0xff]  }
 0x3d4   : > { %3227 = vmatprep.subr.bf16.mxu1 %v10711_v49  ;;  %v10760_v49 = vld [vmem:[#allocation10 + $0xa8] ss:$16 sps:$4 sm:$0xff]  }
 0x3d7   : > { %3228 = vmatpush1.bf16.msra.mxu1 %v10709_v51  ;;  %v10765_v51 = vld [vmem:[#allocation10 + $0xcc] ss:$16 sps:$4 sm:$0xff]  }
 0x3d8   : > { %3229 = vmatprep.subr.bf16.mxu1 %v10714_v52 }
 0x3db   : > { %3230 = vmatpush1.bf16.msra.mxu1 %v10712_v55 }
 0x3dc   : > { %3231 = vmatprep.subr.bf16.mxu1 %v10717_v56  ;;  %v10763_v56 = vld [vmem:[#allocation10 + $0xc8] ss:$16 sps:$4 sm:$0xff]  }
 0x3df   : > { %3232 = vmatpush1.bf16.msra.mxu1 %v10715_v59 }
 0x3e0   : > { %3233 = vmatprep.subr.bf16.mxu1 %v10720_v61  ;;  %v10766_v61 = vld [vmem:[#allocation10 + $0xe8] ss:$16 sps:$4 sm:$0xff]  }
 0x3e3   : > { %v11938_v5 = vpop.f32.mrb[8].mxu0  ;;  %3234 = vmatpush1.bf16.msra.mxu1 %v10718_v60  ;;  %v10768_v60 = vld [vmem:[#allocation10 + $0xec] ss:$16 sps:$4 sm:$0xff]  }
 0x3e4   : > { %v11940_v43 = vpop.f32.mrb[9].mxu0  ;;  %3235 = vmatprep.subr.bf16.mxu1 %v10723_v63  ;;  %v10771_v63 = vld [vmem:[#allocation10 + $0x10c] ss:$16 sps:$4 sm:$0xff]  }
 0x3e5   : > { %v11942_v6 = vpop.f32.mrb[10].mxu0 }
 0x3e6   : > { %v9990_v8 = vpack.i.bf16 %v11942_v6, %v11938_v5  ;;  %v9773_v45 = vpack.c.bf16 %v11942_v6, %v11938_v5  ;;  %v11948_v11 = vpop.f32.mrb[11].mxu0  ;;  %v10928_v5 = vld [vmem:[#allocation11 + $0xf8] ss:$24 sps:$4 sm:$0xff]   ;;  %v10936_v6 = vld [vmem:[#allocation11 + $0x12c] ss:$24 sps:$4 sm:$0xff]  }
 0x3e7   : > { %v10000_v17 = vpack.i.bf16 %v11948_v11, %v11940_v43  ;;  %v9787_v18 = vpack.c.bf16 %v11948_v11, %v11940_v43  ;;  %3236 = vmatpush1.bf16.msra.mxu1 %v10721_v1  ;;  %v10769_v1 = vld [vmem:[#allocation10 + $0x108] ss:$16 sps:$4 sm:$0xff]   ;;  %v11008_v11 = vld [vmem:[#allocation11 + $0x2ac] ss:$24 sps:$4 sm:$0xff]  }
 0x3e8   : > { %9774 = vmatpush3.bf16.msra.mxu0 %v9773_v45  ;;  %3237 = vmatprep.subr.bf16.mxu1 %v10726_v2  ;;  %v10735_v45 = vld [vmem:[#allocation8 + $0x58c] ss:$16 sps:$4 sm:$0xff]   ;;  %v11000_v43 = vld [vmem:[#allocation11 + $0x278] ss:$24 sps:$4 sm:$0xff]  }
 0x3e9   : > { %v10774_v2 = vld [vmem:[#allocation10 + $0x12c] ss:$16 sps:$4 sm:$0xff]  }
 0x3eb   : > { %3238 = vmatpush1.bf16.msra.mxu1 %v10724_v3  ;;  %v10772_v3 = vld [vmem:[#allocation10 + $0x128] ss:$16 sps:$4 sm:$0xff]  }
 0x3ec   : > { %3239 = vmatprep.subr.bf16.mxu1 %v10729_v30  ;;  %v10775_v30 = vld [vmem:[#allocation10 + $0x148] ss:$16 sps:$4 sm:$0xff]  }
 0x3ef   : > { %3240 = vmatpush1.bf16.msra.mxu1 %v10727_v4  ;;  %v10777_v4 = vld [vmem:[#allocation10 + $0x14c] ss:$16 sps:$4 sm:$0xff]  }
 0x3f0   : > { %3241 = vmatprep.subr.bf16.mxu1 %v10732_v62  ;;  %v10780_v62 = vld [vmem:[#allocation10 + $0x16c] ss:$16 sps:$4 sm:$0xff]  }
 0x3f3   : > { %3242 = vmatpush1.bf16.msra.mxu1 %v10730_v7  ;;  %v10778_v7 = vld [vmem:[#allocation10 + $0x168] ss:$16 sps:$4 sm:$0xff]  }
 0x3f4   : > { %3243 = vmatprep.subr.bf16.mxu1 %v10735_v45  ;;  %v10783_v45 = vld [vmem:[#allocation10 + $0x18c] ss:$16 sps:$4 sm:$0xff]  }
 0x3f7   : > { %3244 = vmatpush1.bf16.msra.mxu1 %v10733_v15  ;;  %v10781_v15 = vld [vmem:[#allocation10 + $0x188] ss:$16 sps:$4 sm:$0xff]  }
 0x3f8   : > { %3245 = vmatprep.subr.bf16.mxu1 %v10738_v20  ;;  %v10786_v20 = vld [vmem:[#allocation10 + $0x1ac] ss:$16 sps:$4 sm:$0xff]  }
 0x3fb   : > { %3246 = vmatpush1.bf16.msra.mxu1 %v10736_v19  ;;  %v10784_v19 = vld [vmem:[#allocation10 + $0x1a8] ss:$16 sps:$4 sm:$0xff]  }
 0x3fc   : > { %3247 = vmatprep.subr.bf16.mxu1 %v10741_v22  ;;  %v10789_v22 = vld [vmem:[#allocation10 + $0x1cc] ss:$16 sps:$4 sm:$0xff]  }
 0x3ff   : > { %3248 = vmatpush1.bf16.msra.mxu1 %v10739_v21  ;;  %v10787_v21 = vld [vmem:[#allocation10 + $0x1c8] ss:$16 sps:$4 sm:$0xff]  }
 0x400   : > { %3249 = vmatprep.subr.bf16.mxu1 %v10744_v23  ;;  %v10792_v23 = vld [vmem:[#allocation10 + $0x1ec] ss:$16 sps:$4 sm:$0xff]  }
 0x402   : > { %v11956_v39 = vpop.f32.mrb[12].mxu0 }
 0x403   : > { %v9662_v41 = vpop.f32.mrb[13].mxu0  ;;  %v4754_v42 = vsel %vm4753_vm3, %v11956_v39, -inf  ;;  %3250 = vmatpush1.bf16.msra.mxu1 %v10742_v24  ;;  %v10790_v24 = vld [vmem:[#allocation10 + $0x1e8] ss:$16 sps:$4 sm:$0xff]  }
 0x404   : > { %4755 = vmax.xlane.f32.xlu0 %v4754_v42  ;;  %4543 = vmatprep.subr.bf16.mxu1 %v10747_v25  ;;  %v10759_v41 = vld [vmem:[#allocation10 + $0x8c] ss:$16 sps:$4 sm:$0xff]   ;;  %v10757_v42 = vld [vmem:[#allocation10 + $0x88] ss:$16 sps:$4 sm:$0xff]  }
 0x405   : > { %v10795_v25 = vld [vmem:[#allocation10 + $0x20c] ss:$16 sps:$4 sm:$0xff]  }
 0x406   : > { %3252 = vmatmul.mubr.bf16.vlgmr.msra.gmra.mrb[4].mxu1 %v11891_v12 }
 0x407   : > { %4544 = vmatpush1.bf16.msra.mxu1 %v10745_v26  ;;  %4575 = vmatprep.mubr.bf16.mxu1 %v11865_v0  ;;  %v10793_v26 = vld [vmem:[#allocation10 + $0x208] ss:$16 sps:$4 sm:$0xff]  }
 0x408   : > { %4545 = vmatprep.subr.bf16.mxu1 %v10750_v16  ;;  %v10798_v16 = vld [vmem:[#allocation10 + $0x22c] ss:$16 sps:$4 sm:$0xff]  }
 0x40b   : > { %4546 = vmatpush1.bf16.msra.mxu1 %v10748_v27  ;;  %v10796_v27 = vld [vmem:[#allocation10 + $0x228] ss:$16 sps:$4 sm:$0xff]  }
 0x40c   : > { %4547 = vmatprep.subr.bf16.mxu1 %v10753_v34  ;;  %v10801_v34 = vld [vmem:[#allocation10 + $0x24c] ss:$16 sps:$4 sm:$0xff]  }
 0x40f   : > { %4548 = vmatpush1.bf16.msra.mxu1 %v10751_v36  ;;  %v10799_v36 = vld [vmem:[#allocation10 + $0x248] ss:$16 sps:$4 sm:$0xff]  }
 0x410   : > { %4549 = vmatprep.subr.bf16.mxu1 %v10756_v38  ;;  %v10804_v38 = vld [vmem:[#allocation10 + $0x26c] ss:$16 sps:$4 sm:$0xff]  }
 0x413   : > { %4550 = vmatpush1.bf16.msra.mxu1 %v10754_v40  ;;  %v10802_v40 = vld [vmem:[#allocation10 + $0x268] ss:$16 sps:$4 sm:$0xff]  }
 0x414   : > { %4551 = vmatprep.subr.bf16.mxu1 %v10759_v41  ;;  %v10807_v41 = vld [vmem:[#allocation10 + $0x28c] ss:$16 sps:$4 sm:$0xff]  }
 0x417   : > { %4552 = vmatpush1.bf16.msra.mxu1 %v10757_v42  ;;  %v10805_v42 = vld [vmem:[#allocation10 + $0x288] ss:$16 sps:$4 sm:$0xff]  }
 0x418   : > { %4553 = vmatprep.subr.bf16.mxu1 %v10762_v44  ;;  %v10810_v44 = vld [vmem:[#allocation10 + $0x2ac] ss:$16 sps:$4 sm:$0xff]  }
 0x419   : > { %v11962_v52 = vpop.f32.mrb[0].mxu1 }
 0x41a   : > { %v11964_v0 = vpop.f32.mrb[1].mxu1 }
 0x41b   : > { %v1845_v55 = vpop.f32.mrb[2].mxu1  ;;  %4554 = vmatpush1.bf16.msra.mxu1 %v10760_v49  ;;  %v10813_v49 = vld [vmem:[#allocation10 + $0x2cc] ss:$16 sps:$4 sm:$0xff]  }
 0x41c   : > { %v1846_v59 = vpop.f32.mrb[3].mxu1  ;;  %4555 = vmatprep.subr.bf16.mxu1 %v10765_v51 }
 0x41f   : > { %4556 = vmatpush1.bf16.msra.mxu1 %v10763_v56  ;;  %v10816_v56 = vld [vmem:[#allocation10 + $0x2ec] ss:$16 sps:$4 sm:$0xff]  }
 0x420   : > { %4557 = vmatprep.subr.bf16.mxu1 %v10768_v60  ;;  %v10814_v60 = vld [vmem:[#allocation10 + $0x2e8] ss:$16 sps:$4 sm:$0xff]  }
 0x423   : > { %4558 = vmatpush1.bf16.msra.mxu1 %v10766_v61  ;;  %v10819_v61 = vld [vmem:[#allocation10 + $0x30c] ss:$16 sps:$4 sm:$0xff]  }
 0x424   : > { %4559 = vmatprep.subr.bf16.mxu1 %v10771_v63  ;;  %v10817_v63 = vld [vmem:[#allocation10 + $0x308] ss:$16 sps:$4 sm:$0xff]  }
 0x427   : > { %4560 = vmatpush1.bf16.msra.mxu1 %v10769_v1  ;;  %v10822_v1 = vld [vmem:[#allocation10 + $0x32c] ss:$16 sps:$4 sm:$0xff]  }
 0x428   : > { %4561 = vmatprep.subr.bf16.mxu1 %v10774_v2  ;;  %v10820_v2 = vld [vmem:[#allocation10 + $0x328] ss:$16 sps:$4 sm:$0xff]  }
 0x42b   : > { %4562 = vmatpush1.bf16.msra.mxu1 %v10772_v3  ;;  %v10825_v3 = vld [vmem:[#allocation10 + $0x34c] ss:$16 sps:$4 sm:$0xff]  }
 0x42c   : > { %4563 = vmatprep.subr.bf16.mxu1 %v10777_v4 }
 0x42f   : > { %4564 = vmatpush1.bf16.msra.mxu1 %v10775_v30  ;;  %v10823_v30 = vld [vmem:[#allocation10 + $0x348] ss:$16 sps:$4 sm:$0xff]  }
 0x430   : > { %4565 = vmatprep.subr.bf16.mxu1 %v10780_v62  ;;  %v10828_v62 = vld [vmem:[#allocation10 + $0x36c] ss:$16 sps:$4 sm:$0xff]  }
 0x433   : > { %4566 = vmatpush1.bf16.msra.mxu1 %v10778_v7  ;;  %v10826_v7 = vld [vmem:[#allocation10 + $0x368] ss:$16 sps:$4 sm:$0xff]  }
 0x434   : > { %4567 = vmatprep.subr.bf16.mxu1 %v10783_v45  ;;  %v10831_v45 = vld [vmem:[#allocation10 + $0x38c] ss:$16 sps:$4 sm:$0xff]  }
 0x437   : > { %4568 = vmatpush1.bf16.msra.mxu1 %v10781_v15  ;;  %v10829_v15 = vld [vmem:[#allocation10 + $0x388] ss:$16 sps:$4 sm:$0xff]  }
 0x438   : > { %4569 = vmatprep.subr.bf16.mxu1 %v10786_v20  ;;  %v10834_v20 = vld [vmem:[#allocation10 + $0x3ac] ss:$16 sps:$4 sm:$0xff]  }
 0x43b   : > { %4570 = vmatpush1.bf16.msra.mxu1 %v10784_v19  ;;  %v10832_v19 = vld [vmem:[#allocation10 + $0x3a8] ss:$16 sps:$4 sm:$0xff]  }
 0x43c   : > { %4571 = vmatprep.subr.bf16.mxu1 %v10789_v22  ;;  %v10837_v22 = vld [vmem:[#allocation10 + $0x3cc] ss:$16 sps:$4 sm:$0xff]  }
 0x43f   : > { %4572 = vmatpush1.bf16.msra.mxu1 %v10787_v21  ;;  %v10835_v21 = vld [vmem:[#allocation10 + $0x3c8] ss:$16 sps:$4 sm:$0xff]  }
 0x440   : > { %4573 = vmatprep.subr.bf16.mxu1 %v10792_v23  ;;  %v10840_v23 = vld [vmem:[#allocation10 + $0x3ec] ss:$16 sps:$4 sm:$0xff]  }
 0x443   : > { %4574 = vmatpush1.bf16.msra.mxu1 %v10790_v24  ;;  %v10838_v24 = vld [vmem:[#allocation10 + $0x3e8] ss:$16 sps:$4 sm:$0xff]  }
 0x444   : > { %4586 = vmatprep.subr.bf16.mxu1 %v10795_v25  ;;  %v10843_v25 = vld [vmem:[#allocation10 + $0x40c] ss:$16 sps:$4 sm:$0xff]  }
 0x446   : > { %4576 = vmatmul.mubr.bf16.vlgmr.msra.gmra.mrb[8].mxu1 %v11873_v46  ;;  %v10808_v46 = vld [vmem:[#allocation10 + $0x2a8] ss:$16 sps:$4 sm:$0xff]  }
 0x447   : > { %4587 = vmatpush1.bf16.msra.mxu1 %v10793_v26  ;;  %4618 = vmatprep.mubr.bf16.mxu1 %v11875_v48  ;;  %v10811_v48 = vld [vmem:[#allocation10 + $0x2c8] ss:$16 sps:$4 sm:$0xff]  }
 0x448   : > { %4588 = vmatprep.subr.bf16.mxu1 %v10798_v16  ;;  %v10841_v26 = vld [vmem:[#allocation10 + $0x408] ss:$16 sps:$4 sm:$0xff]  }
 0x449   : > { %v10844_v16 = vld [vmem:[#allocation10 + $0x428] ss:$16 sps:$4 sm:$0xff]  }
 0x44b   : > { %4589 = vmatpush1.bf16.msra.mxu1 %v10796_v27  ;;  %v10846_v27 = vld [vmem:[#allocation10 + $0x42c] ss:$16 sps:$4 sm:$0xff]  }
 0x44c   : > { %4590 = vmatprep.subr.bf16.mxu1 %v10801_v34  ;;  %v10849_v34 = vld [vmem:[#allocation10 + $0x44c] ss:$16 sps:$4 sm:$0xff]  }
 0x44f   : > { %4591 = vmatpush1.bf16.msra.mxu1 %v10799_v36  ;;  %v10847_v36 = vld [vmem:[#allocation10 + $0x448] ss:$16 sps:$4 sm:$0xff]  }
 0x450   : > { %4592 = vmatprep.subr.bf16.mxu1 %v10804_v38  ;;  %v10852_v38 = vld [vmem:[#allocation10 + $0x46c] ss:$16 sps:$4 sm:$0xff]  }
 0x453   : > { %4593 = vmatpush1.bf16.msra.mxu1 %v10802_v40  ;;  %v10850_v40 = vld [vmem:[#allocation10 + $0x468] ss:$16 sps:$4 sm:$0xff]  }
 0x454   : > { %4594 = vmatprep.subr.bf16.mxu1 %v10807_v41  ;;  %v10855_v41 = vld [vmem:[#allocation10 + $0x48c] ss:$16 sps:$4 sm:$0xff]  }
 0x457   : > { %4595 = vmatpush1.bf16.msra.mxu1 %v10805_v42  ;;  %v10897_v42 = vld [vmem:[#allocation11 + $0x4] ss:$24 sps:$4 sm:$0xff]  }
 0x458   : > { %4596 = vmatprep.subr.bf16.mxu1 %v10810_v44  ;;  %v10853_v44 = vld [vmem:[#allocation10 + $0x488] ss:$16 sps:$4 sm:$0xff]   ;;  %4987 = vmatprep.subr.bf16.mxu0 %v10897_v42 }
 0x45b   : > { %4597 = vmatpush1.bf16.msra.mxu1 %v10808_v46  ;;  %v10856_v46 = vld [vmem:[#allocation10 + $0x4a8] ss:$16 sps:$4 sm:$0xff]  }
 0x45c   : > { %4598 = vmatprep.subr.bf16.mxu1 %v10813_v49  ;;  %v10859_v49 = vld [vmem:[#allocation10 + $0x4c8] ss:$16 sps:$4 sm:$0xff]  }
 0x45f   : > { %4599 = vmatpush1.bf16.msra.mxu1 %v10811_v48  ;;  %v10862_v48 = vld [vmem:[#allocation10 + $0x4e8] ss:$16 sps:$4 sm:$0xff]  }
 0x460   : > { %4600 = vmatprep.subr.bf16.mxu1 %v10816_v56  ;;  %v10865_v56 = vld [vmem:[#allocation10 + $0x508] ss:$16 sps:$4 sm:$0xff]  }
 0x463   : > { %4601 = vmatpush1.bf16.msra.mxu1 %v10814_v60  ;;  %v10868_v60 = vld [vmem:[#allocation10 + $0x528] ss:$16 sps:$4 sm:$0xff]  }
 0x464   : > { %4602 = vmatprep.subr.bf16.mxu1 %v10819_v61  ;;  %v10873_v61 = vld [vmem:[#allocation10 + $0x54c] ss:$16 sps:$4 sm:$0xff]  }
 0x467   : > { %4603 = vmatpush1.bf16.msra.mxu1 %v10817_v63  ;;  %v10871_v63 = vld [vmem:[#allocation10 + $0x548] ss:$16 sps:$4 sm:$0xff]  }
 0x468   : > { %4604 = vmatprep.subr.bf16.mxu1 %v10822_v1  ;;  %v10876_v1 = vld [vmem:[#allocation10 + $0x56c] ss:$16 sps:$4 sm:$0xff]  }
 0x46b   : > { %4605 = vmatpush1.bf16.msra.mxu1 %v10820_v2  ;;  %v10874_v2 = vld [vmem:[#allocation10 + $0x568] ss:$16 sps:$4 sm:$0xff]  }
 0x46c   : > { %4606 = vmatprep.subr.bf16.mxu1 %v10825_v3  ;;  %v10879_v3 = vld [vmem:[#allocation10 + $0x58c] ss:$16 sps:$4 sm:$0xff]  }
 0x46f   : > { %4607 = vmatpush1.bf16.msra.mxu1 %v10823_v30  ;;  %v10882_v30 = vld [vmem:[#allocation10 + $0x5ac] ss:$16 sps:$4 sm:$0xff]  }
 0x470   : > { %4608 = vmatprep.subr.bf16.mxu1 %v10828_v62  ;;  %v10880_v62 = vld [vmem:[#allocation10 + $0x5a8] ss:$16 sps:$4 sm:$0xff]  }
 0x473   : > { %4609 = vmatpush1.bf16.msra.mxu1 %v10826_v7  ;;  %v10885_v7 = vld [vmem:[#allocation10 + $0x5cc] ss:$16 sps:$4 sm:$0xff]  }
 0x474   : > { %4610 = vmatprep.subr.bf16.mxu1 %v10831_v45  ;;  %v10883_v45 = vld [vmem:[#allocation10 + $0x5c8] ss:$16 sps:$4 sm:$0xff]  }
 0x477   : > { %4611 = vmatpush1.bf16.msra.mxu1 %v10829_v15  ;;  %v10888_v15 = vld [vmem:[#allocation10 + $0x5ec] ss:$16 sps:$4 sm:$0xff]  }
 0x478   : > { %4612 = vmatprep.subr.bf16.mxu1 %v10834_v20  ;;  %v10886_v20 = vld [vmem:[#allocation10 + $0x5e8] ss:$16 sps:$4 sm:$0xff]  }
 0x47b   : > { %4613 = vmatpush1.bf16.msra.mxu1 %v10832_v19  ;;  %v10891_v19 = vld [vmem:[#allocation11 + $0xc] ss:$24 sps:$4 sm:$0xff]  }
 0x47c   : > { %4614 = vmatprep.subr.bf16.mxu1 %v10837_v22  ;;  %v10889_v22 = vld [vmem:[#allocation11 + $0x8] ss:$24 sps:$4 sm:$0xff]  }
 0x47f   : > { %4615 = vmatpush1.bf16.msra.mxu1 %v10835_v21  ;;  %v10894_v21 = vld [vmem:[#allocation11 + $0x3c] ss:$24 sps:$4 sm:$0xff]  }
 0x480   : > { %4616 = vmatprep.subr.bf16.mxu1 %v10840_v23  ;;  %v10892_v23 = vld [vmem:[#allocation11 + $0x38] ss:$24 sps:$4 sm:$0xff]  }
 0x483   : > { %4617 = vmatpush1.bf16.msra.mxu1 %v10838_v24  ;;  %v10900_v24 = vld [vmem:[#allocation11 + $0x6c] ss:$24 sps:$4 sm:$0xff]  }
 0x484   : > { %4629 = vmatprep.subr.bf16.mxu1 %v10843_v25  ;;  %v10898_v25 = vld [vmem:[#allocation11 + $0x68] ss:$24 sps:$4 sm:$0xff]  }
 0x486   : > { %4619 = vmatmul.mubr.bf16.vlgmr.msra.gmra.mrb[8].mxu1 %v11883_v29  ;;  %v10858_v29 = vld [vmem:[#allocation10 + $0x4ac] ss:$16 sps:$4 sm:$0xff]  }
 0x487   : > { %4630 = vmatpush1.bf16.msra.mxu1 %v10841_v26  ;;  %4661 = vmatprep.mubr.bf16.mxu1 %v11885_v32  ;;  %v10861_v32 = vld [vmem:[#allocation10 + $0x4cc] ss:$16 sps:$4 sm:$0xff]  }
 0x488   : > { %4631 = vmatprep.subr.bf16.mxu1 %v10846_v27  ;;  %v10906_v26 = vld [vmem:[#allocation11 + $0x9c] ss:$24 sps:$4 sm:$0xff]  }
 0x48b   : > { %4632 = vmatpush1.bf16.msra.mxu1 %v10844_v16  ;;  %v10904_v16 = vld [vmem:[#allocation11 + $0x98] ss:$24 sps:$4 sm:$0xff]  }
 0x48c   : > { %4633 = vmatprep.subr.bf16.mxu1 %v10849_v34 }
 0x48f   : > { %4634 = vmatpush1.bf16.msra.mxu1 %v10847_v36 }
 0x490   : > { %4635 = vmatprep.subr.bf16.mxu1 %v10852_v38 }
 0x491   : > { %v4756_v51 = vpop.xlane.xlu0 %4755 }
 0x492   : > { %v4757_v55 = vsub.f32 %v11956_v39, %v4756_v51  ;;  %v10864_v51 = vld [vmem:[#allocation10 + $0x4ec] ss:$16 sps:$4 sm:$0xff]  }
 0x493   : > { %4636 = vmatpush1.bf16.msra.mxu1 %v10850_v40 }
 0x494   : > { %v4758_v59 = vmul.f32 1.442695, %v4757_v55  ;;  %4637 = vmatprep.subr.bf16.mxu1 %v10855_v41  ;;  %v10867_v55 = vld [vmem:[#allocation10 + $0x50c] ss:$16 sps:$4 sm:$0xff]  }
 0x496   : > { %11177 = vpow2.f32 %v4758_v59  ;;  %v10870_v59 = vld [vmem:[#allocation10 + $0x52c] ss:$16 sps:$4 sm:$0xff]  }
 0x497   : > { %4638 = vmatpush1.bf16.msra.mxu1 %v10853_v44 }
 0x498   : > { %4639 = vmatprep.subr.bf16.mxu1 %v10858_v29 }
 0x49b   : > { %4640 = vmatpush1.bf16.msra.mxu1 %v10856_v46  ;;  %v10895_v46 = vld [vmem:[#allocation11] ss:$24 sps:$4 sm:$0xff]  }
 0x49c   : > { %4641 = vmatprep.subr.bf16.mxu1 %v10861_v32 }
 0x49f   : > { %4642 = vmatpush1.bf16.msra.mxu1 %v10859_v49  ;;  %v10903_v49 = vld [vmem:[#allocation11 + $0x34] ss:$24 sps:$4 sm:$0xff]  }
 0x4a0   : > { %v11969_v4 = vpop.eup %11177  ;;  %4643 = vmatprep.subr.bf16.mxu1 %v10864_v51  ;;  %v10901_v51 = vld [vmem:[#allocation11 + $0x30] ss:$24 sps:$4 sm:$0xff]  }
 0x4a1   : > { %v4760_v39 = vsel %vm4753_vm3, %v11969_v4, 0.0 }
 0x4a2   : > { %4761 = vadd.xlane.f32.xlu0 %v4760_v39  ;;  %v10877_v39 = vld [vmem:[#allocation10 + $0x588] ss:$16 sps:$4 sm:$0xff]  }
 0x4a3   : > { %4644 = vmatpush1.bf16.msra.mxu1 %v10862_v48  ;;  %v10909_v48 = vld [vmem:[#allocation11 + $0x64] ss:$24 sps:$4 sm:$0xff]  }
 0x4a4   : > { %4645 = vmatprep.subr.bf16.mxu1 %v10867_v55  ;;  %v10907_v55 = vld [vmem:[#allocation11 + $0x60] ss:$24 sps:$4 sm:$0xff]  }
 0x4a7   : > { %4646 = vmatpush1.bf16.msra.mxu1 %v10865_v56  ;;  %v10912_v56 = vld [vmem:[#allocation11 + $0x94] ss:$24 sps:$4 sm:$0xff]  }
 0x4a8   : > { %4647 = vmatprep.subr.bf16.mxu1 %v10870_v59  ;;  %v10910_v59 = vld [vmem:[#allocation11 + $0x90] ss:$24 sps:$4 sm:$0xff]  }
 0x4ab   : > { %4648 = vmatpush1.bf16.msra.mxu1 %v10868_v60  ;;  %v10915_v60 = vld [vmem:[#allocation11 + $0x14] ss:$24 sps:$4 sm:$0xff]  }
 0x4ac   : > { %4649 = vmatprep.subr.bf16.mxu1 %v10873_v61  ;;  %v11482_v61 = vmov 0  }
 0x4af   : > { %4650 = vmatpush1.bf16.msra.mxu1 %v10871_v63 }
 0x4b0   : > { %4651 = vmatprep.subr.bf16.mxu1 %v10876_v1 }
 0x4b3   : > { %4652 = vmatpush1.bf16.msra.mxu1 %v10874_v2 }
 0x4b4   : > { %4653 = vmatprep.subr.bf16.mxu1 %v10879_v3 }
 0x4b7   : > { %4654 = vmatpush1.bf16.msra.mxu1 %v10877_v39 }
 0x4b8   : > { %4655 = vmatprep.subr.bf16.mxu1 %v10882_v30 }
 0x4bb   : > { %4656 = vmatpush1.bf16.msra.mxu1 %v10880_v62 }
 0x4bc   : > { %4657 = vmatprep.subr.bf16.mxu1 %v10885_v7  ;;  %v9987_v7 = vpop.permute.xlu1 %9986 }
 0x4bf   : > { %4658 = vmatpush1.bf16.msra.mxu1 %v10883_v45  ;;  %v9989_v45 = vunpack.i.h.bf16 %v9987_v7 }
 0x4c0   : > { %4659 = vmatprep.subr.bf16.mxu1 %v10888_v15  ;;  %v9988_v15 = vunpack.i.l.bf16 %v9987_v7 }
 0x4c3   : > { %4660 = vmatpush1.bf16.msra.mxu1 %v10886_v20 }
 0x4c4   : > { %5028 = vmatprep.subr.bf16.mxu1 %v10891_v19  ;;  %v10913_v19 = vld [vmem:[#allocation11 + $0x10] ss:$24 sps:$4 sm:$0xff]  }
 0x4c6   : > { %4662 = vmatmul.mubr.bf16.vlgmr.msra.gmra.mrb[8].mxu1 %v11891_v12 }
 0x4c7   : > { %5029 = vmatpush1.bf16.msra.mxu1 %v10889_v22  ;;  %5060 = vmatprep.mubr.bf16.mxu1 %v11482_v61 }
 0x4c8   : > { %5030 = vmatprep.subr.bf16.mxu1 %v10894_v21 }
 0x4cb   : > { %5031 = vmatpush1.bf16.msra.mxu1 %v10892_v23  ;;  %v10918_v23 = vld [vmem:[#allocation11 + $0x44] ss:$24 sps:$4 sm:$0xff]  }
 0x4cc   : > { %5032 = vmatprep.subr.bf16.mxu1 %v10900_v24  ;;  %v9776_v24 = vpack.c.bf16 %v9989_v45, %v9988_v15 }
 0x4cf   : > { %5033 = vmatpush1.bf16.msra.mxu1 %v10898_v25  ;;  %v10916_v25 = vld [vmem:[#allocation11 + $0x40] ss:$24 sps:$4 sm:$0xff]  }
 0x4d0   : > { %5034 = vmatprep.subr.bf16.mxu1 %v10906_v26  ;;  %v10921_v26 = vld [vmem:[#allocation11 + $0x74] ss:$24 sps:$4 sm:$0xff]  }
 0x4d3   : > { %5035 = vmatpush1.bf16.msra.mxu1 %v10904_v16  ;;  %v10919_v16 = vld [vmem:[#allocation11 + $0x70] ss:$24 sps:$4 sm:$0xff]  }
 0x4d4   : > { %9775 = vmatprep.subr.bf16.mxu1 %v11478_v28 }
 0x4d9   : > { %v11977_v27 = vpop.f32.mrb[4].mxu1 }
 0x4da   : > { %v11979_v34 = vpop.f32.mrb[5].mxu1 }
 0x4db   : > { %v11981_v36 = vpop.f32.mrb[6].mxu1 }
 0x4dc   : > { %v10005_v12 = vpack.i.bf16 %v11981_v36, %v11977_v27  ;;  %v9797_v38 = vpack.c.bf16 %v11981_v36, %v11977_v27  ;;  %v11987_v40 = vpop.f32.mrb[7].mxu1  ;;  %v11044_v27 = vld [vmem:[#allocation11 + $0x36c] ss:$24 sps:$4 sm:$0xff]   ;;  %v11042_v36 = vld [vmem:[#allocation11 + $0x368] ss:$24 sps:$4 sm:$0xff]  }
 0x4dd   : > { %v10015_v41 = vpack.i.bf16 %v11987_v40, %v11979_v34  ;;  %v9811_v42 = vpack.c.bf16 %v11987_v40, %v11979_v34 }
 0x52f   : > { %v4762_v44 = vpop.xlane.xlu0 %4761 }
 0x530   : > { %11179 = vrcp.f32 %v4762_v44  ;;  %v10924_v44 = vld [vmem:[#allocation11 + $0xa4] ss:$24 sps:$4 sm:$0xff]  }
 0x53a   : > { %v11180_v29 = vpop.eup %11179 }
 0x53b   : > { %v4764_v32 = vmul.f32 %v11180_v29, %v11969_v4  ;;  %v5159_v29 = vpop.permute.xlu1 %5158 }
 0x53d   : > { %9668 = vmatmul.mubr.msk.f32.vlgmr.msra.gmra.mrb[14].mxu0 %vm4765_vm4, %v4764_v32  ;;  %v11483_v32 = vmov 1966171168  }
 0x53e   : > { %4988 = vmatpush1.bf16.msra.mxu0 %v10895_v46  ;;  %5019 = vmatprep.mubr.bf16.mxu0 %v11482_v61  ;;  %v10922_v46 = vld [vmem:[#allocation11 + $0xa0] ss:$24 sps:$4 sm:$0xff]  }
 0x53f   : > { %4989 = vmatprep.subr.bf16.mxu0 %v10903_v49  ;;  %v5120_v49 = vunpack.c.l.s4 %v11483_v32 }
 0x542   : > { %4990 = vmatpush1.bf16.msra.mxu0 %v10901_v51  ;;  %v5121_v51 = vunpack.c.0.s8 %v5120_v49 }
 0x543   : > { %4991 = vmatprep.subr.bf16.mxu0 %v10909_v48 }
 0x544   : > { %v12027_v48 = vsub.s32 %v5121_v51, %v11820_v10 }
 0x546   : > { %4992 = vmatpush1.bf16.msra.mxu0 %v10907_v55 }
 0x547   : > { %4993 = vmatprep.subr.bf16.mxu0 %v10912_v56 }
 0x54a   : > { %4994 = vmatpush1.bf16.msra.mxu0 %v10910_v59 }
 0x54b   : > { %5069 = vmatprep.subr.bf16.mxu0 %v10915_v60 }
 0x599   : > { %v11997_v4 = vpop.f32.mrb[8].mxu1 }
 0x59a   : > { %v11999_v63 = vpop.f32.mrb[9].mxu1 }
 0x59b   : > { %v12001_v1 = vpop.f32.mrb[10].mxu1 }
 0x59c   : > { %v10010_v2 = vpack.i.bf16 %v12001_v1, %v11997_v4  ;;  %v9801_v3 = vpack.c.bf16 %v12001_v1, %v11997_v4  ;;  %v12007_v39 = vpop.f32.mrb[11].mxu1 }
 0x59d   : > { %v10020_v30 = vpack.i.bf16 %v12007_v39, %v11999_v63  ;;  %v9815_v62 = vpack.c.bf16 %v12007_v39, %v11999_v63 }
 0x610   : > { %v4835_v20 = vpop.f32.mrb[14].mxu0 }
 0x611   : > { %v4839_v22 = vpack.c.bf16 %v4835_v20, %v4835_v20  ;;  %v9669_v21 = vpop.f32.mrb[15].mxu0 }
 0x613   : > { %9385 = vmatmul.mubr.msk.bf16.vlgmr.msra.gmra.mrb[16].mxu0 %vm4673_vm1, %v4839_v22  ;;  %9386 = vmatmul.mubr.msk.bf16.vlgmr.msra.gmra.mrb[12].mxu1 %vm4673_vm1, %v4839_v22 }
 0x614   : > { %5070 = vmatpush1.bf16.msra.mxu0 %v10913_v19  ;;  %9778 = vmatpush3.bf16.xpose.msk.msra.mxu1 %vm11913_vm2, %v9776_v24 }
 0x615   : > { %5071 = vmatprep.subr.bf16.mxu0 %v10918_v23  ;;  %9674 = vmatprep.mubr.msk.f32.mxu1 %vm11479_vm0, %v11480_v33 }
 0x616   : > { %5101 = vmatprep.mubr.bf16.mxu0 %v11482_v61  ;;  %9779 = vmatprep.subr.bf16.mxu1 %v11478_v28 }
 0x618   : > { %5072 = vmatpush1.bf16.msra.mxu0 %v10916_v25 }
 0x619   : > { %5073 = vmatprep.subr.bf16.mxu0 %v10921_v26 }
 0x61b   : > { %9675 = vmatmul.mubr.msk.f32.vlgmr.msra.gmra.mrb[16].mxu1 %vm4673_vm1, %v5159_v29 }
 0x61c   : > { %5074 = vmatpush1.bf16.msra.mxu0 %v10919_v16  ;;  %9681 = vmatprep.mubr.msk.f32.mxu1 %vm11479_vm0, %v11480_v33 }
 0x61d   : > { %5075 = vmatprep.subr.bf16.mxu0 %v10924_v44 }
 0x620   : > { %5076 = vmatpush1.bf16.msra.mxu0 %v10922_v46 }
 0x623   : > { %9387 = vmatmul.mubr.msk.bf16.vlgmr.msra.gmra.mrb[20].mxu0 %vm4673_vm1, %v4839_v22 }
 0x624   : > { %5553 = vmatprep.mubr.bf16.mxu0 %v11482_v61 }
 0x6e6   : > { %v5021_v55 = vpop.f32.mrb[16].mxu0  ;;  %v5062_v56 = vpop.f32.mrb[12].mxu1 }
 0x6e7   : > { %v5023_v59 = vpop.f32.mrb[17].mxu0  ;;  %v5064_v60 = vpop.f32.mrb[13].mxu1 }
 0x6e8   : > { %v5116_v7 = vcombine.low %v5021_v55, %v5023_v59  ;;  %v5117_v45 = vcombine.low %v5062_v56, %v5064_v60  ;;  %v5025_v15 = vpop.f32.mrb[18].mxu0  ;;  %v5066_v20 = vpop.f32.mrb[14].mxu1 }
 0x6e9   : > { %v5026_v19 = vpop.f32.mrb[19].mxu0  ;;  %v5067_v21 = vpop.f32.mrb[15].mxu1 }
 0x6ea   : > { %v5125_v22 = vrot.slane %v5116_v7, %v12027_v48  ;;  %v5132_v23 = vrot.slane %v5117_v45, %v12027_v48 }
 0x6ec   : > { %v5140_v24 = vcombine.low %v5125_v22, %v5132_v23 }
 0x6ee   : > { %v5147_v25 = vrot.slane %v5140_v24, %v12027_v48  ;;  %v5236_v26 = vpop.f32.mrb[16].mxu1  ;;  %v10925_v24 = vld [vmem:[#allocation11 + $0xc8] ss:$24 sps:$4 sm:$0xff]  }
 0x6ef   : > { %v9676_v16 = vpop.f32.mrb[17].mxu1  ;;  %v5240_v44 = vsel %vm4753_vm3, %v5236_v26, -inf }
 0x6f0   : > { %5241 = vmax.xlane.f32.xlu0 %v5240_v44  ;;  %v10930_v16 = vld [vmem:[#allocation11 + $0xfc] ss:$24 sps:$4 sm:$0xff]  }
 0x6f1   : > { %v10933_v44 = vld [vmem:[#allocation11 + $0xc4] ss:$24 sps:$4 sm:$0xff]  }
 0x6f6   : > { %v5103_v29 = vpop.f32.mrb[20].mxu0 }
 0x6f7   : > { %v5105_v46 = vpop.f32.mrb[21].mxu0 }
 0x6f8   : > { %v5118_v32 = vcombine.low %v5103_v29, %v5105_v46  ;;  %v5107_v49 = vpop.f32.mrb[22].mxu0  ;;  %v10940_v29 = vld [vmem:[#allocation11 + $0x158] ss:$24 sps:$4 sm:$0xff]  }
 0x6f9   : > { %v5108_v51 = vpop.f32.mrb[23].mxu0  ;;  %v10931_v49 = vld [vmem:[#allocation11 + $0xc0] ss:$24 sps:$4 sm:$0xff]  }
 0x6fa   : > { %v5139_v55 = vrot.slane %v5118_v32, %v12027_v48 }
 0x6fc   : > { %v5154_v56 = vrot.slane %v5139_v55, %v12027_v48  ;;  %v10939_v55 = vld [vmem:[#allocation11 + $0xf4] ss:$24 sps:$4 sm:$0xff]  }
 0x6fe   : > { %v12035_v59 = vcombine.low %v5147_v25, %v5154_v56  ;;  %v10927_v25 = vld [vmem:[#allocation11 + $0xcc] ss:$24 sps:$4 sm:$0xff]   ;;  %v10937_v56 = vld [vmem:[#allocation11 + $0xf0] ss:$24 sps:$4 sm:$0xff]  }
 0x6ff   : > { %5521 = vmatprep.subr.bf16.mxu0 %v10927_v25  ;;  %v10952_v25 = vld [vmem:[#allocation11 + $0x100] ss:$24 sps:$4 sm:$0xff]  }
 0x700   : > { %5522 = vmatpush1.bf16.msra.mxu0 %v10925_v24  ;;  %v10954_v24 = vld [vmem:[#allocation11 + $0x104] ss:$24 sps:$4 sm:$0xff]  }
 0x701   : > { %5523 = vmatprep.subr.bf16.mxu0 %v10930_v16  ;;  %v10957_v16 = vld [vmem:[#allocation11 + $0x134] ss:$24 sps:$4 sm:$0xff]  }
 0x704   : > { %5524 = vmatpush1.bf16.msra.mxu0 %v10928_v5  ;;  %v1849_v5 = vmul.f32 0.125, %v11897_v31 }
 0x705   : > { %5525 = vmatprep.subr.bf16.mxu0 %v10936_v6  ;;  %v10960_v6 = vld [vmem:[#allocation11 + $0x164] ss:$24 sps:$4 sm:$0xff]  }
 0x706   : > { %9991 = vrot.lane.b32.xlu0 %v9990_v8, %s11481_s11  ;;  %v10934_v8 = vld [vmem:[#allocation11 + $0x128] ss:$24 sps:$4 sm:$0xff]  }
 0x708   : > { %5526 = vmatpush1.bf16.msra.mxu0 %v10934_v8 }
 0x77d   : > { %v5242_v60 = vpop.xlane.xlu0 %5241 }
 0x77e   : > { %v5243_v7 = vsub.f32 %v5236_v26, %v5242_v60  ;;  %v10942_v26 = vld [vmem:[#allocation11 + $0x15c] ss:$24 sps:$4 sm:$0xff]  }
 0x77f   : > { %5527 = vmatprep.subr.bf16.mxu0 %v10942_v26  ;;  %v10945_v60 = vld [vmem:[#allocation11 + $0x124] ss:$24 sps:$4 sm:$0xff]  }
 0x780   : > { %v5244_v45 = vmul.f32 1.442695, %v5243_v7  ;;  %5528 = vmatpush1.bf16.msra.mxu0 %v10940_v29  ;;  %v10943_v7 = vld [vmem:[#allocation11 + $0x120] ss:$24 sps:$4 sm:$0xff]  }
 0x781   : > { %v9992_v15 = vpop.permute.xlu0 %9991  ;;  %9782 = vmatprep.subr.bf16.mxu0 %v11478_v28 }
 0x782   : > { %11181 = vpow2.f32 %v5244_v45  ;;  %v9994_v20 = vunpack.i.h.bf16 %v9992_v15  ;;  %v9993_v19 = vunpack.i.l.bf16 %v9992_v15  ;;  %v10948_v45 = vld [vmem:[#allocation11 + $0x154] ss:$24 sps:$4 sm:$0xff]   ;;  %v10946_v15 = vld [vmem:[#allocation11 + $0x150] ss:$24 sps:$4 sm:$0xff]  }
 0x784   : > { %v9780_v21 = vpack.c.bf16 %v9994_v20, %v9993_v19  ;;  %v10951_v20 = vld [vmem:[#allocation11 + $0xd4] ss:$24 sps:$4 sm:$0xff]  }
 0x786   : > { %9781 = vmatpush3.bf16.msra.mxu1 %v9780_v21  ;;  %v10949_v21 = vld [vmem:[#allocation11 + $0xd0] ss:$24 sps:$4 sm:$0xff]  }
 0x787   : > { %5480 = vmatprep.subr.bf16.mxu1 %v10933_v44  ;;  %v10955_v44 = vld [vmem:[#allocation11 + $0x130] ss:$24 sps:$4 sm:$0xff]  }
 0x78c   : > { %v11182_v22 = vpop.eup %11181 }
 0x78d   : > { %v5246_v23 = vsel %vm4753_vm3, %v11182_v22, 0.0 }
 0x78e   : > { %5247 = vadd.xlane.f32.xlu1 %v5246_v23 }
 0x81b   : > { %v5248_v46 = vpop.xlane.xlu1 %5247 }
 0x81c   : > { %11183 = vrcp.f32 %v5248_v46 }
 0x826   : > { %v11184_v32 = vpop.eup %11183 }
 0x827   : > { %v5250_v51 = vmul.f32 %v11184_v32, %v11182_v22 }
 0x829   : > { %9682 = vmatmul.mubr.msk.f32.vlgmr.msra.gmra.mrb[18].mxu1 %vm4765_vm4, %v5250_v51 }
 0x82a   : > { %5481 = vmatpush1.bf16.msra.mxu1 %v10931_v49  ;;  %5512 = vmatprep.mubr.bf16.mxu1 %v11482_v61 }
 0x82b   : > { %5482 = vmatprep.subr.bf16.mxu1 %v10939_v55 }
 0x82e   : > { %5483 = vmatpush1.bf16.msra.mxu1 %v10937_v56 }
 0x82f   : > { %5484 = vmatprep.subr.bf16.mxu1 %v10945_v60 }
 0x832   : > { %5485 = vmatpush1.bf16.msra.mxu1 %v10943_v7 }
 0x833   : > { %5486 = vmatprep.subr.bf16.mxu1 %v10948_v45 }
 0x836   : > { %5487 = vmatpush1.bf16.msra.mxu1 %v10946_v15 }
 0x837   : > { %5562 = vmatprep.subr.bf16.mxu1 %v10951_v20 }
 0x8fc   : > { %v5328_v19 = vpop.f32.mrb[18].mxu1 }
 0x8fd   : > { %v5332_v22 = vpack.c.bf16 %v5328_v19, %v5328_v19  ;;  %v9683_v23 = vpop.f32.mrb[19].mxu1 }
 0x8ff   : > { %9416 = vmatmul.mubr.msk.bf16.vlgmr.msra.gmra.mrb[20].mxu1 %vm4673_vm1, %v5332_v22  ;;  %9417 = vmatmul.mubr.msk.bf16.vlgmr.msra.gmra.mrb[24].mxu0 %vm4673_vm1, %v5332_v22 }
 0x900   : > { %5563 = vmatpush1.bf16.msra.mxu1 %v10949_v21  ;;  %9785 = vmatpush3.bf16.xpose.msk.msra.mxu0 %vm11913_vm2, %v9783_v58  ;;  %v10958_v58 = vld [vmem:[#allocation11 + $0x160] ss:$24 sps:$4 sm:$0xff]  }
 0x901   : > { %5564 = vmatprep.subr.bf16.mxu1 %v10954_v24  ;;  %9688 = vmatprep.mubr.msk.f32.mxu0 %vm11479_vm0, %v11480_v33 }
 0x902   : > { %9786 = vmatprep.subr.bf16.mxu0 %v11478_v28  ;;  %5594 = vmatprep.mubr.bf16.mxu1 %v11482_v61 }
 0x904   : > { %5565 = vmatpush1.bf16.msra.mxu1 %v10952_v25 }
 0x905   : > { %5566 = vmatprep.subr.bf16.mxu1 %v10957_v16 }
 0x907   : > { %9689 = vmatmul.mubr.msk.f32.vlgmr.msra.gmra.mrb[28].mxu0 %vm4673_vm1, %v1849_v5 }
 0x908   : > { %5567 = vmatpush1.bf16.msra.mxu1 %v10955_v44  ;;  %9788 = vmatpush3.bf16.msra.mxu0 %v9787_v18  ;;  %v4672_v44 = vld [vmem:[%s12331_s6] sm:$0x3f] }
 0x909   : > { %5568 = vmatprep.subr.bf16.mxu1 %v10960_v6  ;;  %9695 = vmatprep.mubr.msk.f32.mxu0 %vm11479_vm0, %v11480_v33 }
 0x90c   : > { %5569 = vmatpush1.bf16.msra.mxu1 %v10958_v58  ;;  %v5157_v58 = vadd.f32 %v12035_v59, %v4672_v44  ;;  %v10963_v59 = vld [vmem:[#allocation11 + $0x18c] ss:$24 sps:$4 sm:$0xff]  }
 0x90d   : > { %6003 = vmatprep.subr.bf16.mxu1 %v10963_v59  ;;  %v10991_v59 = vld [vmem:[#allocation11 + $0x1f0] ss:$24 sps:$4 sm:$0xff]  }
 0x90f   : > { %9418 = vmatmul.mubr.msk.bf16.vlgmr.msra.gmra.mrb[24].mxu1 %vm4673_vm1, %v5332_v22 }
 0x910   : > { %6035 = vmatprep.mubr.bf16.mxu1 %v11482_v61 }
 0x9d2   : > { %v5514_v31 = vpop.f32.mrb[20].mxu1  ;;  %v5555_v8 = vpop.f32.mrb[24].mxu0 }
 0x9d3   : > { %v5516_v26 = vpop.f32.mrb[21].mxu1  ;;  %v5557_v29 = vpop.f32.mrb[25].mxu0 }
 0x9d4   : > { %v5609_v46 = vcombine.low %v5514_v31, %v5516_v26  ;;  %v5610_v32 = vcombine.low %v5555_v8, %v5557_v29  ;;  %v5518_v49 = vpop.f32.mrb[22].mxu1  ;;  %v5559_v51 = vpop.f32.mrb[26].mxu0 }
 0x9d5   : > { %v5519_v55 = vpop.f32.mrb[23].mxu1  ;;  %v5560_v18 = vpop.f32.mrb[27].mxu0  ;;  %v10961_v51 = vld [vmem:[#allocation11 + $0x188] ss:$24 sps:$4 sm:$0xff]  }
 0x9d6   : > { %v5618_v56 = vrot.slane %v5609_v46, %v12027_v48  ;;  %v5625_v60 = vrot.slane %v5610_v32, %v12027_v48  ;;  %v10966_v55 = vld [vmem:[#allocation11 + $0x1bc] ss:$24 sps:$4 sm:$0xff]   ;;  %6004 = vmatpush1.bf16.msra.mxu1 %v10961_v51 }
 0x9d7   : > { %v10969_v18 = vld [vmem:[#allocation11 + $0x184] ss:$24 sps:$4 sm:$0xff]   ;;  %6005 = vmatprep.subr.bf16.mxu1 %v10966_v55  ;;  %v10993_v51 = vld [vmem:[#allocation11 + $0x1f4] ss:$24 sps:$4 sm:$0xff]  }
 0x9d8   : > { %v5633_v7 = vcombine.low %v5618_v56, %v5625_v60  ;;  %5962 = vmatprep.subr.bf16.mxu0 %v10969_v18  ;;  %v10972_v56 = vld [vmem:[#allocation11 + $0x1ec] ss:$24 sps:$4 sm:$0xff]   ;;  %v10970_v60 = vld [vmem:[#allocation11 + $0x1e8] ss:$24 sps:$4 sm:$0xff]  }
 0x9d9   : > { %v10996_v55 = vld [vmem:[#allocation11 + $0x224] ss:$24 sps:$4 sm:$0xff]  }
 0x9da   : > { %v5640_v45 = vrot.slane %v5633_v7, %v12027_v48  ;;  %v5726_v15 = vpop.f32.mrb[28].mxu0  ;;  %v10978_v7 = vld [vmem:[#allocation11 + $0x21c] ss:$24 sps:$4 sm:$0xff]  }
 0x9db   : > { %v9690_v20 = vpop.f32.mrb[29].mxu0  ;;  %v5730_v19 = vsel %vm4753_vm3, %v5726_v15, -inf }
 0x9dc   : > { %5731 = vmax.xlane.f32.xlu0 %v5730_v19  ;;  %v10975_v20 = vld [vmem:[#allocation11 + $0x1b4] ss:$24 sps:$4 sm:$0xff]   ;;  %v10973_v19 = vld [vmem:[#allocation11 + $0x1b0] ss:$24 sps:$4 sm:$0xff]  }
 0x9e2   : > { %v5596_v21 = vpop.f32.mrb[24].mxu1 }
 0x9e3   : > { %v5598_v22 = vpop.f32.mrb[25].mxu1 }
 0x9e4   : > { %v5611_v23 = vcombine.low %v5596_v21, %v5598_v22  ;;  %v5600_v24 = vpop.f32.mrb[26].mxu1  ;;  %v10981_v21 = vld [vmem:[#allocation11 + $0x1e4] ss:$24 sps:$4 sm:$0xff]   ;;  %v10979_v22 = vld [vmem:[#allocation11 + $0x1e0] ss:$24 sps:$4 sm:$0xff]  }
 0x9e5   : > { %v5601_v25 = vpop.f32.mrb[27].mxu1  ;;  %v10982_v24 = vld [vmem:[#allocation11 + $0x210] ss:$24 sps:$4 sm:$0xff]  }
 0x9e6   : > { %v5632_v16 = vrot.slane %v5611_v23, %v12027_v48  ;;  %v10984_v23 = vld [vmem:[#allocation11 + $0x214] ss:$24 sps:$4 sm:$0xff]  }
 0x9e7   : > { %v10987_v25 = vld [vmem:[#allocation11 + $0x194] ss:$24 sps:$4 sm:$0xff]  }
 0x9e8   : > { %v5647_v6 = vrot.slane %v5632_v16, %v12027_v48 }
 0x9ea   : > { %v5648_v31 = vcombine.low %v5640_v45, %v5647_v6  ;;  %v10976_v45 = vld [vmem:[#allocation11 + $0x218] ss:$24 sps:$4 sm:$0xff]  }
 0x9ec   : > { %v12075_v8 = vadd.f32 %v5648_v31, %v5157_v58  ;;  %v10985_v31 = vld [vmem:[#allocation11 + $0x190] ss:$24 sps:$4 sm:$0xff]  }
 0x9f2   : > { %6133 = vrot.lane.b32.xlu0 %v1849_v5, %s11481_s11  ;;  %v10964_v5 = vld [vmem:[#allocation11 + $0x1b8] ss:$24 sps:$4 sm:$0xff]  }
 0x9f3   : > { %6006 = vmatpush1.bf16.msra.mxu1 %v10964_v5  ;;  %v10994_v5 = vld [vmem:[#allocation11 + $0x220] ss:$24 sps:$4 sm:$0xff]  }
 0x9f4   : > { %6007 = vmatprep.subr.bf16.mxu1 %v10972_v56 }
 0x9f7   : > { %6008 = vmatpush1.bf16.msra.mxu1 %v10970_v60 }
 0x9f8   : > { %6009 = vmatprep.subr.bf16.mxu1 %v10978_v7 }
 0x9fb   : > { %6010 = vmatpush1.bf16.msra.mxu1 %v10976_v45 }
 0x9fc   : > { %9789 = vmatprep.subr.bf16.mxu1 %v11478_v28 }
 0xa69   : > { %v5732_v26 = vpop.xlane.xlu0 %5731 }
 0xa6a   : > { %v5733_v29 = vsub.f32 %v5726_v15, %v5732_v26 }
 0xa6c   : > { %v5734_v46 = vmul.f32 1.442695, %v5733_v29 }
 0xa6d   : > { %v6134_v18 = vpop.permute.xlu0 %6133 }
 0xa6e   : > { %11185 = vpow2.f32 %v5734_v46  ;;  %v10990_v46 = vld [vmem:[#allocation11 + $0x1c4] ss:$24 sps:$4 sm:$0xff]  }
 0xa78   : > { %v11186_v32 = vpop.eup %11185 }
 0xa79   : > { %v5736_v49 = vsel %vm4753_vm3, %v11186_v32, 0.0 }
 0xa7a   : > { %5737 = vadd.xlane.f32.xlu1 %v5736_v49  ;;  %v10988_v49 = vld [vmem:[#allocation11 + $0x1c0] ss:$24 sps:$4 sm:$0xff]  }
 0xa8b   : > { %9996 = vrot.lane.b32.xlu1 %v9995_v57, %s11481_s11  ;;  %v10967_v57 = vld [vmem:[#allocation11 + $0x180] ss:$24 sps:$4 sm:$0xff]  }
 0xb07   : > { %v5738_v47 = vpop.xlane.xlu1 %5737 }
 0xb08   : > { %11187 = vrcp.f32 %v5738_v47 }
 0xb0b   : > { %v9997_v16 = vpop.permute.xlu1 %9996 }
 0xb0c   : > { %v9999_v44 = vunpack.i.h.bf16 %v9997_v16  ;;  %v9998_v6 = vunpack.i.l.bf16 %v9997_v16 }
 0xb12   : > { %v11188_v54 = vpop.eup %11187 }
 0xb13   : > { %v5740_v15 = vmul.f32 %v11188_v54, %v11186_v32  ;;  %v9790_v32 = vpack.c.bf16 %v9999_v44, %v9998_v6 }
 0xb15   : > { %9696 = vmatmul.mubr.msk.f32.vlgmr.msra.gmra.mrb[30].mxu0 %vm4765_vm4, %v5740_v15 }
 0xb16   : > { %5963 = vmatpush1.bf16.msra.mxu0 %v10967_v57  ;;  %5994 = vmatprep.mubr.bf16.mxu0 %v11482_v61 }
 0xb17   : > { %5964 = vmatprep.subr.bf16.mxu0 %v10975_v20 }
 0xb1a   : > { %5965 = vmatpush1.bf16.msra.mxu0 %v10973_v19 }
 0xb1b   : > { %5966 = vmatprep.subr.bf16.mxu0 %v10981_v21 }
 0xb1e   : > { %5967 = vmatpush1.bf16.msra.mxu0 %v10979_v22 }
 0xb1f   : > { %5968 = vmatprep.subr.bf16.mxu0 %v10984_v23 }
 0xb22   : > { %5969 = vmatpush1.bf16.msra.mxu0 %v10982_v24 }
 0xb23   : > { %6044 = vmatprep.subr.bf16.mxu0 %v10987_v25 }
 0xbe8   : > { %v5810_v58 = vpop.f32.mrb[30].mxu0 }
 0xbe9   : > { %v5814_v26 = vpack.c.bf16 %v5810_v58, %v5810_v58  ;;  %v9697_v29 = vpop.f32.mrb[31].mxu0 }
 0xbeb   : > { %9447 = vmatmul.mubr.msk.bf16.vlgmr.msra.gmra.mrb[32].mxu0 %vm4673_vm1, %v5814_v26  ;;  %9448 = vmatmul.mubr.msk.bf16.vlgmr.msra.gmra.mrb[28].mxu1 %vm4673_vm1, %v5814_v26 }
 0xbec   : > { %6045 = vmatpush1.bf16.msra.mxu0 %v10985_v31  ;;  %9792 = vmatpush3.bf16.xpose.msk.msra.mxu1 %vm11913_vm2, %v9790_v32 }
 0xbed   : > { %6046 = vmatprep.subr.bf16.mxu0 %v10990_v46  ;;  %9702 = vmatprep.mubr.msk.f32.mxu1 %vm11479_vm0, %v11480_v33 }
 0xbee   : > { %6076 = vmatprep.mubr.bf16.mxu0 %v11482_v61  ;;  %9793 = vmatprep.subr.bf16.mxu1 %v11478_v28 }
 0xbf0   : > { %6047 = vmatpush1.bf16.msra.mxu0 %v10988_v49 }
 0xbf1   : > { %6048 = vmatprep.subr.bf16.mxu0 %v10993_v51 }
 0xbf3   : > { %9703 = vmatmul.mubr.msk.f32.vlgmr.msra.gmra.mrb[32].mxu1 %vm4673_vm1, %v6134_v18 }
 0xbf4   : > { %6049 = vmatpush1.bf16.msra.mxu0 %v10991_v59  ;;  %9709 = vmatprep.mubr.msk.f32.mxu1 %vm11479_vm0, %v11480_v33 }
 0xbf5   : > { %6050 = vmatprep.subr.bf16.mxu0 %v10996_v55 }
 0xbf8   : > { %6051 = vmatpush1.bf16.msra.mxu0 %v10994_v5 }
 0xbfb   : > { %9449 = vmatmul.mubr.msk.bf16.vlgmr.msra.gmra.mrb[36].mxu0 %vm4673_vm1, %v5814_v26 }
 0xbfc   : > { %6528 = vmatprep.mubr.bf16.mxu0 %v11482_v61 }
 0xcbe   : > { %v5996_v56 = vpop.f32.mrb[32].mxu0  ;;  %v6037_v60 = vpop.f32.mrb[28].mxu1 }
 0xcbf   : > { %v5998_v7 = vpop.f32.mrb[33].mxu0  ;;  %v6039_v45 = vpop.f32.mrb[29].mxu1 }
 0xcc0   : > { %v6091_v47 = vcombine.low %v5996_v56, %v5998_v7  ;;  %v6092_v54 = vcombine.low %v6037_v60, %v6039_v45  ;;  %v6000_v57 = vpop.f32.mrb[34].mxu0  ;;  %v6041_v15 = vpop.f32.mrb[30].mxu1 }
 0xcc1   : > { %v6001_v20 = vpop.f32.mrb[35].mxu0  ;;  %v6042_v19 = vpop.f32.mrb[31].mxu1  ;;  %v11002_v57 = vld [vmem:[#allocation11 + $0x27c] ss:$24 sps:$4 sm:$0xff]  }
 0xcc2   : > { %v6100_v21 = vrot.slane %v6091_v47, %v12027_v48  ;;  %v6107_v22 = vrot.slane %v6092_v54, %v12027_v48  ;;  %v10999_v54 = vld [vmem:[#allocation11 + $0x24c] ss:$24 sps:$4 sm:$0xff]   ;;  %v11014_v20 = vld [vmem:[#allocation11 + $0x2dc] ss:$24 sps:$4 sm:$0xff]   ;;  %v11012_v19 = vld [vmem:[#allocation11 + $0x2d8] ss:$24 sps:$4 sm:$0xff]  }
 0xcc3   : > { %v11005_v15 = vld [vmem:[#allocation11 + $0x244] ss:$24 sps:$4 sm:$0xff]   ;;  %6496 = vmatprep.subr.bf16.mxu0 %v10999_v54 }
 0xcc4   : > { %v6115_v23 = vcombine.low %v6100_v21, %v6107_v22 }
 0xcc6   : > { %v6122_v24 = vrot.slane %v6115_v23, %v12027_v48  ;;  %v6211_v25 = vpop.f32.mrb[32].mxu1  ;;  %v11003_v23 = vld [vmem:[#allocation11 + $0x240] ss:$24 sps:$4 sm:$0xff]  }
 0xcc7   : > { %v9704_v16 = vpop.f32.mrb[33].mxu1  ;;  %v6215_v44 = vsel %vm4753_vm3, %v6211_v25, -inf }
 0xcc8   : > { %6216 = vmax.xlane.f32.xlu1 %v6215_v44  ;;  %v11009_v16 = vld [vmem:[#allocation11 + $0x270] ss:$24 sps:$4 sm:$0xff]   ;;  %v11017_v44 = vld [vmem:[#allocation11 + $0x2a4] ss:$24 sps:$4 sm:$0xff]  }
 0xcce   : > { %v6078_v6 = vpop.f32.mrb[36].mxu0 }
 0xccf   : > { %v6080_v58 = vpop.f32.mrb[37].mxu0 }
 0xcd0   : > { %v6093_v31 = vcombine.low %v6078_v6, %v6080_v58  ;;  %v6082_v26 = vpop.f32.mrb[38].mxu0  ;;  %v11015_v6 = vld [vmem:[#allocation11 + $0x2a0] ss:$24 sps:$4 sm:$0xff]   ;;  %v11020_v58 = vld [vmem:[#allocation11 + $0x2d4] ss:$24 sps:$4 sm:$0xff]  }
 0xcd1   : > { %v6083_v29 = vpop.f32.mrb[39].mxu0  ;;  %v11023_v26 = vld [vmem:[#allocation11 + $0x254] ss:$24 sps:$4 sm:$0xff]  }
 0xcd2   : > { %v6114_v46 = vrot.slane %v6093_v31, %v12027_v48  ;;  %v11018_v31 = vld [vmem:[#allocation11 + $0x2d0] ss:$24 sps:$4 sm:$0xff]  }
 0xcd4   : > { %v6129_v32 = vrot.slane %v6114_v46, %v12027_v48  ;;  %v11021_v46 = vld [vmem:[#allocation11 + $0x250] ss:$24 sps:$4 sm:$0xff]  }
 0xcd6   : > { %v6130_v49 = vcombine.low %v6122_v24, %v6129_v32 }
 0xcd8   : > { %v12106_v51 = vadd.f32 %v6130_v49, %v12075_v8  ;;  %v10997_v8 = vld [vmem:[#allocation11 + $0x248] ss:$24 sps:$4 sm:$0xff]  }
 0xcd9   : > { %10001 = vrot.lane.b32.xlu1 %v10000_v17, %s11481_s11  ;;  %6497 = vmatpush1.bf16.msra.mxu0 %v10997_v8  ;;  %v11006_v17 = vld [vmem:[#allocation11 + $0x2a8] ss:$24 sps:$4 sm:$0xff]  }
 0xcda   : > { %6498 = vmatprep.subr.bf16.mxu0 %v11002_v57 }
 0xcdd   : > { %6499 = vmatpush1.bf16.msra.mxu0 %v11000_v43 }
 0xcde   : > { %6500 = vmatprep.subr.bf16.mxu0 %v11008_v11 }
 0xce1   : > { %6501 = vmatpush1.bf16.msra.mxu0 %v11006_v17 }
 0xce2   : > { %6502 = vmatprep.subr.bf16.mxu0 %v11014_v20 }
 0xce5   : > { %6503 = vmatpush1.bf16.msra.mxu0 %v11012_v19 }
 0xce6   : > { %9796 = vmatprep.subr.bf16.mxu0 %v11478_v28 }
 0xd55   : > { %v6217_v59 = vpop.xlane.xlu1 %6216 }
 0xd56   : > { %v6218_v55 = vsub.f32 %v6211_v25, %v6217_v59  ;;  %v11011_v25 = vld [vmem:[#allocation11 + $0x274] ss:$24 sps:$4 sm:$0xff]   ;;  %v11026_v59 = vld [vmem:[#allocation11 + $0x284] ss:$24 sps:$4 sm:$0xff]  }
 0xd58   : > { %v6219_v18 = vmul.f32 1.442695, %v6218_v55  ;;  %v11024_v55 = vld [vmem:[#allocation11 + $0x280] ss:$24 sps:$4 sm:$0xff]  }
 0xd59   : > { %v10002_v5 = vpop.permute.xlu1 %10001 }
 0xd5a   : > { %11189 = vpow2.f32 %v6219_v18  ;;  %v10004_v56 = vunpack.i.h.bf16 %v10002_v5  ;;  %v10003_v60 = vunpack.i.l.bf16 %v10002_v5  ;;  %v11029_v18 = vld [vmem:[#allocation11 + $0x2b4] ss:$24 sps:$4 sm:$0xff]   ;;  %v11027_v5 = vld [vmem:[#allocation11 + $0x2b0] ss:$24 sps:$4 sm:$0xff]  }
 0xd5c   : > { %v9794_v7 = vpack.c.bf16 %v10004_v56, %v10003_v60  ;;  %v1850_v56 = vmul.f32 0.125, %v11962_v52  ;;  %v11032_v60 = vld [vmem:[#allocation11 + $0x2e4] ss:$24 sps:$4 sm:$0xff]  }
 0xd5e   : > { %9795 = vmatpush3.bf16.msra.mxu1 %v9794_v7 }
 0xd5f   : > { %6455 = vmatprep.subr.bf16.mxu1 %v11005_v15 }
 0xd64   : > { %v11190_v45 = vpop.eup %11189 }
 0xd65   : > { %v6221_v47 = vsel %vm4753_vm3, %v11190_v45, 0.0 }
 0xd66   : > { %6222 = vadd.xlane.f32.xlu0 %v6221_v47 }
 0xdf3   : > { %v6223_v21 = vpop.xlane.xlu0 %6222 }
 0xdf4   : > { %11191 = vrcp.f32 %v6223_v21 }
 0xdfe   : > { %v11192_v22 = vpop.eup %11191 }
 0xdff   : > { %v6225_v24 = vmul.f32 %v11192_v22, %v11190_v45 }
 0xe01   : > { %9710 = vmatmul.mubr.msk.f32.vlgmr.msra.gmra.mrb[34].mxu1 %vm4765_vm4, %v6225_v24 }
 0xe02   : > { %6456 = vmatpush1.bf16.msra.mxu1 %v11003_v23  ;;  %6487 = vmatprep.mubr.bf16.mxu1 %v11482_v61 }
 0xe03   : > { %6457 = vmatprep.subr.bf16.mxu1 %v11011_v25 }
 0xe06   : > { %6458 = vmatpush1.bf16.msra.mxu1 %v11009_v16 }
 0xe07   : > { %6459 = vmatprep.subr.bf16.mxu1 %v11017_v44 }
 0xe0a   : > { %6460 = vmatpush1.bf16.msra.mxu1 %v11015_v6 }
 0xe0b   : > { %6461 = vmatprep.subr.bf16.mxu1 %v11020_v58 }
 0xe0e   : > { %6462 = vmatpush1.bf16.msra.mxu1 %v11018_v31 }
 0xe0f   : > { %6537 = vmatprep.subr.bf16.mxu1 %v11023_v26 }
 0xed4   : > { %v6303_v29 = vpop.f32.mrb[34].mxu1 }
 0xed5   : > { %v6307_v32 = vpack.c.bf16 %v6303_v29, %v6303_v29  ;;  %v9711_v49 = vpop.f32.mrb[35].mxu1 }
 0xed7   : > { %9478 = vmatmul.mubr.msk.bf16.vlgmr.msra.gmra.mrb[36].mxu1 %vm4673_vm1, %v6307_v32  ;;  %9479 = vmatmul.mubr.msk.bf16.vlgmr.msra.gmra.mrb[40].mxu0 %vm4673_vm1, %v6307_v32 }
 0xed8   : > { %6538 = vmatpush1.bf16.msra.mxu1 %v11021_v46  ;;  %9799 = vmatpush3.bf16.xpose.msk.msra.mxu0 %vm11913_vm2, %v9797_v38  ;;  %v11030_v38 = vld [vmem:[#allocation11 + $0x2e0] ss:$24 sps:$4 sm:$0xff]  }
 0xed9   : > { %6539 = vmatprep.subr.bf16.mxu1 %v11026_v59  ;;  %9716 = vmatprep.mubr.msk.f32.mxu0 %vm11479_vm0, %v11480_v33 }
 0xeda   : > { %9800 = vmatprep.subr.bf16.mxu0 %v11478_v28  ;;  %6569 = vmatprep.mubr.bf16.mxu1 %v11482_v61 }
 0xedc   : > { %6540 = vmatpush1.bf16.msra.mxu1 %v11024_v55 }
 0xedd   : > { %6541 = vmatprep.subr.bf16.mxu1 %v11029_v18  ;;  %v11033_v18 = vld [vmem:[#allocation11 + $0x308] ss:$24 sps:$4 sm:$0xff]  }
 0xedf   : > { %9717 = vmatmul.mubr.msk.f32.vlgmr.msra.gmra.mrb[44].mxu0 %vm4673_vm1, %v1850_v56 }
 0xee0   : > { %6542 = vmatpush1.bf16.msra.mxu1 %v11027_v5  ;;  %9802 = vmatpush3.bf16.msra.mxu0 %v9801_v3  ;;  %v11035_v5 = vld [vmem:[#allocation11 + $0x30c] ss:$24 sps:$4 sm:$0xff]  }
 0xee1   : > { %6543 = vmatprep.subr.bf16.mxu1 %v11032_v60  ;;  %9723 = vmatprep.mubr.msk.f32.mxu0 %vm11479_vm0, %v11480_v33  ;;  %v11038_v60 = vld [vmem:[#allocation11 + $0x33c] ss:$24 sps:$4 sm:$0xff]  }
 0xee4   : > { %6544 = vmatpush1.bf16.msra.mxu1 %v11030_v38  ;;  %v11036_v38 = vld [vmem:[#allocation11 + $0x338] ss:$24 sps:$4 sm:$0xff]  }
 0xee5   : > { %6978 = vmatprep.subr.bf16.mxu1 %v11035_v5 }
 0xee7   : > { %9480 = vmatmul.mubr.msk.bf16.vlgmr.msra.gmra.mrb[40].mxu1 %vm4673_vm1, %v6307_v32 }
 0xee8   : > { %7010 = vmatprep.mubr.bf16.mxu1 %v11482_v61  ;;  %6979 = vmatpush1.bf16.msra.mxu1 %v11033_v18 }
 0xee9   : > { %6980 = vmatprep.subr.bf16.mxu1 %v11038_v60 }
 0xeec   : > { %6981 = vmatpush1.bf16.msra.mxu1 %v11036_v38 }
 0xeed   : > { %6982 = vmatprep.subr.bf16.mxu1 %v11044_v27 }
 0xef0   : > { %6983 = vmatpush1.bf16.msra.mxu1 %v11042_v36 }
 0xfaa   : > { %v6489_v52 = vpop.f32.mrb[36].mxu1  ;;  %v6530_v7 = vpop.f32.mrb[40].mxu0 }
 0xfab   : > { %v6491_v45 = vpop.f32.mrb[37].mxu1  ;;  %v6532_v47 = vpop.f32.mrb[41].mxu0 }
 0xfac   : > { %v6584_v8 = vcombine.low %v6489_v52, %v6491_v45  ;;  %v6585_v54 = vcombine.low %v6530_v7, %v6532_v47  ;;  %v6493_v57 = vpop.f32.mrb[38].mxu1  ;;  %v6534_v15 = vpop.f32.mrb[42].mxu0  ;;  %v11039_v45 = vld [vmem:[#allocation11 + $0x300] ss:$24 sps:$4 sm:$0xff]  }
 0xfad   : > { %v6494_v43 = vpop.f32.mrb[39].mxu1  ;;  %v6535_v3 = vpop.f32.mrb[43].mxu0  ;;  %v11053_v57 = vld [vmem:[#allocation11 + $0x364] ss:$24 sps:$4 sm:$0xff]   ;;  %v11051_v15 = vld [vmem:[#allocation11 + $0x360] ss:$24 sps:$4 sm:$0xff]  }
 0xfae   : > { %v6593_v11 = vrot.slane %v6584_v8, %v12027_v48  ;;  %v6600_v17 = vrot.slane %v6585_v54, %v12027_v48  ;;  %v11047_v8 = vld [vmem:[#allocation11 + $0x334] ss:$24 sps:$4 sm:$0xff]   ;;  %v11045_v54 = vld [vmem:[#allocation11 + $0x330] ss:$24 sps:$4 sm:$0xff]  }
 0xfaf   : > { %v11056_v43 = vld [vmem:[#allocation11 + $0x394] ss:$24 sps:$4 sm:$0xff]   ;;  %v11054_v3 = vld [vmem:[#allocation11 + $0x390] ss:$24 sps:$4 sm:$0xff]  }
 0xfb0   : > { %v6608_v20 = vcombine.low %v6593_v11, %v6600_v17  ;;  %v11059_v11 = vld [vmem:[#allocation11 + $0x314] ss:$24 sps:$4 sm:$0xff]  }
 0xfb2   : > { %v6615_v19 = vrot.slane %v6608_v20, %v12027_v48  ;;  %v6701_v21 = vpop.f32.mrb[44].mxu0 }
 0xfb3   : > { %v9718_v22 = vpop.f32.mrb[45].mxu0  ;;  %v6705_v23 = vsel %vm4753_vm3, %v6701_v21, -inf }
 0xfb4   : > { %6706 = vmax.xlane.f32.xlu0 %v6705_v23  ;;  %v11057_v22 = vld [vmem:[#allocation11 + $0x310] ss:$24 sps:$4 sm:$0xff]  }
 0xfba   : > { %v6571_v24 = vpop.f32.mrb[40].mxu1 }
 0xfbb   : > { %v6573_v25 = vpop.f32.mrb[41].mxu1 }
 0xfbc   : > { %v6586_v16 = vcombine.low %v6571_v24, %v6573_v25  ;;  %v6575_v44 = vpop.f32.mrb[42].mxu1  ;;  %v11062_v25 = vld [vmem:[#allocation11 + $0x344] ss:$24 sps:$4 sm:$0xff]  }
 0xfbd   : > { %v6576_v6 = vpop.f32.mrb[43].mxu1  ;;  %v11060_v44 = vld [vmem:[#allocation11 + $0x340] ss:$24 sps:$4 sm:$0xff]  }
 0xfbe   : > { %v6607_v58 = vrot.slane %v6586_v16, %v12027_v48  ;;  %v11065_v6 = vld [vmem:[#allocation11 + $0x374] ss:$24 sps:$4 sm:$0xff]  }
 0xfc0   : > { %v6622_v31 = vrot.slane %v6607_v58, %v12027_v48  ;;  %v11063_v58 = vld [vmem:[#allocation11 + $0x370] ss:$24 sps:$4 sm:$0xff]  }
 0xfc2   : > { %v6623_v26 = vcombine.low %v6615_v19, %v6622_v31  ;;  %v11068_v31 = vld [vmem:[#allocation11 + $0x3a4] ss:$24 sps:$4 sm:$0xff]  }
 0xfc4   : > { %v12143_v29 = vadd.f32 %v6623_v26, %v12106_v51  ;;  %v11041_v51 = vld [vmem:[#allocation11 + $0x304] ss:$24 sps:$4 sm:$0xff]  }
 0xfc5   : > { %6937 = vmatprep.subr.bf16.mxu0 %v11041_v51 }
 0xfca   : > { %10006 = vrot.lane.b32.xlu0 %v10005_v12, %s11481_s11  ;;  %v11050_v12 = vld [vmem:[#allocation11 + $0x39c] ss:$24 sps:$4 sm:$0xff]  }
 0xfcb   : > { %6984 = vmatprep.subr.bf16.mxu1 %v11050_v12 }
 0xfce   : > { %7108 = vrot.lane.b32.xlu0 %v1850_v56, %s11481_s11  ;;  %v11048_v56 = vld [vmem:[#allocation11 + $0x398] ss:$24 sps:$4 sm:$0xff]  }
 0xfcf   : > { %6985 = vmatpush1.bf16.msra.mxu1 %v11048_v56 }
 0xfd0   : > { %9803 = vmatprep.subr.bf16.mxu1 %v11478_v28 }
0x1041   : > { %v6707_v46 = vpop.xlane.xlu0 %6706 }
0x1042   : > { %v6708_v32 = vsub.f32 %v6701_v21, %v6707_v46  ;;  %v11066_v46 = vld [vmem:[#allocation11 + $0x3a0] ss:$24 sps:$4 sm:$0xff]  }
0x1044   : > { %v6709_v49 = vmul.f32 1.442695, %v6708_v32 }
0x1045   : > { %v10007_v17 = vpop.permute.xlu0 %10006 }
0x1046   : > { %11193 = vpow2.f32 %v6709_v49  ;;  %v10009_v20 = vunpack.i.h.bf16 %v10007_v17  ;;  %v10008_v19 = vunpack.i.l.bf16 %v10007_v17 }
0x1048   : > { %v9804_v16 = vpack.c.bf16 %v10009_v20, %v10008_v19 }
0x1049   : > { %v7109_v26 = vpop.permute.xlu0 %7108 }
0x1050   : > { %v11194_v59 = vpop.eup %11193 }
0x1051   : > { %v6711_v55 = vsel %vm4753_vm3, %v11194_v59, 0.0 }
0x1052   : > { %6712 = vadd.xlane.f32.xlu1 %v6711_v55 }
0x10df   : > { %v6713_v52 = vpop.xlane.xlu1 %6712 }
0x10e0   : > { %11195 = vrcp.f32 %v6713_v52 }
0x10ea   : > { %v11196_v7 = vpop.eup %11195 }
0x10eb   : > { %v6715_v47 = vmul.f32 %v11196_v7, %v11194_v59 }
0x10ed   : > { %9724 = vmatmul.mubr.msk.f32.vlgmr.msra.gmra.mrb[46].mxu0 %vm4765_vm4, %v6715_v47 }
0x10ee   : > { %6938 = vmatpush1.bf16.msra.mxu0 %v11039_v45  ;;  %6969 = vmatprep.mubr.bf16.mxu0 %v11482_v61 }
0x10ef   : > { %6939 = vmatprep.subr.bf16.mxu0 %v11047_v8 }
0x10f2   : > { %6940 = vmatpush1.bf16.msra.mxu0 %v11045_v54 }
0x10f3   : > { %6941 = vmatprep.subr.bf16.mxu0 %v11053_v57 }
0x10f6   : > { %6942 = vmatpush1.bf16.msra.mxu0 %v11051_v15 }
0x10f7   : > { %6943 = vmatprep.subr.bf16.mxu0 %v11056_v43 }
0x10fa   : > { %6944 = vmatpush1.bf16.msra.mxu0 %v11054_v3 }
0x10fb   : > { %7019 = vmatprep.subr.bf16.mxu0 %v11059_v11 }
0x11c0   : > { %v6785_v21 = vpop.f32.mrb[46].mxu0 }
0x11c1   : > { %v6789_v23 = vpack.c.bf16 %v6785_v21, %v6785_v21  ;;  %v9725_v24 = vpop.f32.mrb[47].mxu0 }
0x11c3   : > { %9509 = vmatmul.mubr.msk.bf16.vlgmr.msra.gmra.mrb[48].mxu0 %vm4673_vm1, %v6789_v23  ;;  %9510 = vmatmul.mubr.msk.bf16.vlgmr.msra.gmra.mrb[44].mxu1 %vm4673_vm1, %v6789_v23 }
0x11c4   : > { %7020 = vmatpush1.bf16.msra.mxu0 %v11057_v22  ;;  %9806 = vmatpush3.bf16.xpose.msk.msra.mxu1 %vm11913_vm2, %v9804_v16  ;;  %v11071_v16 = vld [vmem:[#allocation11 + $0x3cc] ss:$24 sps:$4 sm:$0xff]  }
0x11c5   : > { %7021 = vmatprep.subr.bf16.mxu0 %v11062_v25  ;;  %9730 = vmatprep.mubr.msk.f32.mxu1 %vm11479_vm0, %v11480_v33  ;;  %v11069_v25 = vld [vmem:[#allocation11 + $0x3c8] ss:$24 sps:$4 sm:$0xff]  }
0x11c6   : > { %7051 = vmatprep.mubr.bf16.mxu0 %v11482_v61  ;;  %9807 = vmatprep.subr.bf16.mxu1 %v11478_v28 }
0x11c8   : > { %7022 = vmatpush1.bf16.msra.mxu0 %v11060_v44  ;;  %v11074_v44 = vld [vmem:[#allocation11 + $0x3fc] ss:$24 sps:$4 sm:$0xff]  }
0x11c9   : > { %7023 = vmatprep.subr.bf16.mxu0 %v11065_v6  ;;  %v11080_v6 = vld [vmem:[#allocation11 + $0x42c] ss:$24 sps:$4 sm:$0xff]  }
0x11cb   : > { %9731 = vmatmul.mubr.msk.f32.vlgmr.msra.gmra.mrb[48].mxu1 %vm4673_vm1, %v7109_v26  ;;  %v11084_v26 = vld [vmem:[#allocation11 + $0x458] ss:$24 sps:$4 sm:$0xff]  }
0x11cc   : > { %7024 = vmatpush1.bf16.msra.mxu0 %v11063_v58  ;;  %9737 = vmatprep.mubr.msk.f32.mxu1 %vm11479_vm0, %v11480_v33  ;;  %v11078_v58 = vld [vmem:[#allocation11 + $0x428] ss:$24 sps:$4 sm:$0xff]  }
0x11cd   : > { %7025 = vmatprep.subr.bf16.mxu0 %v11068_v31  ;;  %v11086_v31 = vld [vmem:[#allocation11 + $0x45c] ss:$24 sps:$4 sm:$0xff]  }
0x11d0   : > { %7026 = vmatpush1.bf16.msra.mxu0 %v11066_v46 }
0x11d1   : > { %7471 = vmatprep.subr.bf16.mxu0 %v11071_v16 }
0x11d3   : > { %9511 = vmatmul.mubr.msk.bf16.vlgmr.msra.gmra.mrb[52].mxu0 %vm4673_vm1, %v6789_v23 }
0x11d4   : > { %7503 = vmatprep.mubr.bf16.mxu0 %v11482_v61  ;;  %7472 = vmatpush1.bf16.msra.mxu0 %v11069_v25 }
0x11d5   : > { %7473 = vmatprep.subr.bf16.mxu0 %v11074_v44 }
0x1296   : > { %v6971_v32 = vpop.f32.mrb[48].mxu0  ;;  %v7012_v49 = vpop.f32.mrb[44].mxu1 }
0x1297   : > { %v6973_v59 = vpop.f32.mrb[49].mxu0  ;;  %v7014_v55 = vpop.f32.mrb[45].mxu1 }
0x1298   : > { %v7066_v18 = vcombine.low %v6971_v32, %v6973_v59  ;;  %v7067_v5 = vcombine.low %v7012_v49, %v7014_v55  ;;  %v6975_v60 = vpop.f32.mrb[50].mxu0  ;;  %v7016_v51 = vpop.f32.mrb[46].mxu1  ;;  %v11077_v32 = vld [vmem:[#allocation11 + $0x3c4] ss:$24 sps:$4 sm:$0xff]   ;;  %v11075_v55 = vld [vmem:[#allocation11 + $0x3c0] ss:$24 sps:$4 sm:$0xff]  }
0x1299   : > { %v6976_v38 = vpop.f32.mrb[51].mxu0  ;;  %v7017_v27 = vpop.f32.mrb[47].mxu1  ;;  %v11081_v60 = vld [vmem:[#allocation11 + $0x3f0] ss:$24 sps:$4 sm:$0xff]   ;;  %v11089_v51 = vld [vmem:[#allocation11 + $0x424] ss:$24 sps:$4 sm:$0xff]  }
0x129a   : > { %v7075_v36 = vrot.slane %v7066_v18, %v12027_v48  ;;  %v7082_v12 = vrot.slane %v7067_v5, %v12027_v48  ;;  %v11083_v5 = vld [vmem:[#allocation11 + $0x3f4] ss:$24 sps:$4 sm:$0xff]   ;;  %v11087_v38 = vld [vmem:[#allocation11 + $0x420] ss:$24 sps:$4 sm:$0xff]  }
0x129b   : > { %v11092_v27 = vld [vmem:[#allocation11 + $0x454] ss:$24 sps:$4 sm:$0xff]  }
0x129c   : > { %v7090_v56 = vcombine.low %v7075_v36, %v7082_v12  ;;  %v11090_v36 = vld [vmem:[#allocation11 + $0x450] ss:$24 sps:$4 sm:$0xff]   ;;  %v11095_v12 = vld [vmem:[#allocation11 + $0x3d4] ss:$24 sps:$4 sm:$0xff]  }
0x129e   : > { %v7097_v52 = vrot.slane %v7090_v56, %v12027_v48  ;;  %v7186_v7 = vpop.f32.mrb[48].mxu1 }
0x129f   : > { %v9732_v45 = vpop.f32.mrb[49].mxu1  ;;  %v7190_v47 = vsel %vm4753_vm3, %v7186_v7, -inf }
0x12a0   : > { %7191 = vmax.xlane.f32.xlu0 %v7190_v47  ;;  %v11098_v47 = vld [vmem:[#allocation11 + $0x404] ss:$24 sps:$4 sm:$0xff]  }
0x12a6   : > { %v7053_v8 = vpop.f32.mrb[52].mxu0 }
0x12a7   : > { %v7055_v54 = vpop.f32.mrb[53].mxu0 }
0x12a8   : > { %v7068_v57 = vcombine.low %v7053_v8, %v7055_v54  ;;  %v7057_v15 = vpop.f32.mrb[54].mxu0  ;;  %v11096_v8 = vld [vmem:[#allocation11 + $0x400] ss:$24 sps:$4 sm:$0xff]   ;;  %v11101_v54 = vld [vmem:[#allocation11 + $0x434] ss:$24 sps:$4 sm:$0xff]  }
0x12a9   : > { %v7058_v43 = vpop.f32.mrb[55].mxu0  ;;  %v1851_v15 = vmul.f32 0.125, %v11964_v0 }
0x12aa   : > { %v7089_v3 = vrot.slane %v7068_v57, %v12027_v48  ;;  %v11099_v57 = vld [vmem:[#allocation11 + $0x430] ss:$24 sps:$4 sm:$0xff]   ;;  %v11104_v43 = vld [vmem:[#allocation11 + $0x464] ss:$24 sps:$4 sm:$0xff]  }
0x12ac   : > { %v7104_v11 = vrot.slane %v7089_v3, %v12027_v48 }
0x12ae   : > { %v7105_v17 = vcombine.low %v7097_v52, %v7104_v11  ;;  %v11093_v52 = vld [vmem:[#allocation11 + $0x3d0] ss:$24 sps:$4 sm:$0xff]  }
0x12b0   : > { %v12174_v20 = vadd.f32 %v7105_v17, %v12143_v29  ;;  %v11072_v29 = vld [vmem:[#allocation11 + $0x3f8] ss:$24 sps:$4 sm:$0xff]  }
0x12b1   : > { %7474 = vmatpush1.bf16.msra.mxu0 %v11072_v29 }
0x12b2   : > { %7475 = vmatprep.subr.bf16.mxu0 %v11080_v6 }
0x12b5   : > { %7476 = vmatpush1.bf16.msra.mxu0 %v11078_v58 }
0x12b6   : > { %7477 = vmatprep.subr.bf16.mxu0 %v11086_v31 }
0x12b9   : > { %7478 = vmatpush1.bf16.msra.mxu0 %v11084_v26 }
0x12ba   : > { %9810 = vmatprep.subr.bf16.mxu0 %v11478_v28 }
0x132d   : > { %v7192_v19 = vpop.xlane.xlu0 %7191 }
0x132e   : > { %v7193_v21 = vsub.f32 %v7186_v7, %v7192_v19 }
0x1330   : > { %v7194_v22 = vmul.f32 1.442695, %v7193_v21 }
0x1332   : > { %11197 = vpow2.f32 %v7194_v22 }
0x133c   : > { %v11198_v23 = vpop.eup %11197 }
0x133d   : > { %v7196_v24 = vsel %vm4753_vm3, %v11198_v23, 0.0 }
0x133e   : > { %7197 = vadd.xlane.f32.xlu1 %v7196_v24 }
0x134f   : > { %10011 = vrot.lane.b32.xlu1 %v10010_v2, %s11481_s11 }
0x13cb   : > { %v7198_v4 = vpop.xlane.xlu1 %7197 }
0x13cc   : > { %11199 = vrcp.f32 %v7198_v4 }
0x13cf   : > { %v10012_v1 = vpop.permute.xlu1 %10011 }
0x13d0   : > { %v10014_v2 = vunpack.i.h.bf16 %v10012_v1  ;;  %v10013_v46 = vunpack.i.l.bf16 %v10012_v1 }
0x13d2   : > { %v9808_v49 = vpack.c.bf16 %v10014_v2, %v10013_v46 }
0x13d4   : > { %9809 = vmatpush3.bf16.msra.mxu1 %v9808_v49 }
0x13d5   : > { %7430 = vmatprep.subr.bf16.mxu1 %v11077_v32 }
0x13d6   : > { %v11200_v59 = vpop.eup %11199 }
0x13d7   : > { %v7200_v18 = vmul.f32 %v11200_v59, %v11198_v23 }
0x13d9   : > { %9738 = vmatmul.mubr.msk.f32.vlgmr.msra.gmra.mrb[50].mxu1 %vm4765_vm4, %v7200_v18 }
0x13da   : > { %7431 = vmatpush1.bf16.msra.mxu1 %v11075_v55  ;;  %7462 = vmatprep.mubr.bf16.mxu1 %v11482_v61 }
0x13db   : > { %7432 = vmatprep.subr.bf16.mxu1 %v11083_v5 }
0x13de   : > { %7433 = vmatpush1.bf16.msra.mxu1 %v11081_v60 }
0x13df   : > { %7434 = vmatprep.subr.bf16.mxu1 %v11089_v51 }
0x13e2   : > { %7435 = vmatpush1.bf16.msra.mxu1 %v11087_v38 }
0x13e3   : > { %7436 = vmatprep.subr.bf16.mxu1 %v11092_v27  ;;  %v11105_v27 = vld [vmem:[#allocation11 + $0x488] ss:$24 sps:$4 sm:$0xff]  }
0x13e6   : > { %7437 = vmatpush1.bf16.msra.mxu1 %v11090_v36  ;;  %v11107_v36 = vld [vmem:[#allocation11 + $0x48c] ss:$24 sps:$4 sm:$0xff]  }
0x13e7   : > { %7512 = vmatprep.subr.bf16.mxu1 %v11095_v12  ;;  %v11110_v12 = vld [vmem:[#allocation11 + $0x4bc] ss:$24 sps:$4 sm:$0xff]  }
0x14ac   : > { %v7278_v56 = vpop.f32.mrb[50].mxu1 }
0x14ad   : > { %v7282_v7 = vpack.c.bf16 %v7278_v56, %v7278_v56  ;;  %v9739_v45 = vpop.f32.mrb[51].mxu1  ;;  %v11108_v56 = vld [vmem:[#allocation11 + $0x4b8] ss:$24 sps:$4 sm:$0xff]  }
0x14ae   : > { %v11122_v45 = vld [vmem:[#allocation11 + $0x51c] ss:$24 sps:$4 sm:$0xff]  }
0x14af   : > { %9540 = vmatmul.mubr.msk.bf16.vlgmr.msra.gmra.mrb[52].mxu1 %vm4673_vm1, %v7282_v7  ;;  %9541 = vmatmul.mubr.msk.bf16.vlgmr.msra.gmra.mrb[56].mxu0 %vm4673_vm1, %v7282_v7 }
0x14b0   : > { %7513 = vmatpush1.bf16.msra.mxu1 %v11093_v52  ;;  %9813 = vmatpush3.bf16.xpose.msk.msra.mxu0 %vm11913_vm2, %v9811_v42  ;;  %v11102_v42 = vld [vmem:[#allocation11 + $0x460] ss:$24 sps:$4 sm:$0xff]   ;;  %v11116_v52 = vld [vmem:[#allocation11 + $0x4ec] ss:$24 sps:$4 sm:$0xff]  }
0x14b1   : > { %7514 = vmatprep.subr.bf16.mxu1 %v11098_v47  ;;  %9744 = vmatprep.mubr.msk.f32.mxu0 %vm11479_vm0, %v11480_v33  ;;  %v11120_v47 = vld [vmem:[#allocation11 + $0x518] ss:$24 sps:$4 sm:$0xff]  }
0x14b2   : > { %9814 = vmatprep.subr.bf16.mxu0 %v11478_v28  ;;  %7544 = vmatprep.mubr.bf16.mxu1 %v11482_v61 }
0x14b4   : > { %7515 = vmatpush1.bf16.msra.mxu1 %v11096_v8 }
0x14b5   : > { %7516 = vmatprep.subr.bf16.mxu1 %v11101_v54  ;;  %v11119_v54 = vld [vmem:[#allocation11 + $0x4b4] ss:$24 sps:$4 sm:$0xff]  }
0x14b7   : > { %9745 = vmatmul.mubr.msk.f32.vlgmr.msra.gmra.mrb[60].mxu0 %vm4673_vm1, %v1851_v15 }
0x14b8   : > { %7517 = vmatpush1.bf16.msra.mxu1 %v11099_v57  ;;  %9816 = vmatpush3.bf16.msra.mxu0 %v9815_v62  ;;  %v11117_v57 = vld [vmem:[#allocation11 + $0x4b0] ss:$24 sps:$4 sm:$0xff]  }
0x14b9   : > { %7518 = vmatprep.subr.bf16.mxu1 %v11104_v43  ;;  %9751 = vmatprep.mubr.msk.f32.mxu0 %vm11479_vm0, %v11480_v33  ;;  %v11123_v43 = vld [vmem:[#allocation11 + $0x4e0] ss:$24 sps:$4 sm:$0xff]  }
0x14bc   : > { %7519 = vmatpush1.bf16.msra.mxu1 %v11102_v42  ;;  %v11128_v42 = vld [vmem:[#allocation11 + $0x514] ss:$24 sps:$4 sm:$0xff]  }
0x14bd   : > { %7953 = vmatprep.subr.bf16.mxu1 %v11107_v36 }
0x14bf   : > { %9542 = vmatmul.mubr.msk.bf16.vlgmr.msra.gmra.mrb[56].mxu1 %vm4673_vm1, %v7282_v7  ;;  %v11114_v7 = vld [vmem:[#allocation11 + $0x4e8] ss:$24 sps:$4 sm:$0xff]  }
0x14c0   : > { %7985 = vmatprep.mubr.bf16.mxu1 %v11482_v61  ;;  %7954 = vmatpush1.bf16.msra.mxu1 %v11105_v27 }
0x14c1   : > { %7955 = vmatprep.subr.bf16.mxu1 %v11110_v12 }
0x14c4   : > { %7956 = vmatpush1.bf16.msra.mxu1 %v11108_v56 }
0x14c5   : > { %7957 = vmatprep.subr.bf16.mxu1 %v11116_v52 }
0x14c8   : > { %7958 = vmatpush1.bf16.msra.mxu1 %v11114_v7 }
0x14c9   : > { %7959 = vmatprep.subr.bf16.mxu1 %v11122_v45 }
0x14cc   : > { %7960 = vmatpush1.bf16.msra.mxu1 %v11120_v47 }
0x14cd   : > { %9817 = vmatprep.subr.bf16.mxu1 %v11478_v28 }
0x1582   : > { %v7464_v0 = vpop.f32.mrb[52].mxu1  ;;  %v7505_v3 = vpop.f32.mrb[56].mxu0 }
0x1583   : > { %v7466_v11 = vpop.f32.mrb[53].mxu1  ;;  %v7507_v17 = vpop.f32.mrb[57].mxu0 }
0x1584   : > { %v7559_v19 = vcombine.low %v7464_v0, %v7466_v11  ;;  %v7560_v21 = vcombine.low %v7505_v3, %v7507_v17  ;;  %v7468_v22 = vpop.f32.mrb[54].mxu1  ;;  %v7509_v23 = vpop.f32.mrb[58].mxu0  ;;  %v11126_v0 = vld [vmem:[#allocation11 + $0x510] ss:$24 sps:$4 sm:$0xff]   ;;  %v11131_v3 = vld [vmem:[#allocation11 + $0x494] ss:$24 sps:$4 sm:$0xff]  }
0x1585   : > { %v7469_v24 = vpop.f32.mrb[55].mxu1  ;;  %v7510_v62 = vpop.f32.mrb[59].mxu0  ;;  %v11129_v22 = vld [vmem:[#allocation11 + $0x490] ss:$24 sps:$4 sm:$0xff]  }
0x1586   : > { %v7568_v25 = vrot.slane %v7559_v19, %v12027_v48  ;;  %v7575_v16 = vrot.slane %v7560_v21, %v12027_v48  ;;  %v11134_v62 = vld [vmem:[#allocation11 + $0x4c4] ss:$24 sps:$4 sm:$0xff]  }
0x1588   : > { %v7583_v44 = vcombine.low %v7568_v25, %v7575_v16  ;;  %v11132_v16 = vld [vmem:[#allocation11 + $0x4c0] ss:$24 sps:$4 sm:$0xff]  }
0x158a   : > { %v7590_v29 = vrot.slane %v7583_v44, %v12027_v48  ;;  %v7676_v6 = vpop.f32.mrb[60].mxu0  ;;  %v11137_v44 = vld [vmem:[#allocation11 + $0x4f4] ss:$24 sps:$4 sm:$0xff]  }
0x158b   : > { %v9746_v58 = vpop.f32.mrb[61].mxu0  ;;  %v7680_v31 = vsel %vm4753_vm3, %v7676_v6, -inf }
0x158c   : > { %7681 = vmax.xlane.f32.xlu1 %v7680_v31 }
0x1592   : > { %v7546_v26 = vpop.f32.mrb[56].mxu1 }
0x1593   : > { %v7548_v4 = vpop.f32.mrb[57].mxu1 }
0x1594   : > { %v7561_v1 = vcombine.low %v7546_v26, %v7548_v4  ;;  %v7550_v2 = vpop.f32.mrb[58].mxu1 }
0x1595   : > { %v7551_v46 = vpop.f32.mrb[59].mxu1 }
0x1596   : > { %v7582_v32 = vrot.slane %v7561_v1, %v12027_v48 }
0x1598   : > { %v7597_v49 = vrot.slane %v7582_v32, %v12027_v48 }
0x159a   : > { %v7598_v59 = vcombine.low %v7590_v29, %v7597_v49  ;;  %v11135_v29 = vld [vmem:[#allocation11 + $0x4f0] ss:$24 sps:$4 sm:$0xff]  }
0x159c   : > { %v12211_v55 = vadd.f32 %v7598_v59, %v12174_v20  ;;  %v11113_v20 = vld [vmem:[#allocation11 + $0x484] ss:$24 sps:$4 sm:$0xff]  }
0x159d   : > { %7912 = vmatprep.subr.bf16.mxu0 %v11113_v20 }
0x1619   : > { %v7682_v18 = vpop.xlane.xlu1 %7681 }
0x161a   : > { %v7683_v5 = vsub.f32 %v7676_v6, %v7682_v18  ;;  %v11140_v6 = vld [vmem:[#allocation11 + $0x524] ss:$24 sps:$4 sm:$0xff]  }
0x161c   : > { %v7684_v60 = vmul.f32 1.442695, %v7683_v5 }
0x161e   : > { %11201 = vpow2.f32 %v7684_v60 }
0x1628   : > { %v11202_v51 = vpop.eup %11201 }
0x1629   : > { %v7686_v38 = vsel %vm4753_vm3, %v11202_v51, 0.0 }
0x162a   : > { %7687 = vadd.xlane.f32.xlu0 %v7686_v38 }
0x1640   : > { %10016 = vrot.lane.b32.xlu0 %v10015_v41, %s11481_s11  ;;  %v11111_v41 = vld [vmem:[#allocation11 + $0x480] ss:$24 sps:$4 sm:$0xff]  }
0x1644   : > { %8083 = vrot.lane.b32.xlu0 %v1851_v15, %s11481_s11  ;;  %v11125_v15 = vld [vmem:[#allocation11 + $0x4e4] ss:$24 sps:$4 sm:$0xff]  }
0x16b7   : > { %v7688_v34 = vpop.xlane.xlu0 %7687 }
0x16b8   : > { %11203 = vrcp.f32 %v7688_v34 }
0x16bb   : > { %v10017_v11 = vpop.permute.xlu0 %10016 }
0x16bc   : > { %v10019_v17 = vunpack.i.h.bf16 %v10017_v11  ;;  %v10018_v19 = vunpack.i.l.bf16 %v10017_v11  ;;  %v11162_v11 = vld [vmem:[#allocation11 + $0x5d8] ss:$24 sps:$4 sm:$0xff]  }
0x16be   : > { %v9818_v25 = vpack.c.bf16 %v10019_v17, %v10018_v19  ;;  %v11164_v17 = vld [vmem:[#allocation11 + $0x5dc] ss:$24 sps:$4 sm:$0xff]  }
0x16bf   : > { %v8084_v58 = vpop.permute.xlu0 %8083 }
0x16c2   : > { %v11204_v40 = vpop.eup %11203 }
0x16c3   : > { %v7690_v8 = vmul.f32 %v11204_v40, %v11202_v51 }
0x16c5   : > { %9752 = vmatmul.mubr.msk.f32.vlgmr.msra.gmra.mrb[62].mxu0 %vm4765_vm4, %v7690_v8 }
0x16c6   : > { %7913 = vmatpush1.bf16.msra.mxu0 %v11111_v41  ;;  %7944 = vmatprep.mubr.bf16.mxu0 %v11482_v61 }
0x16c7   : > { %7914 = vmatprep.subr.bf16.mxu0 %v11119_v54 }
0x16ca   : > { %7915 = vmatpush1.bf16.msra.mxu0 %v11117_v57 }
0x16cb   : > { %7916 = vmatprep.subr.bf16.mxu0 %v11125_v15  ;;  %v11144_v15 = vld [vmem:[#allocation11 + $0x548] ss:$24 sps:$4 sm:$0xff]  }
0x16ce   : > { %7917 = vmatpush1.bf16.msra.mxu0 %v11123_v43  ;;  %v11146_v43 = vld [vmem:[#allocation11 + $0x54c] ss:$24 sps:$4 sm:$0xff]  }
0x16cf   : > { %7918 = vmatprep.subr.bf16.mxu0 %v11128_v42  ;;  %v11150_v42 = vld [vmem:[#allocation11 + $0x578] ss:$24 sps:$4 sm:$0xff]  }
0x16d2   : > { %7919 = vmatpush1.bf16.msra.mxu0 %v11126_v0  ;;  %v11156_v0 = vld [vmem:[#allocation11 + $0x5a8] ss:$24 sps:$4 sm:$0xff]  }
0x16d3   : > { %7994 = vmatprep.subr.bf16.mxu0 %v11131_v3  ;;  %v11158_v3 = vld [vmem:[#allocation11 + $0x5ac] ss:$24 sps:$4 sm:$0xff]  }
0x1798   : > { %v7760_v21 = vpop.f32.mrb[62].mxu0 }
0x1799   : > { %v7764_v23 = vpack.c.bf16 %v7760_v21, %v7760_v21  ;;  %v9753_v24 = vpop.f32.mrb[63].mxu0  ;;  %v11143_v21 = vld [vmem:[#allocation11 + $0x544] ss:$24 sps:$4 sm:$0xff]  }
0x179a   : > { %v11141_v24 = vld [vmem:[#allocation11 + $0x540] ss:$24 sps:$4 sm:$0xff]  }
0x179b   : > { %9571 = vmatmul.mubr.msk.bf16.vlgmr.msra.gmra.mrb[64].mxu0 %vm4673_vm1, %v7764_v23  ;;  %9572 = vmatmul.mubr.msk.bf16.vlgmr.msra.gmra.mrb[60].mxu1 %vm4673_vm1, %v7764_v23 }
0x179c   : > { %7995 = vmatpush1.bf16.msra.mxu0 %v11129_v22  ;;  %9820 = vmatpush3.bf16.xpose.msk.msra.mxu1 %vm11913_vm2, %v9818_v25  ;;  %v11149_v25 = vld [vmem:[#allocation11 + $0x574] ss:$24 sps:$4 sm:$0xff]  }
0x179d   : > { %7996 = vmatprep.subr.bf16.mxu0 %v11134_v62  ;;  %9758 = vmatprep.mubr.msk.f32.mxu1 %vm11479_vm0, %v11480_v33 }
0x179e   : > { %8026 = vmatprep.mubr.bf16.mxu0 %v11482_v61  ;;  %9821 = vmatprep.subr.bf16.mxu1 %v11478_v28 }
0x17a0   : > { %7997 = vmatpush1.bf16.msra.mxu0 %v11132_v16  ;;  %v11147_v16 = vld [vmem:[#allocation11 + $0x570] ss:$24 sps:$4 sm:$0xff]  }
0x17a1   : > { %7998 = vmatprep.subr.bf16.mxu0 %v11137_v44  ;;  %v11155_v44 = vld [vmem:[#allocation11 + $0x5a4] ss:$24 sps:$4 sm:$0xff]  }
0x17a3   : > { %9759 = vmatmul.mubr.msk.f32.vlgmr.msra.gmra.mrb[64].mxu1 %vm4673_vm1, %v8084_v58  ;;  %v11159_v58 = vld [vmem:[#allocation11 + $0x5d0] ss:$24 sps:$4 sm:$0xff]  }
0x17a4   : > { %7999 = vmatpush1.bf16.msra.mxu0 %v11135_v29  ;;  %9765 = vmatprep.mubr.msk.f32.mxu1 %vm11479_vm0, %v11480_v33  ;;  %v11153_v29 = vld [vmem:[#allocation11 + $0x5a0] ss:$24 sps:$4 sm:$0xff]  }
0x17a5   : > { %8000 = vmatprep.subr.bf16.mxu0 %v11140_v6  ;;  %v11161_v6 = vld [vmem:[#allocation11 + $0x5d4] ss:$24 sps:$4 sm:$0xff]  }
0x17a8   : > { %8001 = vmatpush1.bf16.msra.mxu0 %v11138_v50  ;;  %v11167_v50 = vld [vmem:[#allocation11 + $0x554] ss:$24 sps:$4 sm:$0xff]  }
0x17a9   : > { %8446 = vmatprep.subr.bf16.mxu0 %v11146_v43 }
0x17ab   : > { %9573 = vmatmul.mubr.msk.bf16.vlgmr.msra.gmra.mrb[68].mxu0 %vm4673_vm1, %v7764_v23 }
0x17ac   : > { %8478 = vmatprep.mubr.bf16.mxu0 %v11482_v61  ;;  %8447 = vmatpush1.bf16.msra.mxu0 %v11144_v15 }
0x186e   : > { %v7946_v31 = vpop.f32.mrb[64].mxu0  ;;  %v7987_v28 = vpop.f32.mrb[60].mxu1 }
0x186f   : > { %v7948_v26 = vpop.f32.mrb[65].mxu0  ;;  %v7989_v4 = vpop.f32.mrb[61].mxu1 }
0x1870   : > { %v8041_v1 = vcombine.low %v7946_v31, %v7948_v26  ;;  %v8042_v2 = vcombine.low %v7987_v28, %v7989_v4  ;;  %v7950_v46 = vpop.f32.mrb[66].mxu0  ;;  %v7991_v32 = vpop.f32.mrb[62].mxu1  ;;  %v11165_v28 = vld [vmem:[#allocation11 + $0x550] ss:$24 sps:$4 sm:$0xff]  }
0x1871   : > { %v7951_v49 = vpop.f32.mrb[67].mxu0  ;;  %v7992_v59 = vpop.f32.mrb[63].mxu1  ;;  %v11173_v46 = vld [vmem:[#allocation11 + $0x5b4] ss:$24 sps:$4 sm:$0xff]   ;;  %v11171_v32 = vld [vmem:[#allocation11 + $0x5b0] ss:$24 sps:$4 sm:$0xff]  }
0x1872   : > { %v8050_v18 = vrot.slane %v8041_v1, %v12027_v48  ;;  %v8057_v33 = vrot.slane %v8042_v2, %v12027_v48  ;;  %v11170_v1 = vld [vmem:[#allocation11 + $0x584] ss:$24 sps:$4 sm:$0xff]   ;;  %v11168_v2 = vld [vmem:[#allocation11 + $0x580] ss:$24 sps:$4 sm:$0xff]  }
0x1873   : > { %v11176_v49 = vld [vmem:[#allocation11 + $0x5e4] ss:$24 sps:$4 sm:$0xff]   ;;  %v11174_v59 = vld [vmem:[#allocation11 + $0x5e0] ss:$24 sps:$4 sm:$0xff]  }
0x1874   : > { %v8065_v5 = vcombine.low %v8050_v18, %v8057_v33 }
0x1876   : > { %v8072_v60 = vrot.slane %v8065_v5, %v12027_v48  ;;  %v8161_v51 = vpop.f32.mrb[64].mxu1 }
0x1877   : > { %v9760_v38 = vpop.f32.mrb[65].mxu1  ;;  %v8165_v27 = vsel %vm4753_vm3, %v8161_v51, -inf }
0x1878   : > { %8166 = vmax.xlane.f32.xlu0 %v8165_v27 }
0x187e   : > { %v8028_v36 = vpop.f32.mrb[68].mxu0 }
0x187f   : > { %v8030_v12 = vpop.f32.mrb[69].mxu0 }
0x1880   : > { %v8043_v20 = vcombine.low %v8028_v36, %v8030_v12  ;;  %v8032_v56 = vpop.f32.mrb[70].mxu0 }
0x1881   : > { %v8033_v52 = vpop.f32.mrb[71].mxu0 }
0x1882   : > { %v8064_v7 = vrot.slane %v8043_v20, %v12027_v48 }
0x1884   : > { %v8079_v45 = vrot.slane %v8064_v7, %v12027_v48 }
0x1886   : > { %v8080_v47 = vcombine.low %v8072_v60, %v8079_v45 }
0x1888   : > { %v12242_v34 = vadd.f32 %v8080_v47, %v12211_v55  ;;  %v11152_v55 = vld [vmem:[#allocation11 + $0x57c] ss:$24 sps:$4 sm:$0xff]  }
0x1889   : > { %8448 = vmatprep.subr.bf16.mxu0 %v11152_v55 }
0x188a   : > { %8449 = vmatpush1.bf16.msra.mxu0 %v11150_v42 }
0x188b   : > { %8450 = vmatprep.subr.bf16.mxu0 %v11158_v3 }
0x188e   : > { %8451 = vmatpush1.bf16.msra.mxu0 %v11156_v0 }
0x188f   : > { %8452 = vmatprep.subr.bf16.mxu0 %v11164_v17 }
0x1892   : > { %8453 = vmatpush1.bf16.msra.mxu0 %v11162_v11 }
0x1905   : > { %v8167_v40 = vpop.xlane.xlu0 %8166 }
0x1906   : > { %v8168_v41 = vsub.f32 %v8161_v51, %v8167_v40 }
0x1908   : > { %v8169_v8 = vmul.f32 1.442695, %v8168_v41 }
0x190a   : > { %11205 = vpow2.f32 %v8169_v8 }
0x1914   : > { %v11206_v54 = vpop.eup %11205 }
0x1915   : > { %v8171_v57 = vsel %vm4753_vm3, %v11206_v54, 0.0 }
0x1916   : > { %8172 = vadd.xlane.f32.xlu1 %v8171_v57 }
0x1927   : > { %10021 = vrot.lane.b32.xlu1 %v10020_v30, %s11481_s11 }
0x19a3   : > { %v8173_v19 = vpop.xlane.xlu1 %8172 }
0x19a4   : > { %11207 = vrcp.f32 %v8173_v19 }
0x19a7   : > { %v10022_v63 = vpop.permute.xlu1 %10021 }
0x19a8   : > { %v10024_v39 = vunpack.i.h.bf16 %v10022_v63  ;;  %v10023_v30 = vunpack.i.l.bf16 %v10022_v63 }
0x19aa   : > { %v9822_v22 = vpack.c.bf16 %v10024_v39, %v10023_v30 }
0x19ac   : > { %9823 = vmatpush3.bf16.msra.mxu1 %v9822_v22 }
0x19ad   : > { %8405 = vmatprep.subr.bf16.mxu1 %v11143_v21 }
0x19ae   : > { %v11208_v23 = vpop.eup %11207 }
0x19af   : > { %v8175_v62 = vmul.f32 %v11208_v23, %v11206_v54 }
0x19b1   : > { %9766 = vmatmul.mubr.msk.f32.vlgmr.msra.gmra.mrb[66].mxu1 %vm4765_vm4, %v8175_v62 }
0x19b2   : > { %8406 = vmatpush1.bf16.msra.mxu1 %v11141_v24  ;;  %8437 = vmatprep.mubr.bf16.mxu1 %v11482_v61 }
0x19b3   : > { %8407 = vmatprep.subr.bf16.mxu1 %v11149_v25 }
0x19b6   : > { %8408 = vmatpush1.bf16.msra.mxu1 %v11147_v16 }
0x19b7   : > { %8409 = vmatprep.subr.bf16.mxu1 %v11155_v44 }
0x19ba   : > { %8410 = vmatpush1.bf16.msra.mxu1 %v11153_v29 }
0x19bb   : > { %8411 = vmatprep.subr.bf16.mxu1 %v11161_v6 }
0x19be   : > { %8412 = vmatpush1.bf16.msra.mxu1 %v11159_v58 }
0x19bf   : > { %8487 = vmatprep.subr.bf16.mxu1 %v11167_v50 }
0x1a84   : > { %v8253_v31 = vpop.f32.mrb[66].mxu1 }
0x1a85   : > { %v8257_v26 = vpack.c.bf16 %v8253_v31, %v8253_v31  ;;  %v9767_v4 = vpop.f32.mrb[67].mxu1 }
0x1a87   : > { %9602 = vmatmul.mubr.msk.bf16.vlgmr.msra.gmra.mrb[68].mxu1 %vm4673_vm1, %v8257_v26  ;;  %9603 = vmatmul.mubr.msk.bf16.vlgmr.msra.gmra.mrb[72].mxu0 %vm4673_vm1, %v8257_v26 }
0x1a88   : > { %8488 = vmatpush1.bf16.msra.mxu1 %v11165_v28  ;;  %8519 = vmatprep.mubr.bf16.mxu1 %v11482_v61 }
0x1a89   : > { %8489 = vmatprep.subr.bf16.mxu1 %v11170_v1 }
0x1a8c   : > { %8490 = vmatpush1.bf16.msra.mxu1 %v11168_v2 }
0x1a8d   : > { %8491 = vmatprep.subr.bf16.mxu1 %v11173_v46 }
0x1a90   : > { %8492 = vmatpush1.bf16.msra.mxu1 %v11171_v32 }
0x1a91   : > { %8493 = vmatprep.subr.bf16.mxu1 %v11176_v49 }
0x1a94   : > { %8494 = vmatpush1.bf16.msra.mxu1 %v11174_v59 }
0x1a97   : > { %9604 = vmatmul.mubr.msk.bf16.vlgmr.msra.gmra.mrb[72].mxu1 %vm4673_vm1, %v8257_v26 }
0x1b5a   : > { %v8439_v18 = vpop.f32.mrb[68].mxu1  ;;  %v8480_v33 = vpop.f32.mrb[72].mxu0 }
0x1b5b   : > { %v8441_v5 = vpop.f32.mrb[69].mxu1  ;;  %v8482_v60 = vpop.f32.mrb[73].mxu0 }
0x1b5c   : > { %v8534_v51 = vcombine.low %v8439_v18, %v8441_v5  ;;  %v8535_v38 = vcombine.low %v8480_v33, %v8482_v60  ;;  %v8443_v27 = vpop.f32.mrb[70].mxu1  ;;  %v8484_v61 = vpop.f32.mrb[74].mxu0 }
0x1b5d   : > { %v8444_v36 = vpop.f32.mrb[71].mxu1  ;;  %v8485_v12 = vpop.f32.mrb[75].mxu0 }
0x1b5e   : > { %v8543_v20 = vrot.slane %v8534_v51, %v12027_v48  ;;  %v8550_v56 = vrot.slane %v8535_v38, %v12027_v48 }
0x1b60   : > { %v8558_v52 = vcombine.low %v8543_v20, %v8550_v56 }
0x1b62   : > { %v8565_v7 = vrot.slane %v8558_v52, %v12027_v48 }
0x1b6a   : > { %v8521_v45 = vpop.f32.mrb[72].mxu1 }
0x1b6b   : > { %v8523_v47 = vpop.f32.mrb[73].mxu1 }
0x1b6c   : > { %v8536_v40 = vcombine.low %v8521_v45, %v8523_v47  ;;  %v8525_v41 = vpop.f32.mrb[74].mxu1 }
0x1b6d   : > { %v8526_v8 = vpop.f32.mrb[75].mxu1 }
0x1b6e   : > { %v8557_v54 = vrot.slane %v8536_v40, %v12027_v48 }
0x1b70   : > { %v8572_v57 = vrot.slane %v8557_v54, %v12027_v48 }
0x1b72   : > { %v8573_v15 = vcombine.low %v8565_v7, %v8572_v57 }
0x1b74   : > { %v8575_v43 = vadd.f32 %v8573_v15, %v12242_v34 }
0x1b76   : > { %v8580_v42 = vrot.slane %v8575_v43, %v398_v35  ;;  %v8584_v55 = vrot.slane %v8575_v43, %v402_v13  ;;  %v8588_v0 = vrot.slane %v8575_v43, %v406_v9  ;;  %v8592_v3 = vrot.slane %v8575_v43, %v410_v37 }
0x1b77   : > { %v8596_v35 = vrot.slane %v8575_v43, %v414_v53  ;;  %v8600_v13 = vrot.slane %v8575_v43, %v418_v14 }
0x1b78   : > { %8607 = vst [vmem:[%s392_s18] sm:$0xff] %v8580_v42  ;;  %8608 = vst [vmem:[%s392_s18 + $0x8] sm:$0xff] %v8584_v55 }
0x1b79   : > { %8609 = vst [vmem:[%s392_s18 + $0x10] sm:$0xff] %v8588_v0  ;;  %8610 = vst [vmem:[%s392_s18 + $0x18] sm:$0xff] %v8592_v3 }
0x1b7a   : > { %8613 = vst [vmem:[%s392_s18 + $0x30] sm:$0xff] %v8580_v42  ;;  %8614 = vst [vmem:[%s392_s18 + $0x38] sm:$0xff] %v8584_v55 }
0x1b7b   : > { %8615 = vst [vmem:[%s392_s18 + $0x40] sm:$0xff] %v8588_v0  ;;  %8616 = vst [vmem:[%s392_s18 + $0x48] sm:$0xff] %v8592_v3 }
0x1b7c   : > { %8611 = vst [vmem:[%s392_s18 + $0x20] sm:$0xff] %v8596_v35  ;;  %8612 = vst [vmem:[%s392_s18 + $0x28] sm:$0xff] %v8600_v13 }
0x1b7d   : > { %8617 = vst [vmem:[%s392_s18 + $0x50] sm:$0xff] %v8596_v35  ;;  %8618 = vst [vmem:[%s392_s18 + $0x58] sm:$0xff] %v8600_v13 }
0x1b7e   : > { %11395 = shalt.err (!%p11392_p1)
}
0x1b7f   : > { %s11396_s8 = scalar_lea.hbm %s12275_s30, 1536  ;;  %s11400_s11 = scalar_lea.hbm %s12332_s7, 3072 }
0x1b80   : > { %p11397_p11 = scmp.ne.s32.totalorder %s12275_s30, %s11396_s8  ;;  %p11401_p3 = scmp.lt.u32.totalorder %s12275_s30, %s12332_s7 }
0x1b81   : > { %p11402_p13 = scmp.lt.u32.totalorder %s11400_s11, %s11396_s8  ;;  %p11404_p5 = scmp.lt.u32.totalorder %s11396_s8, %s12275_s30 }
0x1b82   : > { %p11398_p8 = pnand %p11397_p11, %p12360_p2 }
0x1b83   : > { %p11403_p0 = por %p11402_p13, %p11401_p3 }
0x1b84   : > { %p11399_p12 = pneg %p11398_p8 }
0x1b85   : > { %p11405_p4 = por %p11404_p5, %p11403_p0 }
0x1b87   : > { %p11406_p10 = pnand %p11405_p4, %p11399_p12 }
0x1b89   : > { %11409 = shalt.err (!%p11406_p10)
}
0x1b8a   : > { %s11485_s13 = smov 768   ;;  %s11486_s18 = smov 48  }
0x1b8b   : > { %9899 = dma.vmem_to_hbm [thread:$0]  (%p12360_p2), %s12277_s10, 1536, %s12275_s30, %s8620_s23, %s11485_s13, %s11485_s13, %s11486_s18  }
0x1b8c PF: > { %s8648_s17 = sand.u32 1, %s11452_s24   ;;  %p12361_p6 = scmp.ne.s32.totalorder %s12347_s16, 0 }
0x1b8d   : > { %p12362_p7 = scmp.ge.s32.totalorder %s11464_s27, 2  ;;  %s8649_s3 = scalar_lea.sflag [#allocation4], %s8648_s17 }
0x1b8f   : > { %p9922_p9 = pnand %p12362_p7, %p12361_p6 }
0x1b91   : > { %11447 = dma.done.wait (!%p9922_p9), %s8649_s3, 1536  }
0x1b92   : > { %11449 = vsyncadd (!%p9922_p9), %s8649_s3, 4294965760  ;;  %p25_p1 = scmp.ge.s32.totalorder %s11676_s29, 4   ;;  %s12363_s24 = smov %s11456_s25 }
0x1b93   : > { %s12364_s25 = smov %s11460_s26  ;;  %s12365_s26 = smov %s11687_s14 }
0x1b94   : > { %s12366_s27 = smov %s11676_s29  ;;  %27 = sbr.rel (!%p25_p1) target bundleno = 13 (0xd), region = 122 }
0x1b9b   :  { %8654 = vsyncpa [#allocation3], 1 }
0x1b9c   :  { %8656 = vsyncpa [#allocation3 + $0x1], 1 }
0x1b9d   :  { %8657 = vsyncpa [#allocation6], 1 }
0x1b9e   :  { %8659 = vsyncpa [#allocation6 + $0x1], 1 }
0x1b9f   :  { %8660 = vsyncpa [#allocation9], 1 }
0x1ba0   :  { %8661 = vsyncpa [#allocation12], 1 }
0x1ba1   :  { %8662 = vsyncpa [#allocation4], 1 }
0x1ba2   :  { %8664 = vsyncpa [#allocation4 + $0x1], 1 }

</bundles_post_ra>
